<compile_context>
chip_gen: v6e
topology: v6e:2x2x1
jax: 0.10.0
libtpu: 0.0.40
codegen_flags: <defaults>
</compile_context>

<pallas_src>
import functools
import math

import jax
import jax.numpy as jnp
from jax.experimental import pallas as pl
from jax.experimental.pallas import tpu as pltpu

# ----------------------------- small ViT config -----------------------------
BATCH = 2
C_IN = 3
IMG = 16          # image_size
PATCH = 8         # patch_size
N_SIDE = IMG // PATCH
N_PATCHES = N_SIDE * N_SIDE          # 4
SEQ = N_PATCHES + 1                  # +1 CLS token -> 5
KP = C_IN * PATCH * PATCH            # flattened patch dim = 192
HIDDEN = 32
HEADS = 4
HEAD_DIM = HIDDEN // HEADS           # 8
MLP = 64
LAYERS = 2
LN_EPS = 1e-6                        # torchvision ViT LayerNorm eps
OUT_LANES = 128                      # lane-dense output width (sliced on host)

# ---- packed f32 parameter table layout (one DMA instead of ~12 tiny ones) ---
# rows 0 .. SEQ-1            : tok_bias (CLS+pos / conv_b+pos folded), cols 0:D
# rows SEQ+8l .. SEQ+8l+7    : layer l: ln1_w, ln1_b, bqkv(0:3D), bo,
#                              ln2_w, ln2_b, fc1_b(0:MLP), fc2_b
# rows SEQ+8L, SEQ+8L+1      : final-LN weight, bias
_PV_LAYER0 = SEQ
_PV_LNF = SEQ + 8 * LAYERS
P_ROWS = ((_PV_LNF + 2 + 7) // 8) * 8    # pad row count to a sublane multiple


# ------------------------------ kernel helpers -------------------------------
def _layer_norm(x, w, b):
    # LayerNorm over last dim, biased variance (matches torch.nn.LayerNorm).
    mean = jnp.mean(x, axis=-1, keepdims=True)
    var = jnp.mean(jnp.square(x - mean), axis=-1, keepdims=True)
    return (x - mean) * jax.lax.rsqrt(var + LN_EPS) * w + b


def _gelu_tanh(x):
    # TODO(synk): torchvision ViT MLP uses exact (erf) GELU; tanh approximation
    # kept for guaranteed Mosaic lowering (difference ~1e-3 max).
    c = math.sqrt(2.0 / math.pi)
    return 0.5 * x * (1.0 + jnp.tanh(c * (x + 0.044715 * x * x * x)))


def _bf16(x):
    return x.astype(jnp.bfloat16)


# --------------------------- fused whole-network kernel ----------------------
def _vit_kernel(bt, patches_ref, conv_w_ref, wqkv_ref, wo_ref,
                fc1_w_ref, fc2_w_ref, pvec_ref, o_ref):
    # patches_ref : (bt*SEQ, KP) bf16, CLS rows are zero
    # conv_w_ref  : (KP, D) bf16
    # wqkv_ref    : (L, D, 3D) bf16        (1/sqrt(head_dim) folded into Wq)
    # wo_ref      : (L, D, D) bf16
    # fc1_w_ref   : (L, D, MLP) bf16
    # fc2_w_ref   : (L, MLP, D) bf16
    # pvec_ref    : (P_ROWS, 128) f32 packed small parameters
    # o_ref       : (bt, 128) f32 lane-dense output (CLS features in cols 0:D)

    # ---- patch embed + CLS + pos: ONE (bt*SEQ, KP) @ (KP, D) MXU matmul ----
    tb = pvec_ref[0:SEQ, 0:HIDDEN]                         # (SEQ, D)
    tok_bias = jnp.concatenate([tb] * bt, axis=0)          # (bt*SEQ, D)
    x = jnp.dot(patches_ref[...], conv_w_ref[...],
                preferred_element_type=jnp.float32) + tok_bias   # (bt*SEQ, D) f32

    for l in range(LAYERS):                                # static unroll (L=2)
        base = _PV_LAYER0 + 8 * l
        ln1_w = pvec_ref[base + 0:base + 1, 0:HIDDEN]
        ln1_b = pvec_ref[base + 1:base + 2, 0:HIDDEN]
        bqkv = pvec_ref[base + 2:base + 3, 0:3 * HIDDEN]
        bo = pvec_ref[base + 3:base + 4, 0:HIDDEN]
        ln2_w = pvec_ref[base + 4:base + 5, 0:HIDDEN]
        ln2_b = pvec_ref[base + 5:base + 6, 0:HIDDEN]
        fc1_b = pvec_ref[base + 6:base + 7, 0:MLP]
        fc2_b = pvec_ref[base + 7:base + 8, 0:HIDDEN]

        # ---------- multi-head self-attention (pre-LN, dropout p=0) ---------
        y = _layer_norm(x, ln1_w, ln1_b)
        qkv = jnp.dot(_bf16(y), wqkv_ref[l],
                      preferred_element_type=jnp.float32) + bqkv   # (bt*SEQ, 3D)
        q = qkv[:, 0:HIDDEN]                     # scale already folded into Wq
        k = qkv[:, HIDDEN:2 * HIDDEN]
        v = qkv[:, 2 * HIDDEN:3 * HIDDEN]

        # Attention core stays per-image; the tiny score/PV products run on the
        # VPU (broadcast-multiply + small reductions) — MXU is reserved for the
        # patch-embed / QKV / Wo / MLP matmuls above and below.
        per_image = []
        for b in range(bt):                      # static unroll over batch tile
            r0 = b * SEQ
            head_out = []
            for h in range(HEADS):               # static unroll over heads
                lo = h * HEAD_DIM
                qh = q[r0:r0 + SEQ, lo:lo + HEAD_DIM]      # (SEQ, hd)
                kh = k[r0:r0 + SEQ, lo:lo + HEAD_DIM]
                vh = v[r0:r0 + SEQ, lo:lo + HEAD_DIM]
                # scores (SEQ, SEQ): per-key broadcast-multiply + lane reduce
                s = jnp.concatenate(
                    [jnp.sum(qh * kh[kk:kk + 1, :], axis=-1, keepdims=True)
                     for kk in range(SEQ)], axis=-1)
                s = s - jnp.max(s, axis=-1, keepdims=True)
                p = jnp.exp(s)
                p = p / jnp.sum(p, axis=-1, keepdims=True)  # exact softmax
                # P @ V (SEQ, hd) as a sum of rank-1 outer products on the VPU
                hv = p[:, 0:1] * vh[0:1, :]
                for kk in range(1, SEQ):
                    hv = hv + p[:, kk:kk + 1] * vh[kk:kk + 1, :]
                head_out.append(hv)
            per_image.append(jnp.concatenate(head_out, axis=-1))   # (SEQ, D)
        attn = jnp.concatenate(per_image, axis=0)                  # (bt*SEQ, D)

        # single output projection for the whole batch tile (host-cast bf16 wo)
        x = x + jnp.dot(_bf16(attn), wo_ref[l],
                        preferred_element_type=jnp.float32) + bo

        # ------------------------ MLP block (pre-LN) ------------------------
        z = _layer_norm(x, ln2_w, ln2_b)
        h1 = jnp.dot(_bf16(z), fc1_w_ref[l],
                     preferred_element_type=jnp.float32) + fc1_b
        h1 = _gelu_tanh(h1)
        x = x + jnp.dot(_bf16(h1), fc2_w_ref[l],
                        preferred_element_type=jnp.float32) + fc2_b

    # ---- final LayerNorm on the CLS rows only; lane-dense 128-wide store ----
    lnf_w = pvec_ref[_PV_LNF:_PV_LNF + 1, 0:HIDDEN]
    lnf_b = pvec_ref[_PV_LNF + 1:_PV_LNF + 2, 0:HIDDEN]
    cls = jnp.concatenate([x[b * SEQ:b * SEQ + 1, :] for b in range(bt)], axis=0)
    cls = _layer_norm(cls, lnf_w, lnf_b)                    # (bt, D)
    o_ref[...] = jnp.concatenate(
        [cls, jnp.zeros((bt, OUT_LANES - HIDDEN), jnp.float32)], axis=-1)


def vit_forward_fused(patch_rows, params, b_tile):
    n_tiles = patch_rows.shape[0] // (b_tile * SEQ)
    weights = [params["conv_w"], params["wqkv"], params["wo"],
               params["fc1_w"], params["fc2_w"], params["pvec"]]
    in_specs = [
        pl.BlockSpec((b_tile * SEQ, KP), lambda i: (i, 0)),          # patches
        pl.BlockSpec((KP, HIDDEN), lambda i: (0, 0)),                # conv_w
        pl.BlockSpec((LAYERS, HIDDEN, 3 * HIDDEN), lambda i: (0, 0, 0)),
        pl.BlockSpec((LAYERS, HIDDEN, HIDDEN), lambda i: (0, 0, 0)),
        pl.BlockSpec((LAYERS, HIDDEN, MLP), lambda i: (0, 0, 0)),
        pl.BlockSpec((LAYERS, MLP, HIDDEN), lambda i: (0, 0, 0)),
        pl.BlockSpec((P_ROWS, OUT_LANES), lambda i: (0, 0)),         # packed f32
    ]
    return pl.pallas_call(
        functools.partial(_vit_kernel, b_tile),
        out_shape=jax.ShapeDtypeStruct((n_tiles * b_tile, OUT_LANES),
                                       jnp.float32),
        grid=(n_tiles,),
        in_specs=in_specs,
        out_specs=pl.BlockSpec((b_tile, OUT_LANES), lambda i: (i, 0)),
        compiler_params=pltpu.CompilerParams(
            dimension_semantics=("parallel",)),   # v7x: batch tiles across TCs
    )(patch_rows, *weights)


# --------------------------- deterministic parameters ------------------------
def init_params(key):
    keys = jax.random.split(key, 4 + LAYERS)

    def nrm(k, shape, std=0.02):
        return (std * jax.random.normal(k, shape)).astype(jnp.float32)

    # conv_proj: Conv2d(3, HIDDEN, kernel=PATCH, stride=PATCH)
    conv_w = nrm(keys[0], (HIDDEN, C_IN, PATCH, PATCH))
    conv_b = nrm(keys[1], (HIDDEN,))
    class_token = nrm(keys[2], (HIDDEN,))
    pos_embed = nrm(keys[3], (SEQ, HIDDEN))

    scale = 1.0 / math.sqrt(HEAD_DIM)
    ones = jnp.ones((HIDDEN,), jnp.float32)
    zeros = jnp.zeros((HIDDEN,), jnp.float32)

    pvec = jnp.zeros((P_ROWS, OUT_LANES), jnp.float32)
    # CLS token + pos embedding + conv bias folded into one additive table.
    tok_bias = jnp.concatenate(
        [(class_token + pos_embed[0])[None, :],
         conv_b[None, :] + pos_embed[1:]], axis=0)          # (SEQ, D)
    pvec = pvec.at[0:SEQ, 0:HIDDEN].set(tok_bias)

    wqkv, wo, fc1_w, fc2_w = [], [], [], []
    for l in range(LAYERS):
        lk = jax.random.split(keys[4 + l], 8)
        in_proj_w = nrm(lk[0], (3 * HIDDEN, HIDDEN))   # torch MHA in_proj_weight
        in_proj_b = nrm(lk[1], (3 * HIDDEN,))
        out_proj_w = nrm(lk[2], (HIDDEN, HIDDEN))
        out_proj_b = nrm(lk[3], (HIDDEN,))
        f1w = nrm(lk[4], (MLP, HIDDEN))
        f1b = nrm(lk[5], (MLP,))
        f2w = nrm(lk[6], (HIDDEN, MLP))
        f2b = nrm(lk[7], (HIDDEN,))

        # q = y @ Wq.T etc.; fold 1/sqrt(head_dim) into the Q projection.
        wq_t = in_proj_w[:HIDDEN].T * scale
        wk_t = in_proj_w[HIDDEN:2 * HIDDEN].T
        wv_t = in_proj_w[2 * HIDDEN:].T
        bq = in_proj_b[:HIDDEN] * scale
        bk = in_proj_b[HIDDEN:2 * HIDDEN]
        bv = in_proj_b[2 * HIDDEN:]

        wqkv.append(jnp.concatenate([wq_t, wk_t, wv_t], axis=1))   # (D, 3D)
        wo.append(out_proj_w.T)                                    # (D, D)
        fc1_w.append(f1w.T)                                        # (D, MLP)
        fc2_w.append(f2w.T)                                        # (MLP, D)

        base = _PV_LAYER0 + 8 * l
        pvec = pvec.at[base + 0, 0:HIDDEN].set(ones)               # ln1_w
        pvec = pvec.at[base + 1, 0:HIDDEN].set(zeros)              # ln1_b
        pvec = pvec.at[base + 2, 0:3 * HIDDEN].set(jnp.concatenate([bq, bk, bv]))
        pvec = pvec.at[base + 3, 0:HIDDEN].set(out_proj_b)         # bo
        pvec = pvec.at[base + 4, 0:HIDDEN].set(ones)               # ln2_w
        pvec = pvec.at[base + 5, 0:HIDDEN].set(zeros)              # ln2_b
        pvec = pvec.at[base + 6, 0:MLP].set(f1b)                   # fc1_b
        pvec = pvec.at[base + 7, 0:HIDDEN].set(f2b)                # fc2_b

    pvec = pvec.at[_PV_LNF, 0:HIDDEN].set(ones)                    # final LN w
    pvec = pvec.at[_PV_LNF + 1, 0:HIDDEN].set(zeros)               # final LN b

    # All matmul weights pre-cast to bf16 on the host (no in-kernel weight casts).
    return dict(
        conv_w=conv_w.reshape(HIDDEN, KP).T.astype(jnp.bfloat16),
        wqkv=jnp.stack(wqkv).astype(jnp.bfloat16),
        wo=jnp.stack(wo).astype(jnp.bfloat16),
        fc1_w=jnp.stack(fc1_w).astype(jnp.bfloat16),
        fc2_w=jnp.stack(fc2_w).astype(jnp.bfloat16),
        pvec=pvec,
    )


# ------------------------------- forward (glue) -------------------------------
def feature_extractor_forward(params, x, b_tile=None):
    # x: (N, C, H, W) float32 -- same NCHW convention as the PyTorch module.
    assert x.ndim == 4
    n = x.shape[0]
    if b_tile is None:
        b_tile = n                    # tiny batch: one grid step for the batch
    assert n % b_tile == 0, "pad batch to a multiple of b_tile"
    # TODO(synk): for large batches pick b_tile so b_tile*SEQ lands in the
    # 64-256 row range (MXU fill; b_tile*SEQ a multiple of 8) — the grid then
    # splits batch tiles across v7x TensorCores via the "parallel" axis.

    # _process_input: conv_proj (kernel=stride=PATCH) == matmul over patches,
    # patch order (gy, gx) row-major, inner order (c, i, j) -- matches torchvision.
    patches = x.reshape(n, C_IN, N_SIDE, PATCH, N_SIDE, PATCH)
    patches = patches.transpose(0, 2, 4, 1, 3, 5).reshape(n, N_PATCHES, KP)
    # Zero row per image for the CLS slot so the single stacked patch-embed
    # matmul yields the full (n*SEQ, D) token block.
    rows = jnp.concatenate(
        [jnp.zeros((n, 1, KP), patches.dtype), patches], axis=1)
    rows = rows.reshape(n * SEQ, KP).astype(jnp.bfloat16)

    out = vit_forward_fused(rows, params, b_tile)     # (n, 128) lane-dense
    return out[:, :HIDDEN]                            # CLS features (n, D)


if __name__ == "__main__":
    key = jax.random.PRNGKey(0)
    pkey, xkey = jax.random.split(key)
    params = init_params(pkey)
    x = jax.random.normal(xkey, (BATCH, C_IN, IMG, IMG), dtype=jnp.float32)

    feats = feature_extractor_forward(params, x)
    feats = jax.block_until_ready(feats)
    assert feats.shape == (BATCH, HIDDEN)
    assert bool(jnp.all(jnp.isfinite(feats)))
    print("KERNEL_OK")
</pallas_src>

<mosaic_0001>
module attributes {stable_mosaic.version = 11 : i64} {
  func.func @_vit_kernel(%arg0: i32, %arg1: memref<10x192xbf16, #tpu.memory_space<vmem>>, %arg2: memref<192x32xbf16, #tpu.memory_space<vmem>>, %arg3: memref<2x32x96xbf16, #tpu.memory_space<vmem>>, %arg4: memref<2x32x32xbf16, #tpu.memory_space<vmem>>, %arg5: memref<2x32x64xbf16, #tpu.memory_space<vmem>>, %arg6: memref<2x64x32xbf16, #tpu.memory_space<vmem>>, %arg7: memref<24x128xf32, #tpu.memory_space<vmem>>, %arg8: memref<2x128xf32, #tpu.memory_space<vmem>>) attributes {dimension_semantics = [#tpu.dimension_semantics<parallel>], iteration_bounds = array<i64: 1>, scalar_prefetch = 0 : i64, scratch_operands = 0 : i64, tpu.core_type = #tpu.core_type<tc>, window_params = [{transform_indices = @transform_0, window_bounds = array<i64: 10, 192>}, {pipeline_mode = #tpu.pipeline_mode<synchronous>, transform_indices = @transform_1, window_bounds = array<i64: 192, 32>}, {pipeline_mode = #tpu.pipeline_mode<synchronous>, transform_indices = @transform_2, window_bounds = array<i64: 2, 32, 96>}, {pipeline_mode = #tpu.pipeline_mode<synchronous>, transform_indices = @transform_3, window_bounds = array<i64: 2, 32, 32>}, {pipeline_mode = #tpu.pipeline_mode<synchronous>, transform_indices = @transform_4, window_bounds = array<i64: 2, 32, 64>}, {pipeline_mode = #tpu.pipeline_mode<synchronous>, transform_indices = @transform_5, window_bounds = array<i64: 2, 64, 32>}, {pipeline_mode = #tpu.pipeline_mode<synchronous>, transform_indices = @transform_6, window_bounds = array<i64: 24, 128>}, {transform_indices = @transform_7, window_bounds = array<i64: 2, 128>}]} {
    %c0 = arith.constant 0 : index
    %c0_0 = arith.constant 0 : index
    %0 = vector.load %arg7[%c0, %c0_0] : memref<24x128xf32, #tpu.memory_space<vmem>>, vector<5x32xf32>
    %1 = tpu.concatenate %0, %0 in 0 : vector<5x32xf32>, vector<5x32xf32> -> vector<10x32xf32>
    %c0_1 = arith.constant 0 : index
    %c0_2 = arith.constant 0 : index
    %2 = vector.load %arg1[%c0_1, %c0_2] : memref<10x192xbf16, #tpu.memory_space<vmem>>, vector<10x192xbf16>
    %c0_3 = arith.constant 0 : index
    %c0_4 = arith.constant 0 : index
    %3 = vector.load %arg2[%c0_3, %c0_4] : memref<192x32xbf16, #tpu.memory_space<vmem>>, vector<192x32xbf16>
    %cst = arith.constant dense<0.000000e+00> : vector<10x32xf32>
    %4 = tpu.matmul %2, %3, %cst {dimension_numbers = #tpu.dot_dimension_numbers<[1], [0], [0], [1], [0, 0, 1, 1], [], []>} : vector<10x192xbf16>, vector<192x32xbf16>, vector<10x32xf32> -> vector<10x32xf32>
    %5 = arith.addf %4, %1 : vector<10x32xf32>
    %c5 = arith.constant 5 : index
    %c0_5 = arith.constant 0 : index
    %6 = vector.load %arg7[%c5, %c0_5] : memref<24x128xf32, #tpu.memory_space<vmem>>, vector<1x32xf32>
    %c6 = arith.constant 6 : index
    %c0_6 = arith.constant 0 : index
    %7 = vector.load %arg7[%c6, %c0_6] : memref<24x128xf32, #tpu.memory_space<vmem>>, vector<1x32xf32>
    %c7 = arith.constant 7 : index
    %c0_7 = arith.constant 0 : index
    %8 = vector.load %arg7[%c7, %c0_7] : memref<24x128xf32, #tpu.memory_space<vmem>>, vector<1x96xf32>
    %c8 = arith.constant 8 : index
    %c0_8 = arith.constant 0 : index
    %9 = vector.load %arg7[%c8, %c0_8] : memref<24x128xf32, #tpu.memory_space<vmem>>, vector<1x32xf32>
    %c9 = arith.constant 9 : index
    %c0_9 = arith.constant 0 : index
    %10 = vector.load %arg7[%c9, %c0_9] : memref<24x128xf32, #tpu.memory_space<vmem>>, vector<1x32xf32>
    %c10 = arith.constant 10 : index
    %c0_10 = arith.constant 0 : index
    %11 = vector.load %arg7[%c10, %c0_10] : memref<24x128xf32, #tpu.memory_space<vmem>>, vector<1x32xf32>
    %c11 = arith.constant 11 : index
    %c0_11 = arith.constant 0 : index
    %12 = vector.load %arg7[%c11, %c0_11] : memref<24x128xf32, #tpu.memory_space<vmem>>, vector<1x64xf32>
    %c12 = arith.constant 12 : index
    %c0_12 = arith.constant 0 : index
    %13 = vector.load %arg7[%c12, %c0_12] : memref<24x128xf32, #tpu.memory_space<vmem>>, vector<1x32xf32>
    %cst_13 = arith.constant dense<0.000000e+00> : vector<10xf32>
    %14 = vector.multi_reduction <add>, %5, %cst_13 [1] : vector<10x32xf32> to vector<10xf32>
    %15 = vector.shape_cast %14 : vector<10xf32> to vector<10x1xf32>
    %cst_14 = arith.constant 3.200000e+01 : f32
    %16 = vector.broadcast %cst_14 : f32 to vector<10x1xf32>
    %17 = arith.divf %15, %16 : vector<10x1xf32>
    %18 = vector.broadcast %17 : vector<10x1xf32> to vector<10x32xf32>
    %19 = arith.subf %5, %18 : vector<10x32xf32>
    %20 = arith.mulf %19, %19 : vector<10x32xf32>
    %cst_15 = arith.constant dense<0.000000e+00> : vector<10xf32>
    %21 = vector.multi_reduction <add>, %20, %cst_15 [1] : vector<10x32xf32> to vector<10xf32>
    %22 = vector.shape_cast %21 : vector<10xf32> to vector<10x1xf32>
    %cst_16 = arith.constant 3.200000e+01 : f32
    %23 = vector.broadcast %cst_16 : f32 to vector<10x1xf32>
    %24 = arith.divf %22, %23 : vector<10x1xf32>
    %25 = vector.broadcast %17 : vector<10x1xf32> to vector<10x32xf32>
    %26 = arith.subf %5, %25 : vector<10x32xf32>
    %cst_17 = arith.constant 9.99999997E-7 : f32
    %27 = vector.broadcast %cst_17 : f32 to vector<10x1xf32>
    %28 = arith.addf %24, %27 : vector<10x1xf32>
    %29 = math.rsqrt %28 : vector<10x1xf32>
    %30 = vector.broadcast %29 : vector<10x1xf32> to vector<10x32xf32>
    %31 = arith.mulf %26, %30 : vector<10x32xf32>
    %32 = vector.broadcast %6 : vector<1x32xf32> to vector<10x32xf32>
    %33 = arith.mulf %31, %32 : vector<10x32xf32>
    %34 = vector.broadcast %7 : vector<1x32xf32> to vector<10x32xf32>
    %35 = arith.addf %33, %34 : vector<10x32xf32>
    %36 = arith.truncf %35 : vector<10x32xf32> to vector<10x32xbf16>
    %c0_18 = arith.constant 0 : index
    %c0_19 = arith.constant 0 : index
    %c0_20 = arith.constant 0 : index
    %37 = vector.load %arg3[%c0_18, %c0_19, %c0_20] : memref<2x32x96xbf16, #tpu.memory_space<vmem>>, vector<1x32x96xbf16>
    %38 = vector.shape_cast %37 : vector<1x32x96xbf16> to vector<32x96xbf16>
    %cst_21 = arith.constant dense<0.000000e+00> : vector<10x96xf32>
    %39 = tpu.matmul %36, %38, %cst_21 {dimension_numbers = #tpu.dot_dimension_numbers<[1], [0], [0], [1], [0, 0, 1, 1], [], []>} : vector<10x32xbf16>, vector<32x96xbf16>, vector<10x96xf32> -> vector<10x96xf32>
    %40 = vector.broadcast %8 : vector<1x96xf32> to vector<10x96xf32>
    %41 = arith.addf %39, %40 : vector<10x96xf32>
    %42 = vector.extract_strided_slice %41 {offsets = [0, 0], sizes = [10, 32], strides = [1, 1]} : vector<10x96xf32> to vector<10x32xf32>
    %43 = vector.extract_strided_slice %41 {offsets = [0, 32], sizes = [10, 32], strides = [1, 1]} : vector<10x96xf32> to vector<10x32xf32>
    %44 = vector.extract_strided_slice %41 {offsets = [0, 64], sizes = [10, 32], strides = [1, 1]} : vector<10x96xf32> to vector<10x32xf32>
    %45 = vector.extract_strided_slice %42 {offsets = [0, 0], sizes = [5, 8], strides = [1, 1]} : vector<10x32xf32> to vector<5x8xf32>
    %46 = vector.extract_strided_slice %43 {offsets = [0, 0], sizes = [5, 8], strides = [1, 1]} : vector<10x32xf32> to vector<5x8xf32>
    %47 = vector.extract_strided_slice %44 {offsets = [0, 0], sizes = [5, 8], strides = [1, 1]} : vector<10x32xf32> to vector<5x8xf32>
    %48 = vector.extract_strided_slice %46 {offsets = [0, 0], sizes = [1, 8], strides = [1, 1]} : vector<5x8xf32> to vector<1x8xf32>
    %49 = vector.broadcast %48 : vector<1x8xf32> to vector<5x8xf32>
    %50 = arith.mulf %45, %49 : vector<5x8xf32>
    %cst_22 = arith.constant dense<0.000000e+00> : vector<5xf32>
    %51 = vector.multi_reduction <add>, %50, %cst_22 [1] : vector<5x8xf32> to vector<5xf32>
    %52 = vector.shape_cast %51 : vector<5xf32> to vector<5x1xf32>
    %53 = vector.extract_strided_slice %46 {offsets = [1, 0], sizes = [1, 8], strides = [1, 1]} : vector<5x8xf32> to vector<1x8xf32>
    %54 = vector.broadcast %53 : vector<1x8xf32> to vector<5x8xf32>
    %55 = arith.mulf %45, %54 : vector<5x8xf32>
    %cst_23 = arith.constant dense<0.000000e+00> : vector<5xf32>
    %56 = vector.multi_reduction <add>, %55, %cst_23 [1] : vector<5x8xf32> to vector<5xf32>
    %57 = vector.shape_cast %56 : vector<5xf32> to vector<5x1xf32>
    %58 = vector.extract_strided_slice %46 {offsets = [2, 0], sizes = [1, 8], strides = [1, 1]} : vector<5x8xf32> to vector<1x8xf32>
    %59 = vector.broadcast %58 : vector<1x8xf32> to vector<5x8xf32>
    %60 = arith.mulf %45, %59 : vector<5x8xf32>
    %cst_24 = arith.constant dense<0.000000e+00> : vector<5xf32>
    %61 = vector.multi_reduction <add>, %60, %cst_24 [1] : vector<5x8xf32> to vector<5xf32>
    %62 = vector.shape_cast %61 : vector<5xf32> to vector<5x1xf32>
    %63 = vector.extract_strided_slice %46 {offsets = [3, 0], sizes = [1, 8], strides = [1, 1]} : vector<5x8xf32> to vector<1x8xf32>
    %64 = vector.broadcast %63 : vector<1x8xf32> to vector<5x8xf32>
    %65 = arith.mulf %45, %64 : vector<5x8xf32>
    %cst_25 = arith.constant dense<0.000000e+00> : vector<5xf32>
    %66 = vector.multi_reduction <add>, %65, %cst_25 [1] : vector<5x8xf32> to vector<5xf32>
    %67 = vector.shape_cast %66 : vector<5xf32> to vector<5x1xf32>
    %68 = vector.extract_strided_slice %46 {offsets = [4, 0], sizes = [1, 8], strides = [1, 1]} : vector<5x8xf32> to vector<1x8xf32>
    %69 = vector.broadcast %68 : vector<1x8xf32> to vector<5x8xf32>
    %70 = arith.mulf %45, %69 : vector<5x8xf32>
    %cst_26 = arith.constant dense<0.000000e+00> : vector<5xf32>
    %71 = vector.multi_reduction <add>, %70, %cst_26 [1] : vector<5x8xf32> to vector<5xf32>
    %72 = vector.shape_cast %71 : vector<5xf32> to vector<5x1xf32>
    %73 = tpu.concatenate %52, %57, %62, %67, %72 in 1 : vector<5x1xf32>, vector<5x1xf32>, vector<5x1xf32>, vector<5x1xf32>, vector<5x1xf32> -> vector<5x5xf32>
    %cst_27 = arith.constant dense<0xFF800000> : vector<5xf32>
    %74 = vector.multi_reduction <maximumf>, %73, %cst_27 [1] : vector<5x5xf32> to vector<5xf32>
    %75 = vector.shape_cast %74 : vector<5xf32> to vector<5x1xf32>
    %76 = vector.broadcast %75 : vector<5x1xf32> to vector<5x5xf32>
    %77 = arith.subf %73, %76 : vector<5x5xf32>
    %78 = math.exp %77 : vector<5x5xf32>
    %cst_28 = arith.constant dense<0.000000e+00> : vector<5xf32>
    %79 = vector.multi_reduction <add>, %78, %cst_28 [1] : vector<5x5xf32> to vector<5xf32>
    %80 = vector.shape_cast %79 : vector<5xf32> to vector<5x1xf32>
    %81 = vector.broadcast %80 : vector<5x1xf32> to vector<5x5xf32>
    %82 = arith.divf %78, %81 : vector<5x5xf32>
    %83 = vector.extract_strided_slice %82 {offsets = [0, 0], sizes = [5, 1], strides = [1, 1]} : vector<5x5xf32> to vector<5x1xf32>
    %84 = vector.extract_strided_slice %47 {offsets = [0, 0], sizes = [1, 8], strides = [1, 1]} : vector<5x8xf32> to vector<1x8xf32>
    %85 = vector.broadcast %83 : vector<5x1xf32> to vector<5x8xf32>
    %86 = vector.broadcast %84 : vector<1x8xf32> to vector<5x8xf32>
    %87 = arith.mulf %85, %86 : vector<5x8xf32>
    %88 = vector.extract_strided_slice %82 {offsets = [0, 1], sizes = [5, 1], strides = [1, 1]} : vector<5x5xf32> to vector<5x1xf32>
    %89 = vector.extract_strided_slice %47 {offsets = [1, 0], sizes = [1, 8], strides = [1, 1]} : vector<5x8xf32> to vector<1x8xf32>
    %90 = vector.broadcast %88 : vector<5x1xf32> to vector<5x8xf32>
    %91 = vector.broadcast %89 : vector<1x8xf32> to vector<5x8xf32>
    %92 = arith.mulf %90, %91 : vector<5x8xf32>
    %93 = arith.addf %87, %92 : vector<5x8xf32>
    %94 = vector.extract_strided_slice %82 {offsets = [0, 2], sizes = [5, 1], strides = [1, 1]} : vector<5x5xf32> to vector<5x1xf32>
    %95 = vector.extract_strided_slice %47 {offsets = [2, 0], sizes = [1, 8], strides = [1, 1]} : vector<5x8xf32> to vector<1x8xf32>
    %96 = vector.broadcast %94 : vector<5x1xf32> to vector<5x8xf32>
    %97 = vector.broadcast %95 : vector<1x8xf32> to vector<5x8xf32>
    %98 = arith.mulf %96, %97 : vector<5x8xf32>
    %99 = arith.addf %93, %98 : vector<5x8xf32>
    %100 = vector.extract_strided_slice %82 {offsets = [0, 3], sizes = [5, 1], strides = [1, 1]} : vector<5x5xf32> to vector<5x1xf32>
    %101 = vector.extract_strided_slice %47 {offsets = [3, 0], sizes = [1, 8], strides = [1, 1]} : vector<5x8xf32> to vector<1x8xf32>
    %102 = vector.broadcast %100 : vector<5x1xf32> to vector<5x8xf32>
    %103 = vector.broadcast %101 : vector<1x8xf32> to vector<5x8xf32>
    %104 = arith.mulf %102, %103 : vector<5x8xf32>
    %105 = arith.addf %99, %104 : vector<5x8xf32>
    %106 = vector.extract_strided_slice %82 {offsets = [0, 4], sizes = [5, 1], strides = [1, 1]} : vector<5x5xf32> to vector<5x1xf32>
    %107 = vector.extract_strided_slice %47 {offsets = [4, 0], sizes = [1, 8], strides = [1, 1]} : vector<5x8xf32> to vector<1x8xf32>
    %108 = vector.broadcast %106 : vector<5x1xf32> to vector<5x8xf32>
    %109 = vector.broadcast %107 : vector<1x8xf32> to vector<5x8xf32>
    %110 = arith.mulf %108, %109 : vector<5x8xf32>
    %111 = arith.addf %105, %110 : vector<5x8xf32>
    %112 = vector.extract_strided_slice %42 {offsets = [0, 8], sizes = [5, 8], strides = [1, 1]} : vector<10x32xf32> to vector<5x8xf32>
    %113 = vector.extract_strided_slice %43 {offsets = [0, 8], sizes = [5, 8], strides = [1, 1]} : vector<10x32xf32> to vector<5x8xf32>
    %114 = vector.extract_strided_slice %44 {offsets = [0, 8], sizes = [5, 8], strides = [1, 1]} : vector<10x32xf32> to vector<5x8xf32>
    %115 = vector.extract_strided_slice %113 {offsets = [0, 0], sizes = [1, 8], strides = [1, 1]} : vector<5x8xf32> to vector<1x8xf32>
    %116 = vector.broadcast %115 : vector<1x8xf32> to vector<5x8xf32>
    %117 = arith.mulf %112, %116 : vector<5x8xf32>
    %cst_29 = arith.constant dense<0.000000e+00> : vector<5xf32>
    %118 = vector.multi_reduction <add>, %117, %cst_29 [1] : vector<5x8xf32> to vector<5xf32>
    %119 = vector.shape_cast %118 : vector<5xf32> to vector<5x1xf32>
    %120 = vector.extract_strided_slice %113 {offsets = [1, 0], sizes = [1, 8], strides = [1, 1]} : vector<5x8xf32> to vector<1x8xf32>
    %121 = vector.broadcast %120 : vector<1x8xf32> to vector<5x8xf32>
    %122 = arith.mulf %112, %121 : vector<5x8xf32>
    %cst_30 = arith.constant dense<0.000000e+00> : vector<5xf32>
    %123 = vector.multi_reduction <add>, %122, %cst_30 [1] : vector<5x8xf32> to vector<5xf32>
    %124 = vector.shape_cast %123 : vector<5xf32> to vector<5x1xf32>
    %125 = vector.extract_strided_slice %113 {offsets = [2, 0], sizes = [1, 8], strides = [1, 1]} : vector<5x8xf32> to vector<1x8xf32>
    %126 = vector.broadcast %125 : vector<1x8xf32> to vector<5x8xf32>
    %127 = arith.mulf %112, %126 : vector<5x8xf32>
    %cst_31 = arith.constant dense<0.000000e+00> : vector<5xf32>
    %128 = vector.multi_reduction <add>, %127, %cst_31 [1] : vector<5x8xf32> to vector<5xf32>
    %129 = vector.shape_cast %128 : vector<5xf32> to vector<5x1xf32>
    %130 = vector.extract_strided_slice %113 {offsets = [3, 0], sizes = [1, 8], strides = [1, 1]} : vector<5x8xf32> to vector<1x8xf32>
    %131 = vector.broadcast %130 : vector<1x8xf32> to vector<5x8xf32>
    %132 = arith.mulf %112, %131 : vector<5x8xf32>
    %cst_32 = arith.constant dense<0.000000e+00> : vector<5xf32>
    %133 = vector.multi_reduction <add>, %132, %cst_32 [1] : vector<5x8xf32> to vector<5xf32>
    %134 = vector.shape_cast %133 : vector<5xf32> to vector<5x1xf32>
    %135 = vector.extract_strided_slice %113 {offsets = [4, 0], sizes = [1, 8], strides = [1, 1]} : vector<5x8xf32> to vector<1x8xf32>
    %136 = vector.broadcast %135 : vector<1x8xf32> to vector<5x8xf32>
    %137 = arith.mulf %112, %136 : vector<5x8xf32>
    %cst_33 = arith.constant dense<0.000000e+00> : vector<5xf32>
    %138 = vector.multi_reduction <add>, %137, %cst_33 [1] : vector<5x8xf32> to vector<5xf32>
    %139 = vector.shape_cast %138 : vector<5xf32> to vector<5x1xf32>
    %140 = tpu.concatenate %119, %124, %129, %134, %139 in 1 : vector<5x1xf32>, vector<5x1xf32>, vector<5x1xf32>, vector<5x1xf32>, vector<5x1xf32> -> vector<5x5xf32>
    %cst_34 = arith.constant dense<0xFF800000> : vector<5xf32>
    %141 = vector.multi_reduction <maximumf>, %140, %cst_34 [1] : vector<5x5xf32> to vector<5xf32>
    %142 = vector.shape_cast %141 : vector<5xf32> to vector<5x1xf32>
    %143 = vector.broadcast %142 : vector<5x1xf32> to vector<5x5xf32>
    %144 = arith.subf %140, %143 : vector<5x5xf32>
    %145 = math.exp %144 : vector<5x5xf32>
    %cst_35 = arith.constant dense<0.000000e+00> : vector<5xf32>
    %146 = vector.multi_reduction <add>, %145, %cst_35 [1] : vector<5x5xf32> to vector<5xf32>
    %147 = vector.shape_cast %146 : vector<5xf32> to vector<5x1xf32>
    %148 = vector.broadcast %147 : vector<5x1xf32> to vector<5x5xf32>
    %149 = arith.divf %145, %148 : vector<5x5xf32>
    %150 = vector.extract_strided_slice %149 {offsets = [0, 0], sizes = [5, 1], strides = [1, 1]} : vector<5x5xf32> to vector<5x1xf32>
    %151 = vector.extract_strided_slice %114 {offsets = [0, 0], sizes = [1, 8], strides = [1, 1]} : vector<5x8xf32> to vector<1x8xf32>
    %152 = vector.broadcast %150 : vector<5x1xf32> to vector<5x8xf32>
    %153 = vector.broadcast %151 : vector<1x8xf32> to vector<5x8xf32>
    %154 = arith.mulf %152, %153 : vector<5x8xf32>
    %155 = vector.extract_strided_slice %149 {offsets = [0, 1], sizes = [5, 1], strides = [1, 1]} : vector<5x5xf32> to vector<5x1xf32>
    %156 = vector.extract_strided_slice %114 {offsets = [1, 0], sizes = [1, 8], strides = [1, 1]} : vector<5x8xf32> to vector<1x8xf32>
    %157 = vector.broadcast %155 : vector<5x1xf32> to vector<5x8xf32>
    %158 = vector.broadcast %156 : vector<1x8xf32> to vector<5x8xf32>
    %159 = arith.mulf %157, %158 : vector<5x8xf32>
    %160 = arith.addf %154, %159 : vector<5x8xf32>
    %161 = vector.extract_strided_slice %149 {offsets = [0, 2], sizes = [5, 1], strides = [1, 1]} : vector<5x5xf32> to vector<5x1xf32>
    %162 = vector.extract_strided_slice %114 {offsets = [2, 0], sizes = [1, 8], strides = [1, 1]} : vector<5x8xf32> to vector<1x8xf32>
    %163 = vector.broadcast %161 : vector<5x1xf32> to vector<5x8xf32>
    %164 = vector.broadcast %162 : vector<1x8xf32> to vector<5x8xf32>
    %165 = arith.mulf %163, %164 : vector<5x8xf32>
    %166 = arith.addf %160, %165 : vector<5x8xf32>
    %167 = vector.extract_strided_slice %149 {offsets = [0, 3], sizes = [5, 1], strides = [1, 1]} : vector<5x5xf32> to vector<5x1xf32>
    %168 = vector.extract_strided_slice %114 {offsets = [3, 0], sizes = [1, 8], strides = [1, 1]} : vector<5x8xf32> to vector<1x8xf32>
    %169 = vector.broadcast %167 : vector<5x1xf32> to vector<5x8xf32>
    %170 = vector.broadcast %168 : vector<1x8xf32> to vector<5x8xf32>
    %171 = arith.mulf %169, %170 : vector<5x8xf32>
    %172 = arith.addf %166, %171 : vector<5x8xf32>
    %173 = vector.extract_strided_slice %149 {offsets = [0, 4], sizes = [5, 1], strides = [1, 1]} : vector<5x5xf32> to vector<5x1xf32>
    %174 = vector.extract_strided_slice %114 {offsets = [4, 0], sizes = [1, 8], strides = [1, 1]} : vector<5x8xf32> to vector<1x8xf32>
    %175 = vector.broadcast %173 : vector<5x1xf32> to vector<5x8xf32>
    %176 = vector.broadcast %174 : vector<1x8xf32> to vector<5x8xf32>
    %177 = arith.mulf %175, %176 : vector<5x8xf32>
    %178 = arith.addf %172, %177 : vector<5x8xf32>
    %179 = vector.extract_strided_slice %42 {offsets = [0, 16], sizes = [5, 8], strides = [1, 1]} : vector<10x32xf32> to vector<5x8xf32>
    %180 = vector.extract_strided_slice %43 {offsets = [0, 16], sizes = [5, 8], strides = [1, 1]} : vector<10x32xf32> to vector<5x8xf32>
    %181 = vector.extract_strided_slice %44 {offsets = [0, 16], sizes = [5, 8], strides = [1, 1]} : vector<10x32xf32> to vector<5x8xf32>
    %182 = vector.extract_strided_slice %180 {offsets = [0, 0], sizes = [1, 8], strides = [1, 1]} : vector<5x8xf32> to vector<1x8xf32>
    %183 = vector.broadcast %182 : vector<1x8xf32> to vector<5x8xf32>
    %184 = arith.mulf %179, %183 : vector<5x8xf32>
    %cst_36 = arith.constant dense<0.000000e+00> : vector<5xf32>
    %185 = vector.multi_reduction <add>, %184, %cst_36 [1] : vector<5x8xf32> to vector<5xf32>
    %186 = vector.shape_cast %185 : vector<5xf32> to vector<5x1xf32>
    %187 = vector.extract_strided_slice %180 {offsets = [1, 0], sizes = [1, 8], strides = [1, 1]} : vector<5x8xf32> to vector<1x8xf32>
    %188 = vector.broadcast %187 : vector<1x8xf32> to vector<5x8xf32>
    %189 = arith.mulf %179, %188 : vector<5x8xf32>
    %cst_37 = arith.constant dense<0.000000e+00> : vector<5xf32>
    %190 = vector.multi_reduction <add>, %189, %cst_37 [1] : vector<5x8xf32> to vector<5xf32>
    %191 = vector.shape_cast %190 : vector<5xf32> to vector<5x1xf32>
    %192 = vector.extract_strided_slice %180 {offsets = [2, 0], sizes = [1, 8], strides = [1, 1]} : vector<5x8xf32> to vector<1x8xf32>
    %193 = vector.broadcast %192 : vector<1x8xf32> to vector<5x8xf32>
    %194 = arith.mulf %179, %193 : vector<5x8xf32>
    %cst_38 = arith.constant dense<0.000000e+00> : vector<5xf32>
    %195 = vector.multi_reduction <add>, %194, %cst_38 [1] : vector<5x8xf32> to vector<5xf32>
    %196 = vector.shape_cast %195 : vector<5xf32> to vector<5x1xf32>
    %197 = vector.extract_strided_slice %180 {offsets = [3, 0], sizes = [1, 8], strides = [1, 1]} : vector<5x8xf32> to vector<1x8xf32>
    %198 = vector.broadcast %197 : vector<1x8xf32> to vector<5x8xf32>
    %199 = arith.mulf %179, %198 : vector<5x8xf32>
    %cst_39 = arith.constant dense<0.000000e+00> : vector<5xf32>
    %200 = vector.multi_reduction <add>, %199, %cst_39 [1] : vector<5x8xf32> to vector<5xf32>
    %201 = vector.shape_cast %200 : vector<5xf32> to vector<5x1xf32>
    %202 = vector.extract_strided_slice %180 {offsets = [4, 0], sizes = [1, 8], strides = [1, 1]} : vector<5x8xf32> to vector<1x8xf32>
    %203 = vector.broadcast %202 : vector<1x8xf32> to vector<5x8xf32>
    %204 = arith.mulf %179, %203 : vector<5x8xf32>
    %cst_40 = arith.constant dense<0.000000e+00> : vector<5xf32>
    %205 = vector.multi_reduction <add>, %204, %cst_40 [1] : vector<5x8xf32> to vector<5xf32>
    %206 = vector.shape_cast %205 : vector<5xf32> to vector<5x1xf32>
    %207 = tpu.concatenate %186, %191, %196, %201, %206 in 1 : vector<5x1xf32>, vector<5x1xf32>, vector<5x1xf32>, vector<5x1xf32>, vector<5x1xf32> -> vector<5x5xf32>
    %cst_41 = arith.constant dense<0xFF800000> : vector<5xf32>
    %208 = vector.multi_reduction <maximumf>, %207, %cst_41 [1] : vector<5x5xf32> to vector<5xf32>
    %209 = vector.shape_cast %208 : vector<5xf32> to vector<5x1xf32>
    %210 = vector.broadcast %209 : vector<5x1xf32> to vector<5x5xf32>
    %211 = arith.subf %207, %210 : vector<5x5xf32>
    %212 = math.exp %211 : vector<5x5xf32>
    %cst_42 = arith.constant dense<0.000000e+00> : vector<5xf32>
    %213 = vector.multi_reduction <add>, %212, %cst_42 [1] : vector<5x5xf32> to vector<5xf32>
    %214 = vector.shape_cast %213 : vector<5xf32> to vector<5x1xf32>
    %215 = vector.broadcast %214 : vector<5x1xf32> to vector<5x5xf32>
    %216 = arith.divf %212, %215 : vector<5x5xf32>
    %217 = vector.extract_strided_slice %216 {offsets = [0, 0], sizes = [5, 1], strides = [1, 1]} : vector<5x5xf32> to vector<5x1xf32>
    %218 = vector.extract_strided_slice %181 {offsets = [0, 0], sizes = [1, 8], strides = [1, 1]} : vector<5x8xf32> to vector<1x8xf32>
    %219 = vector.broadcast %217 : vector<5x1xf32> to vector<5x8xf32>
    %220 = vector.broadcast %218 : vector<1x8xf32> to vector<5x8xf32>
    %221 = arith.mulf %219, %220 : vector<5x8xf32>
    %222 = vector.extract_strided_slice %216 {offsets = [0, 1], sizes = [5, 1], strides = [1, 1]} : vector<5x5xf32> to vector<5x1xf32>
    %223 = vector.extract_strided_slice %181 {offsets = [1, 0], sizes = [1, 8], strides = [1, 1]} : vector<5x8xf32> to vector<1x8xf32>
    %224 = vector.broadcast %222 : vector<5x1xf32> to vector<5x8xf32>
    %225 = vector.broadcast %223 : vector<1x8xf32> to vector<5x8xf32>
    %226 = arith.mulf %224, %225 : vector<5x8xf32>
    %227 = arith.addf %221, %226 : vector<5x8xf32>
    %228 = vector.extract_strided_slice %216 {offsets = [0, 2], sizes = [5, 1], strides = [1, 1]} : vector<5x5xf32> to vector<5x1xf32>
    %229 = vector.extract_strided_slice %181 {offsets = [2, 0], sizes = [1, 8], strides = [1, 1]} : vector<5x8xf32> to vector<1x8xf32>
    %230 = vector.broadcast %228 : vector<5x1xf32> to vector<5x8xf32>
    %231 = vector.broadcast %229 : vector<1x8xf32> to vector<5x8xf32>
    %232 = arith.mulf %230, %231 : vector<5x8xf32>
    %233 = arith.addf %227, %232 : vector<5x8xf32>
    %234 = vector.extract_strided_slice %216 {offsets = [0, 3], sizes = [5, 1], strides = [1, 1]} : vector<5x5xf32> to vector<5x1xf32>
    %235 = vector.extract_strided_slice %181 {offsets = [3, 0], sizes = [1, 8], strides = [1, 1]} : vector<5x8xf32> to vector<1x8xf32>
    %236 = vector.broadcast %234 : vector<5x1xf32> to vector<5x8xf32>
    %237 = vector.broadcast %235 : vector<1x8xf32> to vector<5x8xf32>
    %238 = arith.mulf %236, %237 : vector<5x8xf32>
    %239 = arith.addf %233, %238 : vector<5x8xf32>
    %240 = vector.extract_strided_slice %216 {offsets = [0, 4], sizes = [5, 1], strides = [1, 1]} : vector<5x5xf32> to vector<5x1xf32>
    %241 = vector.extract_strided_slice %181 {offsets = [4, 0], sizes = [1, 8], strides = [1, 1]} : vector<5x8xf32> to vector<1x8xf32>
    %242 = vector.broadcast %240 : vector<5x1xf32> to vector<5x8xf32>
    %243 = vector.broadcast %241 : vector<1x8xf32> to vector<5x8xf32>
    %244 = arith.mulf %242, %243 : vector<5x8xf32>
    %245 = arith.addf %239, %244 : vector<5x8xf32>
    %246 = vector.extract_strided_slice %42 {offsets = [0, 24], sizes = [5, 8], strides = [1, 1]} : vector<10x32xf32> to vector<5x8xf32>
    %247 = vector.extract_strided_slice %43 {offsets = [0, 24], sizes = [5, 8], strides = [1, 1]} : vector<10x32xf32> to vector<5x8xf32>
    %248 = vector.extract_strided_slice %44 {offsets = [0, 24], sizes = [5, 8], strides = [1, 1]} : vector<10x32xf32> to vector<5x8xf32>
    %249 = vector.extract_strided_slice %247 {offsets = [0, 0], sizes = [1, 8], strides = [1, 1]} : vector<5x8xf32> to vector<1x8xf32>
    %250 = vector.broadcast %249 : vector<1x8xf32> to vector<5x8xf32>
    %251 = arith.mulf %246, %250 : vector<5x8xf32>
    %cst_43 = arith.constant dense<0.000000e+00> : vector<5xf32>
    %252 = vector.multi_reduction <add>, %251, %cst_43 [1] : vector<5x8xf32> to vector<5xf32>
    %253 = vector.shape_cast %252 : vector<5xf32> to vector<5x1xf32>
    %254 = vector.extract_strided_slice %247 {offsets = [1, 0], sizes = [1, 8], strides = [1, 1]} : vector<5x8xf32> to vector<1x8xf32>
    %255 = vector.broadcast %254 : vector<1x8xf32> to vector<5x8xf32>
    %256 = arith.mulf %246, %255 : vector<5x8xf32>
    %cst_44 = arith.constant dense<0.000000e+00> : vector<5xf32>
    %257 = vector.multi_reduction <add>, %256, %cst_44 [1] : vector<5x8xf32> to vector<5xf32>
    %258 = vector.shape_cast %257 : vector<5xf32> to vector<5x1xf32>
    %259 = vector.extract_strided_slice %247 {offsets = [2, 0], sizes = [1, 8], strides = [1, 1]} : vector<5x8xf32> to vector<1x8xf32>
    %260 = vector.broadcast %259 : vector<1x8xf32> to vector<5x8xf32>
    %261 = arith.mulf %246, %260 : vector<5x8xf32>
    %cst_45 = arith.constant dense<0.000000e+00> : vector<5xf32>
    %262 = vector.multi_reduction <add>, %261, %cst_45 [1] : vector<5x8xf32> to vector<5xf32>
    %263 = vector.shape_cast %262 : vector<5xf32> to vector<5x1xf32>
    %264 = vector.extract_strided_slice %247 {offsets = [3, 0], sizes = [1, 8], strides = [1, 1]} : vector<5x8xf32> to vector<1x8xf32>
    %265 = vector.broadcast %264 : vector<1x8xf32> to vector<5x8xf32>
    %266 = arith.mulf %246, %265 : vector<5x8xf32>
    %cst_46 = arith.constant dense<0.000000e+00> : vector<5xf32>
    %267 = vector.multi_reduction <add>, %266, %cst_46 [1] : vector<5x8xf32> to vector<5xf32>
    %268 = vector.shape_cast %267 : vector<5xf32> to vector<5x1xf32>
    %269 = vector.extract_strided_slice %247 {offsets = [4, 0], sizes = [1, 8], strides = [1, 1]} : vector<5x8xf32> to vector<1x8xf32>
    %270 = vector.broadcast %269 : vector<1x8xf32> to vector<5x8xf32>
    %271 = arith.mulf %246, %270 : vector<5x8xf32>
    %cst_47 = arith.constant dense<0.000000e+00> : vector<5xf32>
    %272 = vector.multi_reduction <add>, %271, %cst_47 [1] : vector<5x8xf32> to vector<5xf32>
    %273 = vector.shape_cast %272 : vector<5xf32> to vector<5x1xf32>
    %274 = tpu.concatenate %253, %258, %263, %268, %273 in 1 : vector<5x1xf32>, vector<5x1xf32>, vector<5x1xf32>, vector<5x1xf32>, vector<5x1xf32> -> vector<5x5xf32>
    %cst_48 = arith.constant dense<0xFF800000> : vector<5xf32>
    %275 = vector.multi_reduction <maximumf>, %274, %cst_48 [1] : vector<5x5xf32> to vector<5xf32>
    %276 = vector.shape_cast %275 : vector<5xf32> to vector<5x1xf32>
    %277 = vector.broadcast %276 : vector<5x1xf32> to vector<5x5xf32>
    %278 = arith.subf %274, %277 : vector<5x5xf32>
    %279 = math.exp %278 : vector<5x5xf32>
    %cst_49 = arith.constant dense<0.000000e+00> : vector<5xf32>
    %280 = vector.multi_reduction <add>, %279, %cst_49 [1] : vector<5x5xf32> to vector<5xf32>
    %281 = vector.shape_cast %280 : vector<5xf32> to vector<5x1xf32>
    %282 = vector.broadcast %281 : vector<5x1xf32> to vector<5x5xf32>
    %283 = arith.divf %279, %282 : vector<5x5xf32>
    %284 = vector.extract_strided_slice %283 {offsets = [0, 0], sizes = [5, 1], strides = [1, 1]} : vector<5x5xf32> to vector<5x1xf32>
    %285 = vector.extract_strided_slice %248 {offsets = [0, 0], sizes = [1, 8], strides = [1, 1]} : vector<5x8xf32> to vector<1x8xf32>
    %286 = vector.broadcast %284 : vector<5x1xf32> to vector<5x8xf32>
    %287 = vector.broadcast %285 : vector<1x8xf32> to vector<5x8xf32>
    %288 = arith.mulf %286, %287 : vector<5x8xf32>
    %289 = vector.extract_strided_slice %283 {offsets = [0, 1], sizes = [5, 1], strides = [1, 1]} : vector<5x5xf32> to vector<5x1xf32>
    %290 = vector.extract_strided_slice %248 {offsets = [1, 0], sizes = [1, 8], strides = [1, 1]} : vector<5x8xf32> to vector<1x8xf32>
    %291 = vector.broadcast %289 : vector<5x1xf32> to vector<5x8xf32>
    %292 = vector.broadcast %290 : vector<1x8xf32> to vector<5x8xf32>
    %293 = arith.mulf %291, %292 : vector<5x8xf32>
    %294 = arith.addf %288, %293 : vector<5x8xf32>
    %295 = vector.extract_strided_slice %283 {offsets = [0, 2], sizes = [5, 1], strides = [1, 1]} : vector<5x5xf32> to vector<5x1xf32>
    %296 = vector.extract_strided_slice %248 {offsets = [2, 0], sizes = [1, 8], strides = [1, 1]} : vector<5x8xf32> to vector<1x8xf32>
    %297 = vector.broadcast %295 : vector<5x1xf32> to vector<5x8xf32>
    %298 = vector.broadcast %296 : vector<1x8xf32> to vector<5x8xf32>
    %299 = arith.mulf %297, %298 : vector<5x8xf32>
    %300 = arith.addf %294, %299 : vector<5x8xf32>
    %301 = vector.extract_strided_slice %283 {offsets = [0, 3], sizes = [5, 1], strides = [1, 1]} : vector<5x5xf32> to vector<5x1xf32>
    %302 = vector.extract_strided_slice %248 {offsets = [3, 0], sizes = [1, 8], strides = [1, 1]} : vector<5x8xf32> to vector<1x8xf32>
    %303 = vector.broadcast %301 : vector<5x1xf32> to vector<5x8xf32>
    %304 = vector.broadcast %302 : vector<1x8xf32> to vector<5x8xf32>
    %305 = arith.mulf %303, %304 : vector<5x8xf32>
    %306 = arith.addf %300, %305 : vector<5x8xf32>
    %307 = vector.extract_strided_slice %283 {offsets = [0, 4], sizes = [5, 1], strides = [1, 1]} : vector<5x5xf32> to vector<5x1xf32>
    %308 = vector.extract_strided_slice %248 {offsets = [4, 0], sizes = [1, 8], strides = [1, 1]} : vector<5x8xf32> to vector<1x8xf32>
    %309 = vector.broadcast %307 : vector<5x1xf32> to vector<5x8xf32>
    %310 = vector.broadcast %308 : vector<1x8xf32> to vector<5x8xf32>
    %311 = arith.mulf %309, %310 : vector<5x8xf32>
    %312 = arith.addf %306, %311 : vector<5x8xf32>
    %313 = tpu.concatenate %111, %178, %245, %312 in 1 : vector<5x8xf32>, vector<5x8xf32>, vector<5x8xf32>, vector<5x8xf32> -> vector<5x32xf32>
    %314 = vector.extract_strided_slice %42 {offsets = [5, 0], sizes = [5, 8], strides = [1, 1]} : vector<10x32xf32> to vector<5x8xf32>
    %315 = vector.extract_strided_slice %43 {offsets = [5, 0], sizes = [5, 8], strides = [1, 1]} : vector<10x32xf32> to vector<5x8xf32>
    %316 = vector.extract_strided_slice %44 {offsets = [5, 0], sizes = [5, 8], strides = [1, 1]} : vector<10x32xf32> to vector<5x8xf32>
    %317 = vector.extract_strided_slice %315 {offsets = [0, 0], sizes = [1, 8], strides = [1, 1]} : vector<5x8xf32> to vector<1x8xf32>
    %318 = vector.broadcast %317 : vector<1x8xf32> to vector<5x8xf32>
    %319 = arith.mulf %314, %318 : vector<5x8xf32>
    %cst_50 = arith.constant dense<0.000000e+00> : vector<5xf32>
    %320 = vector.multi_reduction <add>, %319, %cst_50 [1] : vector<5x8xf32> to vector<5xf32>
    %321 = vector.shape_cast %320 : vector<5xf32> to vector<5x1xf32>
    %322 = vector.extract_strided_slice %315 {offsets = [1, 0], sizes = [1, 8], strides = [1, 1]} : vector<5x8xf32> to vector<1x8xf32>
    %323 = vector.broadcast %322 : vector<1x8xf32> to vector<5x8xf32>
    %324 = arith.mulf %314, %323 : vector<5x8xf32>
    %cst_51 = arith.constant dense<0.000000e+00> : vector<5xf32>
    %325 = vector.multi_reduction <add>, %324, %cst_51 [1] : vector<5x8xf32> to vector<5xf32>
    %326 = vector.shape_cast %325 : vector<5xf32> to vector<5x1xf32>
    %327 = vector.extract_strided_slice %315 {offsets = [2, 0], sizes = [1, 8], strides = [1, 1]} : vector<5x8xf32> to vector<1x8xf32>
    %328 = vector.broadcast %327 : vector<1x8xf32> to vector<5x8xf32>
    %329 = arith.mulf %314, %328 : vector<5x8xf32>
    %cst_52 = arith.constant dense<0.000000e+00> : vector<5xf32>
    %330 = vector.multi_reduction <add>, %329, %cst_52 [1] : vector<5x8xf32> to vector<5xf32>
    %331 = vector.shape_cast %330 : vector<5xf32> to vector<5x1xf32>
    %332 = vector.extract_strided_slice %315 {offsets = [3, 0], sizes = [1, 8], strides = [1, 1]} : vector<5x8xf32> to vector<1x8xf32>
    %333 = vector.broadcast %332 : vector<1x8xf32> to vector<5x8xf32>
    %334 = arith.mulf %314, %333 : vector<5x8xf32>
    %cst_53 = arith.constant dense<0.000000e+00> : vector<5xf32>
    %335 = vector.multi_reduction <add>, %334, %cst_53 [1] : vector<5x8xf32> to vector<5xf32>
    %336 = vector.shape_cast %335 : vector<5xf32> to vector<5x1xf32>
    %337 = vector.extract_strided_slice %315 {offsets = [4, 0], sizes = [1, 8], strides = [1, 1]} : vector<5x8xf32> to vector<1x8xf32>
    %338 = vector.broadcast %337 : vector<1x8xf32> to vector<5x8xf32>
    %339 = arith.mulf %314, %338 : vector<5x8xf32>
    %cst_54 = arith.constant dense<0.000000e+00> : vector<5xf32>
    %340 = vector.multi_reduction <add>, %339, %cst_54 [1] : vector<5x8xf32> to vector<5xf32>
    %341 = vector.shape_cast %340 : vector<5xf32> to vector<5x1xf32>
    %342 = tpu.concatenate %321, %326, %331, %336, %341 in 1 : vector<5x1xf32>, vector<5x1xf32>, vector<5x1xf32>, vector<5x1xf32>, vector<5x1xf32> -> vector<5x5xf32>
    %cst_55 = arith.constant dense<0xFF800000> : vector<5xf32>
    %343 = vector.multi_reduction <maximumf>, %342, %cst_55 [1] : vector<5x5xf32> to vector<5xf32>
    %344 = vector.shape_cast %343 : vector<5xf32> to vector<5x1xf32>
    %345 = vector.broadcast %344 : vector<5x1xf32> to vector<5x5xf32>
    %346 = arith.subf %342, %345 : vector<5x5xf32>
    %347 = math.exp %346 : vector<5x5xf32>
    %cst_56 = arith.constant dense<0.000000e+00> : vector<5xf32>
    %348 = vector.multi_reduction <add>, %347, %cst_56 [1] : vector<5x5xf32> to vector<5xf32>
    %349 = vector.shape_cast %348 : vector<5xf32> to vector<5x1xf32>
    %350 = vector.broadcast %349 : vector<5x1xf32> to vector<5x5xf32>
    %351 = arith.divf %347, %350 : vector<5x5xf32>
    %352 = vector.extract_strided_slice %351 {offsets = [0, 0], sizes = [5, 1], strides = [1, 1]} : vector<5x5xf32> to vector<5x1xf32>
    %353 = vector.extract_strided_slice %316 {offsets = [0, 0], sizes = [1, 8], strides = [1, 1]} : vector<5x8xf32> to vector<1x8xf32>
    %354 = vector.broadcast %352 : vector<5x1xf32> to vector<5x8xf32>
    %355 = vector.broadcast %353 : vector<1x8xf32> to vector<5x8xf32>
    %356 = arith.mulf %354, %355 : vector<5x8xf32>
    %357 = vector.extract_strided_slice %351 {offsets = [0, 1], sizes = [5, 1], strides = [1, 1]} : vector<5x5xf32> to vector<5x1xf32>
    %358 = vector.extract_strided_slice %316 {offsets = [1, 0], sizes = [1, 8], strides = [1, 1]} : vector<5x8xf32> to vector<1x8xf32>
    %359 = vector.broadcast %357 : vector<5x1xf32> to vector<5x8xf32>
    %360 = vector.broadcast %358 : vector<1x8xf32> to vector<5x8xf32>
    %361 = arith.mulf %359, %360 : vector<5x8xf32>
    %362 = arith.addf %356, %361 : vector<5x8xf32>
    %363 = vector.extract_strided_slice %351 {offsets = [0, 2], sizes = [5, 1], strides = [1, 1]} : vector<5x5xf32> to vector<5x1xf32>
    %364 = vector.extract_strided_slice %316 {offsets = [2, 0], sizes = [1, 8], strides = [1, 1]} : vector<5x8xf32> to vector<1x8xf32>
    %365 = vector.broadcast %363 : vector<5x1xf32> to vector<5x8xf32>
    %366 = vector.broadcast %364 : vector<1x8xf32> to vector<5x8xf32>
    %367 = arith.mulf %365, %366 : vector<5x8xf32>
    %368 = arith.addf %362, %367 : vector<5x8xf32>
    %369 = vector.extract_strided_slice %351 {offsets = [0, 3], sizes = [5, 1], strides = [1, 1]} : vector<5x5xf32> to vector<5x1xf32>
    %370 = vector.extract_strided_slice %316 {offsets = [3, 0], sizes = [1, 8], strides = [1, 1]} : vector<5x8xf32> to vector<1x8xf32>
    %371 = vector.broadcast %369 : vector<5x1xf32> to vector<5x8xf32>
    %372 = vector.broadcast %370 : vector<1x8xf32> to vector<5x8xf32>
    %373 = arith.mulf %371, %372 : vector<5x8xf32>
    %374 = arith.addf %368, %373 : vector<5x8xf32>
    %375 = vector.extract_strided_slice %351 {offsets = [0, 4], sizes = [5, 1], strides = [1, 1]} : vector<5x5xf32> to vector<5x1xf32>
    %376 = vector.extract_strided_slice %316 {offsets = [4, 0], sizes = [1, 8], strides = [1, 1]} : vector<5x8xf32> to vector<1x8xf32>
    %377 = vector.broadcast %375 : vector<5x1xf32> to vector<5x8xf32>
    %378 = vector.broadcast %376 : vector<1x8xf32> to vector<5x8xf32>
    %379 = arith.mulf %377, %378 : vector<5x8xf32>
    %380 = arith.addf %374, %379 : vector<5x8xf32>
    %381 = vector.extract_strided_slice %42 {offsets = [5, 8], sizes = [5, 8], strides = [1, 1]} : vector<10x32xf32> to vector<5x8xf32>
    %382 = vector.extract_strided_slice %43 {offsets = [5, 8], sizes = [5, 8], strides = [1, 1]} : vector<10x32xf32> to vector<5x8xf32>
    %383 = vector.extract_strided_slice %44 {offsets = [5, 8], sizes = [5, 8], strides = [1, 1]} : vector<10x32xf32> to vector<5x8xf32>
    %384 = vector.extract_strided_slice %382 {offsets = [0, 0], sizes = [1, 8], strides = [1, 1]} : vector<5x8xf32> to vector<1x8xf32>
    %385 = vector.broadcast %384 : vector<1x8xf32> to vector<5x8xf32>
    %386 = arith.mulf %381, %385 : vector<5x8xf32>
    %cst_57 = arith.constant dense<0.000000e+00> : vector<5xf32>
    %387 = vector.multi_reduction <add>, %386, %cst_57 [1] : vector<5x8xf32> to vector<5xf32>
    %388 = vector.shape_cast %387 : vector<5xf32> to vector<5x1xf32>
    %389 = vector.extract_strided_slice %382 {offsets = [1, 0], sizes = [1, 8], strides = [1, 1]} : vector<5x8xf32> to vector<1x8xf32>
    %390 = vector.broadcast %389 : vector<1x8xf32> to vector<5x8xf32>
    %391 = arith.mulf %381, %390 : vector<5x8xf32>
    %cst_58 = arith.constant dense<0.000000e+00> : vector<5xf32>
    %392 = vector.multi_reduction <add>, %391, %cst_58 [1] : vector<5x8xf32> to vector<5xf32>
    %393 = vector.shape_cast %392 : vector<5xf32> to vector<5x1xf32>
    %394 = vector.extract_strided_slice %382 {offsets = [2, 0], sizes = [1, 8], strides = [1, 1]} : vector<5x8xf32> to vector<1x8xf32>
    %395 = vector.broadcast %394 : vector<1x8xf32> to vector<5x8xf32>
    %396 = arith.mulf %381, %395 : vector<5x8xf32>
    %cst_59 = arith.constant dense<0.000000e+00> : vector<5xf32>
    %397 = vector.multi_reduction <add>, %396, %cst_59 [1] : vector<5x8xf32> to vector<5xf32>
    %398 = vector.shape_cast %397 : vector<5xf32> to vector<5x1xf32>
    %399 = vector.extract_strided_slice %382 {offsets = [3, 0], sizes = [1, 8], strides = [1, 1]} : vector<5x8xf32> to vector<1x8xf32>
    %400 = vector.broadcast %399 : vector<1x8xf32> to vector<5x8xf32>
    %401 = arith.mulf %381, %400 : vector<5x8xf32>
    %cst_60 = arith.constant dense<0.000000e+00> : vector<5xf32>
    %402 = vector.multi_reduction <add>, %401, %cst_60 [1] : vector<5x8xf32> to vector<5xf32>
    %403 = vector.shape_cast %402 : vector<5xf32> to vector<5x1xf32>
    %404 = vector.extract_strided_slice %382 {offsets = [4, 0], sizes = [1, 8], strides = [1, 1]} : vector<5x8xf32> to vector<1x8xf32>
    %405 = vector.broadcast %404 : vector<1x8xf32> to vector<5x8xf32>
    %406 = arith.mulf %381, %405 : vector<5x8xf32>
    %cst_61 = arith.constant dense<0.000000e+00> : vector<5xf32>
    %407 = vector.multi_reduction <add>, %406, %cst_61 [1] : vector<5x8xf32> to vector<5xf32>
    %408 = vector.shape_cast %407 : vector<5xf32> to vector<5x1xf32>
    %409 = tpu.concatenate %388, %393, %398, %403, %408 in 1 : vector<5x1xf32>, vector<5x1xf32>, vector<5x1xf32>, vector<5x1xf32>, vector<5x1xf32> -> vector<5x5xf32>
    %cst_62 = arith.constant dense<0xFF800000> : vector<5xf32>
    %410 = vector.multi_reduction <maximumf>, %409, %cst_62 [1] : vector<5x5xf32> to vector<5xf32>
    %411 = vector.shape_cast %410 : vector<5xf32> to vector<5x1xf32>
    %412 = vector.broadcast %411 : vector<5x1xf32> to vector<5x5xf32>
    %413 = arith.subf %409, %412 : vector<5x5xf32>
    %414 = math.exp %413 : vector<5x5xf32>
    %cst_63 = arith.constant dense<0.000000e+00> : vector<5xf32>
    %415 = vector.multi_reduction <add>, %414, %cst_63 [1] : vector<5x5xf32> to vector<5xf32>
    %416 = vector.shape_cast %415 : vector<5xf32> to vector<5x1xf32>
    %417 = vector.broadcast %416 : vector<5x1xf32> to vector<5x5xf32>
    %418 = arith.divf %414, %417 : vector<5x5xf32>
    %419 = vector.extract_strided_slice %418 {offsets = [0, 0], sizes = [5, 1], strides = [1, 1]} : vector<5x5xf32> to vector<5x1xf32>
    %420 = vector.extract_strided_slice %383 {offsets = [0, 0], sizes = [1, 8], strides = [1, 1]} : vector<5x8xf32> to vector<1x8xf32>
    %421 = vector.broadcast %419 : vector<5x1xf32> to vector<5x8xf32>
    %422 = vector.broadcast %420 : vector<1x8xf32> to vector<5x8xf32>
    %423 = arith.mulf %421, %422 : vector<5x8xf32>
    %424 = vector.extract_strided_slice %418 {offsets = [0, 1], sizes = [5, 1], strides = [1, 1]} : vector<5x5xf32> to vector<5x1xf32>
    %425 = vector.extract_strided_slice %383 {offsets = [1, 0], sizes = [1, 8], strides = [1, 1]} : vector<5x8xf32> to vector<1x8xf32>
    %426 = vector.broadcast %424 : vector<5x1xf32> to vector<5x8xf32>
    %427 = vector.broadcast %425 : vector<1x8xf32> to vector<5x8xf32>
    %428 = arith.mulf %426, %427 : vector<5x8xf32>
    %429 = arith.addf %423, %428 : vector<5x8xf32>
    %430 = vector.extract_strided_slice %418 {offsets = [0, 2], sizes = [5, 1], strides = [1, 1]} : vector<5x5xf32> to vector<5x1xf32>
    %431 = vector.extract_strided_slice %383 {offsets = [2, 0], sizes = [1, 8], strides = [1, 1]} : vector<5x8xf32> to vector<1x8xf32>
    %432 = vector.broadcast %430 : vector<5x1xf32> to vector<5x8xf32>
    %433 = vector.broadcast %431 : vector<1x8xf32> to vector<5x8xf32>
    %434 = arith.mulf %432, %433 : vector<5x8xf32>
    %435 = arith.addf %429, %434 : vector<5x8xf32>
    %436 = vector.extract_strided_slice %418 {offsets = [0, 3], sizes = [5, 1], strides = [1, 1]} : vector<5x5xf32> to vector<5x1xf32>
    %437 = vector.extract_strided_slice %383 {offsets = [3, 0], sizes = [1, 8], strides = [1, 1]} : vector<5x8xf32> to vector<1x8xf32>
    %438 = vector.broadcast %436 : vector<5x1xf32> to vector<5x8xf32>
    %439 = vector.broadcast %437 : vector<1x8xf32> to vector<5x8xf32>
    %440 = arith.mulf %438, %439 : vector<5x8xf32>
    %441 = arith.addf %435, %440 : vector<5x8xf32>
    %442 = vector.extract_strided_slice %418 {offsets = [0, 4], sizes = [5, 1], strides = [1, 1]} : vector<5x5xf32> to vector<5x1xf32>
    %443 = vector.extract_strided_slice %383 {offsets = [4, 0], sizes = [1, 8], strides = [1, 1]} : vector<5x8xf32> to vector<1x8xf32>
    %444 = vector.broadcast %442 : vector<5x1xf32> to vector<5x8xf32>
    %445 = vector.broadcast %443 : vector<1x8xf32> to vector<5x8xf32>
    %446 = arith.mulf %444, %445 : vector<5x8xf32>
    %447 = arith.addf %441, %446 : vector<5x8xf32>
    %448 = vector.extract_strided_slice %42 {offsets = [5, 16], sizes = [5, 8], strides = [1, 1]} : vector<10x32xf32> to vector<5x8xf32>
    %449 = vector.extract_strided_slice %43 {offsets = [5, 16], sizes = [5, 8], strides = [1, 1]} : vector<10x32xf32> to vector<5x8xf32>
    %450 = vector.extract_strided_slice %44 {offsets = [5, 16], sizes = [5, 8], strides = [1, 1]} : vector<10x32xf32> to vector<5x8xf32>
    %451 = vector.extract_strided_slice %449 {offsets = [0, 0], sizes = [1, 8], strides = [1, 1]} : vector<5x8xf32> to vector<1x8xf32>
    %452 = vector.broadcast %451 : vector<1x8xf32> to vector<5x8xf32>
    %453 = arith.mulf %448, %452 : vector<5x8xf32>
    %cst_64 = arith.constant dense<0.000000e+00> : vector<5xf32>
    %454 = vector.multi_reduction <add>, %453, %cst_64 [1] : vector<5x8xf32> to vector<5xf32>
    %455 = vector.shape_cast %454 : vector<5xf32> to vector<5x1xf32>
    %456 = vector.extract_strided_slice %449 {offsets = [1, 0], sizes = [1, 8], strides = [1, 1]} : vector<5x8xf32> to vector<1x8xf32>
    %457 = vector.broadcast %456 : vector<1x8xf32> to vector<5x8xf32>
    %458 = arith.mulf %448, %457 : vector<5x8xf32>
    %cst_65 = arith.constant dense<0.000000e+00> : vector<5xf32>
    %459 = vector.multi_reduction <add>, %458, %cst_65 [1] : vector<5x8xf32> to vector<5xf32>
    %460 = vector.shape_cast %459 : vector<5xf32> to vector<5x1xf32>
    %461 = vector.extract_strided_slice %449 {offsets = [2, 0], sizes = [1, 8], strides = [1, 1]} : vector<5x8xf32> to vector<1x8xf32>
    %462 = vector.broadcast %461 : vector<1x8xf32> to vector<5x8xf32>
    %463 = arith.mulf %448, %462 : vector<5x8xf32>
    %cst_66 = arith.constant dense<0.000000e+00> : vector<5xf32>
    %464 = vector.multi_reduction <add>, %463, %cst_66 [1] : vector<5x8xf32> to vector<5xf32>
    %465 = vector.shape_cast %464 : vector<5xf32> to vector<5x1xf32>
    %466 = vector.extract_strided_slice %449 {offsets = [3, 0], sizes = [1, 8], strides = [1, 1]} : vector<5x8xf32> to vector<1x8xf32>
    %467 = vector.broadcast %466 : vector<1x8xf32> to vector<5x8xf32>
    %468 = arith.mulf %448, %467 : vector<5x8xf32>
    %cst_67 = arith.constant dense<0.000000e+00> : vector<5xf32>
    %469 = vector.multi_reduction <add>, %468, %cst_67 [1] : vector<5x8xf32> to vector<5xf32>
    %470 = vector.shape_cast %469 : vector<5xf32> to vector<5x1xf32>
    %471 = vector.extract_strided_slice %449 {offsets = [4, 0], sizes = [1, 8], strides = [1, 1]} : vector<5x8xf32> to vector<1x8xf32>
    %472 = vector.broadcast %471 : vector<1x8xf32> to vector<5x8xf32>
    %473 = arith.mulf %448, %472 : vector<5x8xf32>
    %cst_68 = arith.constant dense<0.000000e+00> : vector<5xf32>
    %474 = vector.multi_reduction <add>, %473, %cst_68 [1] : vector<5x8xf32> to vector<5xf32>
    %475 = vector.shape_cast %474 : vector<5xf32> to vector<5x1xf32>
    %476 = tpu.concatenate %455, %460, %465, %470, %475 in 1 : vector<5x1xf32>, vector<5x1xf32>, vector<5x1xf32>, vector<5x1xf32>, vector<5x1xf32> -> vector<5x5xf32>
    %cst_69 = arith.constant dense<0xFF800000> : vector<5xf32>
    %477 = vector.multi_reduction <maximumf>, %476, %cst_69 [1] : vector<5x5xf32> to vector<5xf32>
    %478 = vector.shape_cast %477 : vector<5xf32> to vector<5x1xf32>
    %479 = vector.broadcast %478 : vector<5x1xf32> to vector<5x5xf32>
    %480 = arith.subf %476, %479 : vector<5x5xf32>
    %481 = math.exp %480 : vector<5x5xf32>
    %cst_70 = arith.constant dense<0.000000e+00> : vector<5xf32>
    %482 = vector.multi_reduction <add>, %481, %cst_70 [1] : vector<5x5xf32> to vector<5xf32>
    %483 = vector.shape_cast %482 : vector<5xf32> to vector<5x1xf32>
    %484 = vector.broadcast %483 : vector<5x1xf32> to vector<5x5xf32>
    %485 = arith.divf %481, %484 : vector<5x5xf32>
    %486 = vector.extract_strided_slice %485 {offsets = [0, 0], sizes = [5, 1], strides = [1, 1]} : vector<5x5xf32> to vector<5x1xf32>
    %487 = vector.extract_strided_slice %450 {offsets = [0, 0], sizes = [1, 8], strides = [1, 1]} : vector<5x8xf32> to vector<1x8xf32>
    %488 = vector.broadcast %486 : vector<5x1xf32> to vector<5x8xf32>
    %489 = vector.broadcast %487 : vector<1x8xf32> to vector<5x8xf32>
    %490 = arith.mulf %488, %489 : vector<5x8xf32>
    %491 = vector.extract_strided_slice %485 {offsets = [0, 1], sizes = [5, 1], strides = [1, 1]} : vector<5x5xf32> to vector<5x1xf32>
    %492 = vector.extract_strided_slice %450 {offsets = [1, 0], sizes = [1, 8], strides = [1, 1]} : vector<5x8xf32> to vector<1x8xf32>
    %493 = vector.broadcast %491 : vector<5x1xf32> to vector<5x8xf32>
    %494 = vector.broadcast %492 : vector<1x8xf32> to vector<5x8xf32>
    %495 = arith.mulf %493, %494 : vector<5x8xf32>
    %496 = arith.addf %490, %495 : vector<5x8xf32>
    %497 = vector.extract_strided_slice %485 {offsets = [0, 2], sizes = [5, 1], strides = [1, 1]} : vector<5x5xf32> to vector<5x1xf32>
    %498 = vector.extract_strided_slice %450 {offsets = [2, 0], sizes = [1, 8], strides = [1, 1]} : vector<5x8xf32> to vector<1x8xf32>
    %499 = vector.broadcast %497 : vector<5x1xf32> to vector<5x8xf32>
    %500 = vector.broadcast %498 : vector<1x8xf32> to vector<5x8xf32>
    %501 = arith.mulf %499, %500 : vector<5x8xf32>
    %502 = arith.addf %496, %501 : vector<5x8xf32>
    %503 = vector.extract_strided_slice %485 {offsets = [0, 3], sizes = [5, 1], strides = [1, 1]} : vector<5x5xf32> to vector<5x1xf32>
    %504 = vector.extract_strided_slice %450 {offsets = [3, 0], sizes = [1, 8], strides = [1, 1]} : vector<5x8xf32> to vector<1x8xf32>
    %505 = vector.broadcast %503 : vector<5x1xf32> to vector<5x8xf32>
    %506 = vector.broadcast %504 : vector<1x8xf32> to vector<5x8xf32>
    %507 = arith.mulf %505, %506 : vector<5x8xf32>
    %508 = arith.addf %502, %507 : vector<5x8xf32>
    %509 = vector.extract_strided_slice %485 {offsets = [0, 4], sizes = [5, 1], strides = [1, 1]} : vector<5x5xf32> to vector<5x1xf32>
    %510 = vector.extract_strided_slice %450 {offsets = [4, 0], sizes = [1, 8], strides = [1, 1]} : vector<5x8xf32> to vector<1x8xf32>
    %511 = vector.broadcast %509 : vector<5x1xf32> to vector<5x8xf32>
    %512 = vector.broadcast %510 : vector<1x8xf32> to vector<5x8xf32>
    %513 = arith.mulf %511, %512 : vector<5x8xf32>
    %514 = arith.addf %508, %513 : vector<5x8xf32>
    %515 = vector.extract_strided_slice %42 {offsets = [5, 24], sizes = [5, 8], strides = [1, 1]} : vector<10x32xf32> to vector<5x8xf32>
    %516 = vector.extract_strided_slice %43 {offsets = [5, 24], sizes = [5, 8], strides = [1, 1]} : vector<10x32xf32> to vector<5x8xf32>
    %517 = vector.extract_strided_slice %44 {offsets = [5, 24], sizes = [5, 8], strides = [1, 1]} : vector<10x32xf32> to vector<5x8xf32>
    %518 = vector.extract_strided_slice %516 {offsets = [0, 0], sizes = [1, 8], strides = [1, 1]} : vector<5x8xf32> to vector<1x8xf32>
    %519 = vector.broadcast %518 : vector<1x8xf32> to vector<5x8xf32>
    %520 = arith.mulf %515, %519 : vector<5x8xf32>
    %cst_71 = arith.constant dense<0.000000e+00> : vector<5xf32>
    %521 = vector.multi_reduction <add>, %520, %cst_71 [1] : vector<5x8xf32> to vector<5xf32>
    %522 = vector.shape_cast %521 : vector<5xf32> to vector<5x1xf32>
    %523 = vector.extract_strided_slice %516 {offsets = [1, 0], sizes = [1, 8], strides = [1, 1]} : vector<5x8xf32> to vector<1x8xf32>
    %524 = vector.broadcast %523 : vector<1x8xf32> to vector<5x8xf32>
    %525 = arith.mulf %515, %524 : vector<5x8xf32>
    %cst_72 = arith.constant dense<0.000000e+00> : vector<5xf32>
    %526 = vector.multi_reduction <add>, %525, %cst_72 [1] : vector<5x8xf32> to vector<5xf32>
    %527 = vector.shape_cast %526 : vector<5xf32> to vector<5x1xf32>
    %528 = vector.extract_strided_slice %516 {offsets = [2, 0], sizes = [1, 8], strides = [1, 1]} : vector<5x8xf32> to vector<1x8xf32>
    %529 = vector.broadcast %528 : vector<1x8xf32> to vector<5x8xf32>
    %530 = arith.mulf %515, %529 : vector<5x8xf32>
    %cst_73 = arith.constant dense<0.000000e+00> : vector<5xf32>
    %531 = vector.multi_reduction <add>, %530, %cst_73 [1] : vector<5x8xf32> to vector<5xf32>
    %532 = vector.shape_cast %531 : vector<5xf32> to vector<5x1xf32>
    %533 = vector.extract_strided_slice %516 {offsets = [3, 0], sizes = [1, 8], strides = [1, 1]} : vector<5x8xf32> to vector<1x8xf32>
    %534 = vector.broadcast %533 : vector<1x8xf32> to vector<5x8xf32>
    %535 = arith.mulf %515, %534 : vector<5x8xf32>
    %cst_74 = arith.constant dense<0.000000e+00> : vector<5xf32>
    %536 = vector.multi_reduction <add>, %535, %cst_74 [1] : vector<5x8xf32> to vector<5xf32>
    %537 = vector.shape_cast %536 : vector<5xf32> to vector<5x1xf32>
    %538 = vector.extract_strided_slice %516 {offsets = [4, 0], sizes = [1, 8], strides = [1, 1]} : vector<5x8xf32> to vector<1x8xf32>
    %539 = vector.broadcast %538 : vector<1x8xf32> to vector<5x8xf32>
    %540 = arith.mulf %515, %539 : vector<5x8xf32>
    %cst_75 = arith.constant dense<0.000000e+00> : vector<5xf32>
    %541 = vector.multi_reduction <add>, %540, %cst_75 [1] : vector<5x8xf32> to vector<5xf32>
    %542 = vector.shape_cast %541 : vector<5xf32> to vector<5x1xf32>
    %543 = tpu.concatenate %522, %527, %532, %537, %542 in 1 : vector<5x1xf32>, vector<5x1xf32>, vector<5x1xf32>, vector<5x1xf32>, vector<5x1xf32> -> vector<5x5xf32>
    %cst_76 = arith.constant dense<0xFF800000> : vector<5xf32>
    %544 = vector.multi_reduction <maximumf>, %543, %cst_76 [1] : vector<5x5xf32> to vector<5xf32>
    %545 = vector.shape_cast %544 : vector<5xf32> to vector<5x1xf32>
    %546 = vector.broadcast %545 : vector<5x1xf32> to vector<5x5xf32>
    %547 = arith.subf %543, %546 : vector<5x5xf32>
    %548 = math.exp %547 : vector<5x5xf32>
    %cst_77 = arith.constant dense<0.000000e+00> : vector<5xf32>
    %549 = vector.multi_reduction <add>, %548, %cst_77 [1] : vector<5x5xf32> to vector<5xf32>
    %550 = vector.shape_cast %549 : vector<5xf32> to vector<5x1xf32>
    %551 = vector.broadcast %550 : vector<5x1xf32> to vector<5x5xf32>
    %552 = arith.divf %548, %551 : vector<5x5xf32>
    %553 = vector.extract_strided_slice %552 {offsets = [0, 0], sizes = [5, 1], strides = [1, 1]} : vector<5x5xf32> to vector<5x1xf32>
    %554 = vector.extract_strided_slice %517 {offsets = [0, 0], sizes = [1, 8], strides = [1, 1]} : vector<5x8xf32> to vector<1x8xf32>
    %555 = vector.broadcast %553 : vector<5x1xf32> to vector<5x8xf32>
    %556 = vector.broadcast %554 : vector<1x8xf32> to vector<5x8xf32>
    %557 = arith.mulf %555, %556 : vector<5x8xf32>
    %558 = vector.extract_strided_slice %552 {offsets = [0, 1], sizes = [5, 1], strides = [1, 1]} : vector<5x5xf32> to vector<5x1xf32>
    %559 = vector.extract_strided_slice %517 {offsets = [1, 0], sizes = [1, 8], strides = [1, 1]} : vector<5x8xf32> to vector<1x8xf32>
    %560 = vector.broadcast %558 : vector<5x1xf32> to vector<5x8xf32>
    %561 = vector.broadcast %559 : vector<1x8xf32> to vector<5x8xf32>
    %562 = arith.mulf %560, %561 : vector<5x8xf32>
    %563 = arith.addf %557, %562 : vector<5x8xf32>
    %564 = vector.extract_strided_slice %552 {offsets = [0, 2], sizes = [5, 1], strides = [1, 1]} : vector<5x5xf32> to vector<5x1xf32>
    %565 = vector.extract_strided_slice %517 {offsets = [2, 0], sizes = [1, 8], strides = [1, 1]} : vector<5x8xf32> to vector<1x8xf32>
    %566 = vector.broadcast %564 : vector<5x1xf32> to vector<5x8xf32>
    %567 = vector.broadcast %565 : vector<1x8xf32> to vector<5x8xf32>
    %568 = arith.mulf %566, %567 : vector<5x8xf32>
    %569 = arith.addf %563, %568 : vector<5x8xf32>
    %570 = vector.extract_strided_slice %552 {offsets = [0, 3], sizes = [5, 1], strides = [1, 1]} : vector<5x5xf32> to vector<5x1xf32>
    %571 = vector.extract_strided_slice %517 {offsets = [3, 0], sizes = [1, 8], strides = [1, 1]} : vector<5x8xf32> to vector<1x8xf32>
    %572 = vector.broadcast %570 : vector<5x1xf32> to vector<5x8xf32>
    %573 = vector.broadcast %571 : vector<1x8xf32> to vector<5x8xf32>
    %574 = arith.mulf %572, %573 : vector<5x8xf32>
    %575 = arith.addf %569, %574 : vector<5x8xf32>
    %576 = vector.extract_strided_slice %552 {offsets = [0, 4], sizes = [5, 1], strides = [1, 1]} : vector<5x5xf32> to vector<5x1xf32>
    %577 = vector.extract_strided_slice %517 {offsets = [4, 0], sizes = [1, 8], strides = [1, 1]} : vector<5x8xf32> to vector<1x8xf32>
    %578 = vector.broadcast %576 : vector<5x1xf32> to vector<5x8xf32>
    %579 = vector.broadcast %577 : vector<1x8xf32> to vector<5x8xf32>
    %580 = arith.mulf %578, %579 : vector<5x8xf32>
    %581 = arith.addf %575, %580 : vector<5x8xf32>
    %582 = tpu.concatenate %380, %447, %514, %581 in 1 : vector<5x8xf32>, vector<5x8xf32>, vector<5x8xf32>, vector<5x8xf32> -> vector<5x32xf32>
    %583 = tpu.concatenate %313, %582 in 0 : vector<5x32xf32>, vector<5x32xf32> -> vector<10x32xf32>
    %584 = arith.truncf %583 : vector<10x32xf32> to vector<10x32xbf16>
    %c0_78 = arith.constant 0 : index
    %c0_79 = arith.constant 0 : index
    %c0_80 = arith.constant 0 : index
    %585 = vector.load %arg4[%c0_78, %c0_79, %c0_80] : memref<2x32x32xbf16, #tpu.memory_space<vmem>>, vector<1x32x32xbf16>
    %586 = vector.shape_cast %585 : vector<1x32x32xbf16> to vector<32x32xbf16>
    %cst_81 = arith.constant dense<0.000000e+00> : vector<10x32xf32>
    %587 = tpu.matmul %584, %586, %cst_81 {dimension_numbers = #tpu.dot_dimension_numbers<[1], [0], [0], [1], [0, 0, 1, 1], [], []>} : vector<10x32xbf16>, vector<32x32xbf16>, vector<10x32xf32> -> vector<10x32xf32>
    %588 = arith.addf %5, %587 : vector<10x32xf32>
    %589 = vector.broadcast %9 : vector<1x32xf32> to vector<10x32xf32>
    %590 = arith.addf %588, %589 : vector<10x32xf32>
    %cst_82 = arith.constant dense<0.000000e+00> : vector<10xf32>
    %591 = vector.multi_reduction <add>, %590, %cst_82 [1] : vector<10x32xf32> to vector<10xf32>
    %592 = vector.shape_cast %591 : vector<10xf32> to vector<10x1xf32>
    %cst_83 = arith.constant 3.200000e+01 : f32
    %593 = vector.broadcast %cst_83 : f32 to vector<10x1xf32>
    %594 = arith.divf %592, %593 : vector<10x1xf32>
    %595 = vector.broadcast %594 : vector<10x1xf32> to vector<10x32xf32>
    %596 = arith.subf %590, %595 : vector<10x32xf32>
    %597 = arith.mulf %596, %596 : vector<10x32xf32>
    %cst_84 = arith.constant dense<0.000000e+00> : vector<10xf32>
    %598 = vector.multi_reduction <add>, %597, %cst_84 [1] : vector<10x32xf32> to vector<10xf32>
    %599 = vector.shape_cast %598 : vector<10xf32> to vector<10x1xf32>
    %cst_85 = arith.constant 3.200000e+01 : f32
    %600 = vector.broadcast %cst_85 : f32 to vector<10x1xf32>
    %601 = arith.divf %599, %600 : vector<10x1xf32>
    %602 = vector.broadcast %594 : vector<10x1xf32> to vector<10x32xf32>
    %603 = arith.subf %590, %602 : vector<10x32xf32>
    %cst_86 = arith.constant 9.99999997E-7 : f32
    %604 = vector.broadcast %cst_86 : f32 to vector<10x1xf32>
    %605 = arith.addf %601, %604 : vector<10x1xf32>
    %606 = math.rsqrt %605 : vector<10x1xf32>
    %607 = vector.broadcast %606 : vector<10x1xf32> to vector<10x32xf32>
    %608 = arith.mulf %603, %607 : vector<10x32xf32>
    %609 = vector.broadcast %10 : vector<1x32xf32> to vector<10x32xf32>
    %610 = arith.mulf %608, %609 : vector<10x32xf32>
    %611 = vector.broadcast %11 : vector<1x32xf32> to vector<10x32xf32>
    %612 = arith.addf %610, %611 : vector<10x32xf32>
    %613 = arith.truncf %612 : vector<10x32xf32> to vector<10x32xbf16>
    %c0_87 = arith.constant 0 : index
    %c0_88 = arith.constant 0 : index
    %c0_89 = arith.constant 0 : index
    %614 = vector.load %arg5[%c0_87, %c0_88, %c0_89] : memref<2x32x64xbf16, #tpu.memory_space<vmem>>, vector<1x32x64xbf16>
    %615 = vector.shape_cast %614 : vector<1x32x64xbf16> to vector<32x64xbf16>
    %cst_90 = arith.constant dense<0.000000e+00> : vector<10x64xf32>
    %616 = tpu.matmul %613, %615, %cst_90 {dimension_numbers = #tpu.dot_dimension_numbers<[1], [0], [0], [1], [0, 0, 1, 1], [], []>} : vector<10x32xbf16>, vector<32x64xbf16>, vector<10x64xf32> -> vector<10x64xf32>
    %617 = vector.broadcast %12 : vector<1x64xf32> to vector<10x64xf32>
    %618 = arith.addf %616, %617 : vector<10x64xf32>
    %cst_91 = arith.constant 5.000000e-01 : f32
    %619 = vector.broadcast %cst_91 : f32 to vector<10x64xf32>
    %620 = arith.mulf %619, %618 : vector<10x64xf32>
    %cst_92 = arith.constant 4.471500e-02 : f32
    %621 = vector.broadcast %cst_92 : f32 to vector<10x64xf32>
    %622 = arith.mulf %621, %618 : vector<10x64xf32>
    %623 = arith.mulf %622, %618 : vector<10x64xf32>
    %624 = arith.mulf %623, %618 : vector<10x64xf32>
    %625 = arith.addf %618, %624 : vector<10x64xf32>
    %cst_93 = arith.constant 0.797884583 : f32
    %626 = vector.broadcast %cst_93 : f32 to vector<10x64xf32>
    %627 = arith.mulf %626, %625 : vector<10x64xf32>
    %628 = math.tanh %627 : vector<10x64xf32>
    %cst_94 = arith.constant 1.000000e+00 : f32
    %629 = vector.broadcast %cst_94 : f32 to vector<10x64xf32>
    %630 = arith.addf %629, %628 : vector<10x64xf32>
    %631 = arith.mulf %620, %630 : vector<10x64xf32>
    %632 = arith.truncf %631 : vector<10x64xf32> to vector<10x64xbf16>
    %c0_95 = arith.constant 0 : index
    %c0_96 = arith.constant 0 : index
    %c0_97 = arith.constant 0 : index
    %633 = vector.load %arg6[%c0_95, %c0_96, %c0_97] : memref<2x64x32xbf16, #tpu.memory_space<vmem>>, vector<1x64x32xbf16>
    %634 = vector.shape_cast %633 : vector<1x64x32xbf16> to vector<64x32xbf16>
    %cst_98 = arith.constant dense<0.000000e+00> : vector<10x32xf32>
    %635 = tpu.matmul %632, %634, %cst_98 {dimension_numbers = #tpu.dot_dimension_numbers<[1], [0], [0], [1], [0, 0, 1, 1], [], []>} : vector<10x64xbf16>, vector<64x32xbf16>, vector<10x32xf32> -> vector<10x32xf32>
    %636 = arith.addf %590, %635 : vector<10x32xf32>
    %637 = vector.broadcast %13 : vector<1x32xf32> to vector<10x32xf32>
    %638 = arith.addf %636, %637 : vector<10x32xf32>
    %c13 = arith.constant 13 : index
    %c0_99 = arith.constant 0 : index
    %639 = vector.load %arg7[%c13, %c0_99] : memref<24x128xf32, #tpu.memory_space<vmem>>, vector<1x32xf32>
    %c14 = arith.constant 14 : index
    %c0_100 = arith.constant 0 : index
    %640 = vector.load %arg7[%c14, %c0_100] : memref<24x128xf32, #tpu.memory_space<vmem>>, vector<1x32xf32>
    %c15 = arith.constant 15 : index
    %c0_101 = arith.constant 0 : index
    %641 = vector.load %arg7[%c15, %c0_101] : memref<24x128xf32, #tpu.memory_space<vmem>>, vector<1x96xf32>
    %c16 = arith.constant 16 : index
    %c0_102 = arith.constant 0 : index
    %642 = vector.load %arg7[%c16, %c0_102] : memref<24x128xf32, #tpu.memory_space<vmem>>, vector<1x32xf32>
    %c17 = arith.constant 17 : index
    %c0_103 = arith.constant 0 : index
    %643 = vector.load %arg7[%c17, %c0_103] : memref<24x128xf32, #tpu.memory_space<vmem>>, vector<1x32xf32>
    %c18 = arith.constant 18 : index
    %c0_104 = arith.constant 0 : index
    %644 = vector.load %arg7[%c18, %c0_104] : memref<24x128xf32, #tpu.memory_space<vmem>>, vector<1x32xf32>
    %c19 = arith.constant 19 : index
    %c0_105 = arith.constant 0 : index
    %645 = vector.load %arg7[%c19, %c0_105] : memref<24x128xf32, #tpu.memory_space<vmem>>, vector<1x64xf32>
    %c20 = arith.constant 20 : index
    %c0_106 = arith.constant 0 : index
    %646 = vector.load %arg7[%c20, %c0_106] : memref<24x128xf32, #tpu.memory_space<vmem>>, vector<1x32xf32>
    %cst_107 = arith.constant dense<0.000000e+00> : vector<10xf32>
    %647 = vector.multi_reduction <add>, %638, %cst_107 [1] : vector<10x32xf32> to vector<10xf32>
    %648 = vector.shape_cast %647 : vector<10xf32> to vector<10x1xf32>
    %cst_108 = arith.constant 3.200000e+01 : f32
    %649 = vector.broadcast %cst_108 : f32 to vector<10x1xf32>
    %650 = arith.divf %648, %649 : vector<10x1xf32>
    %651 = vector.broadcast %650 : vector<10x1xf32> to vector<10x32xf32>
    %652 = arith.subf %638, %651 : vector<10x32xf32>
    %653 = arith.mulf %652, %652 : vector<10x32xf32>
    %cst_109 = arith.constant dense<0.000000e+00> : vector<10xf32>
    %654 = vector.multi_reduction <add>, %653, %cst_109 [1] : vector<10x32xf32> to vector<10xf32>
    %655 = vector.shape_cast %654 : vector<10xf32> to vector<10x1xf32>
    %cst_110 = arith.constant 3.200000e+01 : f32
    %656 = vector.broadcast %cst_110 : f32 to vector<10x1xf32>
    %657 = arith.divf %655, %656 : vector<10x1xf32>
    %658 = vector.broadcast %650 : vector<10x1xf32> to vector<10x32xf32>
    %659 = arith.subf %638, %658 : vector<10x32xf32>
    %cst_111 = arith.constant 9.99999997E-7 : f32
    %660 = vector.broadcast %cst_111 : f32 to vector<10x1xf32>
    %661 = arith.addf %657, %660 : vector<10x1xf32>
    %662 = math.rsqrt %661 : vector<10x1xf32>
    %663 = vector.broadcast %662 : vector<10x1xf32> to vector<10x32xf32>
    %664 = arith.mulf %659, %663 : vector<10x32xf32>
    %665 = vector.broadcast %639 : vector<1x32xf32> to vector<10x32xf32>
    %666 = arith.mulf %664, %665 : vector<10x32xf32>
    %667 = vector.broadcast %640 : vector<1x32xf32> to vector<10x32xf32>
    %668 = arith.addf %666, %667 : vector<10x32xf32>
    %669 = arith.truncf %668 : vector<10x32xf32> to vector<10x32xbf16>
    %c1 = arith.constant 1 : index
    %c0_112 = arith.constant 0 : index
    %c0_113 = arith.constant 0 : index
    %670 = vector.load %arg3[%c1, %c0_112, %c0_113] : memref<2x32x96xbf16, #tpu.memory_space<vmem>>, vector<1x32x96xbf16>
    %671 = vector.shape_cast %670 : vector<1x32x96xbf16> to vector<32x96xbf16>
    %cst_114 = arith.constant dense<0.000000e+00> : vector<10x96xf32>
    %672 = tpu.matmul %669, %671, %cst_114 {dimension_numbers = #tpu.dot_dimension_numbers<[1], [0], [0], [1], [0, 0, 1, 1], [], []>} : vector<10x32xbf16>, vector<32x96xbf16>, vector<10x96xf32> -> vector<10x96xf32>
    %673 = vector.broadcast %641 : vector<1x96xf32> to vector<10x96xf32>
    %674 = arith.addf %672, %673 : vector<10x96xf32>
    %675 = vector.extract_strided_slice %674 {offsets = [0, 0], sizes = [10, 32], strides = [1, 1]} : vector<10x96xf32> to vector<10x32xf32>
    %676 = vector.extract_strided_slice %674 {offsets = [0, 32], sizes = [10, 32], strides = [1, 1]} : vector<10x96xf32> to vector<10x32xf32>
    %677 = vector.extract_strided_slice %674 {offsets = [0, 64], sizes = [10, 32], strides = [1, 1]} : vector<10x96xf32> to vector<10x32xf32>
    %678 = vector.extract_strided_slice %675 {offsets = [0, 0], sizes = [5, 8], strides = [1, 1]} : vector<10x32xf32> to vector<5x8xf32>
    %679 = vector.extract_strided_slice %676 {offsets = [0, 0], sizes = [5, 8], strides = [1, 1]} : vector<10x32xf32> to vector<5x8xf32>
    %680 = vector.extract_strided_slice %677 {offsets = [0, 0], sizes = [5, 8], strides = [1, 1]} : vector<10x32xf32> to vector<5x8xf32>
    %681 = vector.extract_strided_slice %679 {offsets = [0, 0], sizes = [1, 8], strides = [1, 1]} : vector<5x8xf32> to vector<1x8xf32>
    %682 = vector.broadcast %681 : vector<1x8xf32> to vector<5x8xf32>
    %683 = arith.mulf %678, %682 : vector<5x8xf32>
    %cst_115 = arith.constant dense<0.000000e+00> : vector<5xf32>
    %684 = vector.multi_reduction <add>, %683, %cst_115 [1] : vector<5x8xf32> to vector<5xf32>
    %685 = vector.shape_cast %684 : vector<5xf32> to vector<5x1xf32>
    %686 = vector.extract_strided_slice %679 {offsets = [1, 0], sizes = [1, 8], strides = [1, 1]} : vector<5x8xf32> to vector<1x8xf32>
    %687 = vector.broadcast %686 : vector<1x8xf32> to vector<5x8xf32>
    %688 = arith.mulf %678, %687 : vector<5x8xf32>
    %cst_116 = arith.constant dense<0.000000e+00> : vector<5xf32>
    %689 = vector.multi_reduction <add>, %688, %cst_116 [1] : vector<5x8xf32> to vector<5xf32>
    %690 = vector.shape_cast %689 : vector<5xf32> to vector<5x1xf32>
    %691 = vector.extract_strided_slice %679 {offsets = [2, 0], sizes = [1, 8], strides = [1, 1]} : vector<5x8xf32> to vector<1x8xf32>
    %692 = vector.broadcast %691 : vector<1x8xf32> to vector<5x8xf32>
    %693 = arith.mulf %678, %692 : vector<5x8xf32>
    %cst_117 = arith.constant dense<0.000000e+00> : vector<5xf32>
    %694 = vector.multi_reduction <add>, %693, %cst_117 [1] : vector<5x8xf32> to vector<5xf32>
    %695 = vector.shape_cast %694 : vector<5xf32> to vector<5x1xf32>
    %696 = vector.extract_strided_slice %679 {offsets = [3, 0], sizes = [1, 8], strides = [1, 1]} : vector<5x8xf32> to vector<1x8xf32>
    %697 = vector.broadcast %696 : vector<1x8xf32> to vector<5x8xf32>
    %698 = arith.mulf %678, %697 : vector<5x8xf32>
    %cst_118 = arith.constant dense<0.000000e+00> : vector<5xf32>
    %699 = vector.multi_reduction <add>, %698, %cst_118 [1] : vector<5x8xf32> to vector<5xf32>
    %700 = vector.shape_cast %699 : vector<5xf32> to vector<5x1xf32>
    %701 = vector.extract_strided_slice %679 {offsets = [4, 0], sizes = [1, 8], strides = [1, 1]} : vector<5x8xf32> to vector<1x8xf32>
    %702 = vector.broadcast %701 : vector<1x8xf32> to vector<5x8xf32>
    %703 = arith.mulf %678, %702 : vector<5x8xf32>
    %cst_119 = arith.constant dense<0.000000e+00> : vector<5xf32>
    %704 = vector.multi_reduction <add>, %703, %cst_119 [1] : vector<5x8xf32> to vector<5xf32>
    %705 = vector.shape_cast %704 : vector<5xf32> to vector<5x1xf32>
    %706 = tpu.concatenate %685, %690, %695, %700, %705 in 1 : vector<5x1xf32>, vector<5x1xf32>, vector<5x1xf32>, vector<5x1xf32>, vector<5x1xf32> -> vector<5x5xf32>
    %cst_120 = arith.constant dense<0xFF800000> : vector<5xf32>
    %707 = vector.multi_reduction <maximumf>, %706, %cst_120 [1] : vector<5x5xf32> to vector<5xf32>
    %708 = vector.shape_cast %707 : vector<5xf32> to vector<5x1xf32>
    %709 = vector.broadcast %708 : vector<5x1xf32> to vector<5x5xf32>
    %710 = arith.subf %706, %709 : vector<5x5xf32>
    %711 = math.exp %710 : vector<5x5xf32>
    %cst_121 = arith.constant dense<0.000000e+00> : vector<5xf32>
    %712 = vector.multi_reduction <add>, %711, %cst_121 [1] : vector<5x5xf32> to vector<5xf32>
    %713 = vector.shape_cast %712 : vector<5xf32> to vector<5x1xf32>
    %714 = vector.broadcast %713 : vector<5x1xf32> to vector<5x5xf32>
    %715 = arith.divf %711, %714 : vector<5x5xf32>
    %716 = vector.extract_strided_slice %715 {offsets = [0, 0], sizes = [5, 1], strides = [1, 1]} : vector<5x5xf32> to vector<5x1xf32>
    %717 = vector.extract_strided_slice %680 {offsets = [0, 0], sizes = [1, 8], strides = [1, 1]} : vector<5x8xf32> to vector<1x8xf32>
    %718 = vector.broadcast %716 : vector<5x1xf32> to vector<5x8xf32>
    %719 = vector.broadcast %717 : vector<1x8xf32> to vector<5x8xf32>
    %720 = arith.mulf %718, %719 : vector<5x8xf32>
    %721 = vector.extract_strided_slice %715 {offsets = [0, 1], sizes = [5, 1], strides = [1, 1]} : vector<5x5xf32> to vector<5x1xf32>
    %722 = vector.extract_strided_slice %680 {offsets = [1, 0], sizes = [1, 8], strides = [1, 1]} : vector<5x8xf32> to vector<1x8xf32>
    %723 = vector.broadcast %721 : vector<5x1xf32> to vector<5x8xf32>
    %724 = vector.broadcast %722 : vector<1x8xf32> to vector<5x8xf32>
    %725 = arith.mulf %723, %724 : vector<5x8xf32>
    %726 = arith.addf %720, %725 : vector<5x8xf32>
    %727 = vector.extract_strided_slice %715 {offsets = [0, 2], sizes = [5, 1], strides = [1, 1]} : vector<5x5xf32> to vector<5x1xf32>
    %728 = vector.extract_strided_slice %680 {offsets = [2, 0], sizes = [1, 8], strides = [1, 1]} : vector<5x8xf32> to vector<1x8xf32>
    %729 = vector.broadcast %727 : vector<5x1xf32> to vector<5x8xf32>
    %730 = vector.broadcast %728 : vector<1x8xf32> to vector<5x8xf32>
    %731 = arith.mulf %729, %730 : vector<5x8xf32>
    %732 = arith.addf %726, %731 : vector<5x8xf32>
    %733 = vector.extract_strided_slice %715 {offsets = [0, 3], sizes = [5, 1], strides = [1, 1]} : vector<5x5xf32> to vector<5x1xf32>
    %734 = vector.extract_strided_slice %680 {offsets = [3, 0], sizes = [1, 8], strides = [1, 1]} : vector<5x8xf32> to vector<1x8xf32>
    %735 = vector.broadcast %733 : vector<5x1xf32> to vector<5x8xf32>
    %736 = vector.broadcast %734 : vector<1x8xf32> to vector<5x8xf32>
    %737 = arith.mulf %735, %736 : vector<5x8xf32>
    %738 = arith.addf %732, %737 : vector<5x8xf32>
    %739 = vector.extract_strided_slice %715 {offsets = [0, 4], sizes = [5, 1], strides = [1, 1]} : vector<5x5xf32> to vector<5x1xf32>
    %740 = vector.extract_strided_slice %680 {offsets = [4, 0], sizes = [1, 8], strides = [1, 1]} : vector<5x8xf32> to vector<1x8xf32>
    %741 = vector.broadcast %739 : vector<5x1xf32> to vector<5x8xf32>
    %742 = vector.broadcast %740 : vector<1x8xf32> to vector<5x8xf32>
    %743 = arith.mulf %741, %742 : vector<5x8xf32>
    %744 = arith.addf %738, %743 : vector<5x8xf32>
    %745 = vector.extract_strided_slice %675 {offsets = [0, 8], sizes = [5, 8], strides = [1, 1]} : vector<10x32xf32> to vector<5x8xf32>
    %746 = vector.extract_strided_slice %676 {offsets = [0, 8], sizes = [5, 8], strides = [1, 1]} : vector<10x32xf32> to vector<5x8xf32>
    %747 = vector.extract_strided_slice %677 {offsets = [0, 8], sizes = [5, 8], strides = [1, 1]} : vector<10x32xf32> to vector<5x8xf32>
    %748 = vector.extract_strided_slice %746 {offsets = [0, 0], sizes = [1, 8], strides = [1, 1]} : vector<5x8xf32> to vector<1x8xf32>
    %749 = vector.broadcast %748 : vector<1x8xf32> to vector<5x8xf32>
    %750 = arith.mulf %745, %749 : vector<5x8xf32>
    %cst_122 = arith.constant dense<0.000000e+00> : vector<5xf32>
    %751 = vector.multi_reduction <add>, %750, %cst_122 [1] : vector<5x8xf32> to vector<5xf32>
    %752 = vector.shape_cast %751 : vector<5xf32> to vector<5x1xf32>
    %753 = vector.extract_strided_slice %746 {offsets = [1, 0], sizes = [1, 8], strides = [1, 1]} : vector<5x8xf32> to vector<1x8xf32>
    %754 = vector.broadcast %753 : vector<1x8xf32> to vector<5x8xf32>
    %755 = arith.mulf %745, %754 : vector<5x8xf32>
    %cst_123 = arith.constant dense<0.000000e+00> : vector<5xf32>
    %756 = vector.multi_reduction <add>, %755, %cst_123 [1] : vector<5x8xf32> to vector<5xf32>
    %757 = vector.shape_cast %756 : vector<5xf32> to vector<5x1xf32>
    %758 = vector.extract_strided_slice %746 {offsets = [2, 0], sizes = [1, 8], strides = [1, 1]} : vector<5x8xf32> to vector<1x8xf32>
    %759 = vector.broadcast %758 : vector<1x8xf32> to vector<5x8xf32>
    %760 = arith.mulf %745, %759 : vector<5x8xf32>
    %cst_124 = arith.constant dense<0.000000e+00> : vector<5xf32>
    %761 = vector.multi_reduction <add>, %760, %cst_124 [1] : vector<5x8xf32> to vector<5xf32>
    %762 = vector.shape_cast %761 : vector<5xf32> to vector<5x1xf32>
    %763 = vector.extract_strided_slice %746 {offsets = [3, 0], sizes = [1, 8], strides = [1, 1]} : vector<5x8xf32> to vector<1x8xf32>
    %764 = vector.broadcast %763 : vector<1x8xf32> to vector<5x8xf32>
    %765 = arith.mulf %745, %764 : vector<5x8xf32>
    %cst_125 = arith.constant dense<0.000000e+00> : vector<5xf32>
    %766 = vector.multi_reduction <add>, %765, %cst_125 [1] : vector<5x8xf32> to vector<5xf32>
    %767 = vector.shape_cast %766 : vector<5xf32> to vector<5x1xf32>
    %768 = vector.extract_strided_slice %746 {offsets = [4, 0], sizes = [1, 8], strides = [1, 1]} : vector<5x8xf32> to vector<1x8xf32>
    %769 = vector.broadcast %768 : vector<1x8xf32> to vector<5x8xf32>
    %770 = arith.mulf %745, %769 : vector<5x8xf32>
    %cst_126 = arith.constant dense<0.000000e+00> : vector<5xf32>
    %771 = vector.multi_reduction <add>, %770, %cst_126 [1] : vector<5x8xf32> to vector<5xf32>
    %772 = vector.shape_cast %771 : vector<5xf32> to vector<5x1xf32>
    %773 = tpu.concatenate %752, %757, %762, %767, %772 in 1 : vector<5x1xf32>, vector<5x1xf32>, vector<5x1xf32>, vector<5x1xf32>, vector<5x1xf32> -> vector<5x5xf32>
    %cst_127 = arith.constant dense<0xFF800000> : vector<5xf32>
    %774 = vector.multi_reduction <maximumf>, %773, %cst_127 [1] : vector<5x5xf32> to vector<5xf32>
    %775 = vector.shape_cast %774 : vector<5xf32> to vector<5x1xf32>
    %776 = vector.broadcast %775 : vector<5x1xf32> to vector<5x5xf32>
    %777 = arith.subf %773, %776 : vector<5x5xf32>
    %778 = math.exp %777 : vector<5x5xf32>
    %cst_128 = arith.constant dense<0.000000e+00> : vector<5xf32>
    %779 = vector.multi_reduction <add>, %778, %cst_128 [1] : vector<5x5xf32> to vector<5xf32>
    %780 = vector.shape_cast %779 : vector<5xf32> to vector<5x1xf32>
    %781 = vector.broadcast %780 : vector<5x1xf32> to vector<5x5xf32>
    %782 = arith.divf %778, %781 : vector<5x5xf32>
    %783 = vector.extract_strided_slice %782 {offsets = [0, 0], sizes = [5, 1], strides = [1, 1]} : vector<5x5xf32> to vector<5x1xf32>
    %784 = vector.extract_strided_slice %747 {offsets = [0, 0], sizes = [1, 8], strides = [1, 1]} : vector<5x8xf32> to vector<1x8xf32>
    %785 = vector.broadcast %783 : vector<5x1xf32> to vector<5x8xf32>
    %786 = vector.broadcast %784 : vector<1x8xf32> to vector<5x8xf32>
    %787 = arith.mulf %785, %786 : vector<5x8xf32>
    %788 = vector.extract_strided_slice %782 {offsets = [0, 1], sizes = [5, 1], strides = [1, 1]} : vector<5x5xf32> to vector<5x1xf32>
    %789 = vector.extract_strided_slice %747 {offsets = [1, 0], sizes = [1, 8], strides = [1, 1]} : vector<5x8xf32> to vector<1x8xf32>
    %790 = vector.broadcast %788 : vector<5x1xf32> to vector<5x8xf32>
    %791 = vector.broadcast %789 : vector<1x8xf32> to vector<5x8xf32>
    %792 = arith.mulf %790, %791 : vector<5x8xf32>
    %793 = arith.addf %787, %792 : vector<5x8xf32>
    %794 = vector.extract_strided_slice %782 {offsets = [0, 2], sizes = [5, 1], strides = [1, 1]} : vector<5x5xf32> to vector<5x1xf32>
    %795 = vector.extract_strided_slice %747 {offsets = [2, 0], sizes = [1, 8], strides = [1, 1]} : vector<5x8xf32> to vector<1x8xf32>
    %796 = vector.broadcast %794 : vector<5x1xf32> to vector<5x8xf32>
    %797 = vector.broadcast %795 : vector<1x8xf32> to vector<5x8xf32>
    %798 = arith.mulf %796, %797 : vector<5x8xf32>
    %799 = arith.addf %793, %798 : vector<5x8xf32>
    %800 = vector.extract_strided_slice %782 {offsets = [0, 3], sizes = [5, 1], strides = [1, 1]} : vector<5x5xf32> to vector<5x1xf32>
    %801 = vector.extract_strided_slice %747 {offsets = [3, 0], sizes = [1, 8], strides = [1, 1]} : vector<5x8xf32> to vector<1x8xf32>
    %802 = vector.broadcast %800 : vector<5x1xf32> to vector<5x8xf32>
    %803 = vector.broadcast %801 : vector<1x8xf32> to vector<5x8xf32>
    %804 = arith.mulf %802, %803 : vector<5x8xf32>
    %805 = arith.addf %799, %804 : vector<5x8xf32>
    %806 = vector.extract_strided_slice %782 {offsets = [0, 4], sizes = [5, 1], strides = [1, 1]} : vector<5x5xf32> to vector<5x1xf32>
    %807 = vector.extract_strided_slice %747 {offsets = [4, 0], sizes = [1, 8], strides = [1, 1]} : vector<5x8xf32> to vector<1x8xf32>
    %808 = vector.broadcast %806 : vector<5x1xf32> to vector<5x8xf32>
    %809 = vector.broadcast %807 : vector<1x8xf32> to vector<5x8xf32>
    %810 = arith.mulf %808, %809 : vector<5x8xf32>
    %811 = arith.addf %805, %810 : vector<5x8xf32>
    %812 = vector.extract_strided_slice %675 {offsets = [0, 16], sizes = [5, 8], strides = [1, 1]} : vector<10x32xf32> to vector<5x8xf32>
    %813 = vector.extract_strided_slice %676 {offsets = [0, 16], sizes = [5, 8], strides = [1, 1]} : vector<10x32xf32> to vector<5x8xf32>
    %814 = vector.extract_strided_slice %677 {offsets = [0, 16], sizes = [5, 8], strides = [1, 1]} : vector<10x32xf32> to vector<5x8xf32>
    %815 = vector.extract_strided_slice %813 {offsets = [0, 0], sizes = [1, 8], strides = [1, 1]} : vector<5x8xf32> to vector<1x8xf32>
    %816 = vector.broadcast %815 : vector<1x8xf32> to vector<5x8xf32>
    %817 = arith.mulf %812, %816 : vector<5x8xf32>
    %cst_129 = arith.constant dense<0.000000e+00> : vector<5xf32>
    %818 = vector.multi_reduction <add>, %817, %cst_129 [1] : vector<5x8xf32> to vector<5xf32>
    %819 = vector.shape_cast %818 : vector<5xf32> to vector<5x1xf32>
    %820 = vector.extract_strided_slice %813 {offsets = [1, 0], sizes = [1, 8], strides = [1, 1]} : vector<5x8xf32> to vector<1x8xf32>
    %821 = vector.broadcast %820 : vector<1x8xf32> to vector<5x8xf32>
    %822 = arith.mulf %812, %821 : vector<5x8xf32>
    %cst_130 = arith.constant dense<0.000000e+00> : vector<5xf32>
    %823 = vector.multi_reduction <add>, %822, %cst_130 [1] : vector<5x8xf32> to vector<5xf32>
    %824 = vector.shape_cast %823 : vector<5xf32> to vector<5x1xf32>
    %825 = vector.extract_strided_slice %813 {offsets = [2, 0], sizes = [1, 8], strides = [1, 1]} : vector<5x8xf32> to vector<1x8xf32>
    %826 = vector.broadcast %825 : vector<1x8xf32> to vector<5x8xf32>
    %827 = arith.mulf %812, %826 : vector<5x8xf32>
    %cst_131 = arith.constant dense<0.000000e+00> : vector<5xf32>
    %828 = vector.multi_reduction <add>, %827, %cst_131 [1] : vector<5x8xf32> to vector<5xf32>
    %829 = vector.shape_cast %828 : vector<5xf32> to vector<5x1xf32>
    %830 = vector.extract_strided_slice %813 {offsets = [3, 0], sizes = [1, 8], strides = [1, 1]} : vector<5x8xf32> to vector<1x8xf32>
    %831 = vector.broadcast %830 : vector<1x8xf32> to vector<5x8xf32>
    %832 = arith.mulf %812, %831 : vector<5x8xf32>
    %cst_132 = arith.constant dense<0.000000e+00> : vector<5xf32>
    %833 = vector.multi_reduction <add>, %832, %cst_132 [1] : vector<5x8xf32> to vector<5xf32>
    %834 = vector.shape_cast %833 : vector<5xf32> to vector<5x1xf32>
    %835 = vector.extract_strided_slice %813 {offsets = [4, 0], sizes = [1, 8], strides = [1, 1]} : vector<5x8xf32> to vector<1x8xf32>
    %836 = vector.broadcast %835 : vector<1x8xf32> to vector<5x8xf32>
    %837 = arith.mulf %812, %836 : vector<5x8xf32>
    %cst_133 = arith.constant dense<0.000000e+00> : vector<5xf32>
    %838 = vector.multi_reduction <add>, %837, %cst_133 [1] : vector<5x8xf32> to vector<5xf32>
    %839 = vector.shape_cast %838 : vector<5xf32> to vector<5x1xf32>
    %840 = tpu.concatenate %819, %824, %829, %834, %839 in 1 : vector<5x1xf32>, vector<5x1xf32>, vector<5x1xf32>, vector<5x1xf32>, vector<5x1xf32> -> vector<5x5xf32>
    %cst_134 = arith.constant dense<0xFF800000> : vector<5xf32>
    %841 = vector.multi_reduction <maximumf>, %840, %cst_134 [1] : vector<5x5xf32> to vector<5xf32>
    %842 = vector.shape_cast %841 : vector<5xf32> to vector<5x1xf32>
    %843 = vector.broadcast %842 : vector<5x1xf32> to vector<5x5xf32>
    %844 = arith.subf %840, %843 : vector<5x5xf32>
    %845 = math.exp %844 : vector<5x5xf32>
    %cst_135 = arith.constant dense<0.000000e+00> : vector<5xf32>
    %846 = vector.multi_reduction <add>, %845, %cst_135 [1] : vector<5x5xf32> to vector<5xf32>
    %847 = vector.shape_cast %846 : vector<5xf32> to vector<5x1xf32>
    %848 = vector.broadcast %847 : vector<5x1xf32> to vector<5x5xf32>
    %849 = arith.divf %845, %848 : vector<5x5xf32>
    %850 = vector.extract_strided_slice %849 {offsets = [0, 0], sizes = [5, 1], strides = [1, 1]} : vector<5x5xf32> to vector<5x1xf32>
    %851 = vector.extract_strided_slice %814 {offsets = [0, 0], sizes = [1, 8], strides = [1, 1]} : vector<5x8xf32> to vector<1x8xf32>
    %852 = vector.broadcast %850 : vector<5x1xf32> to vector<5x8xf32>
    %853 = vector.broadcast %851 : vector<1x8xf32> to vector<5x8xf32>
    %854 = arith.mulf %852, %853 : vector<5x8xf32>
    %855 = vector.extract_strided_slice %849 {offsets = [0, 1], sizes = [5, 1], strides = [1, 1]} : vector<5x5xf32> to vector<5x1xf32>
    %856 = vector.extract_strided_slice %814 {offsets = [1, 0], sizes = [1, 8], strides = [1, 1]} : vector<5x8xf32> to vector<1x8xf32>
    %857 = vector.broadcast %855 : vector<5x1xf32> to vector<5x8xf32>
    %858 = vector.broadcast %856 : vector<1x8xf32> to vector<5x8xf32>
    %859 = arith.mulf %857, %858 : vector<5x8xf32>
    %860 = arith.addf %854, %859 : vector<5x8xf32>
    %861 = vector.extract_strided_slice %849 {offsets = [0, 2], sizes = [5, 1], strides = [1, 1]} : vector<5x5xf32> to vector<5x1xf32>
    %862 = vector.extract_strided_slice %814 {offsets = [2, 0], sizes = [1, 8], strides = [1, 1]} : vector<5x8xf32> to vector<1x8xf32>
    %863 = vector.broadcast %861 : vector<5x1xf32> to vector<5x8xf32>
    %864 = vector.broadcast %862 : vector<1x8xf32> to vector<5x8xf32>
    %865 = arith.mulf %863, %864 : vector<5x8xf32>
    %866 = arith.addf %860, %865 : vector<5x8xf32>
    %867 = vector.extract_strided_slice %849 {offsets = [0, 3], sizes = [5, 1], strides = [1, 1]} : vector<5x5xf32> to vector<5x1xf32>
    %868 = vector.extract_strided_slice %814 {offsets = [3, 0], sizes = [1, 8], strides = [1, 1]} : vector<5x8xf32> to vector<1x8xf32>
    %869 = vector.broadcast %867 : vector<5x1xf32> to vector<5x8xf32>
    %870 = vector.broadcast %868 : vector<1x8xf32> to vector<5x8xf32>
    %871 = arith.mulf %869, %870 : vector<5x8xf32>
    %872 = arith.addf %866, %871 : vector<5x8xf32>
    %873 = vector.extract_strided_slice %849 {offsets = [0, 4], sizes = [5, 1], strides = [1, 1]} : vector<5x5xf32> to vector<5x1xf32>
    %874 = vector.extract_strided_slice %814 {offsets = [4, 0], sizes = [1, 8], strides = [1, 1]} : vector<5x8xf32> to vector<1x8xf32>
    %875 = vector.broadcast %873 : vector<5x1xf32> to vector<5x8xf32>
    %876 = vector.broadcast %874 : vector<1x8xf32> to vector<5x8xf32>
    %877 = arith.mulf %875, %876 : vector<5x8xf32>
    %878 = arith.addf %872, %877 : vector<5x8xf32>
    %879 = vector.extract_strided_slice %675 {offsets = [0, 24], sizes = [5, 8], strides = [1, 1]} : vector<10x32xf32> to vector<5x8xf32>
    %880 = vector.extract_strided_slice %676 {offsets = [0, 24], sizes = [5, 8], strides = [1, 1]} : vector<10x32xf32> to vector<5x8xf32>
    %881 = vector.extract_strided_slice %677 {offsets = [0, 24], sizes = [5, 8], strides = [1, 1]} : vector<10x32xf32> to vector<5x8xf32>
    %882 = vector.extract_strided_slice %880 {offsets = [0, 0], sizes = [1, 8], strides = [1, 1]} : vector<5x8xf32> to vector<1x8xf32>
    %883 = vector.broadcast %882 : vector<1x8xf32> to vector<5x8xf32>
    %884 = arith.mulf %879, %883 : vector<5x8xf32>
    %cst_136 = arith.constant dense<0.000000e+00> : vector<5xf32>
    %885 = vector.multi_reduction <add>, %884, %cst_136 [1] : vector<5x8xf32> to vector<5xf32>
    %886 = vector.shape_cast %885 : vector<5xf32> to vector<5x1xf32>
    %887 = vector.extract_strided_slice %880 {offsets = [1, 0], sizes = [1, 8], strides = [1, 1]} : vector<5x8xf32> to vector<1x8xf32>
    %888 = vector.broadcast %887 : vector<1x8xf32> to vector<5x8xf32>
    %889 = arith.mulf %879, %888 : vector<5x8xf32>
    %cst_137 = arith.constant dense<0.000000e+00> : vector<5xf32>
    %890 = vector.multi_reduction <add>, %889, %cst_137 [1] : vector<5x8xf32> to vector<5xf32>
    %891 = vector.shape_cast %890 : vector<5xf32> to vector<5x1xf32>
    %892 = vector.extract_strided_slice %880 {offsets = [2, 0], sizes = [1, 8], strides = [1, 1]} : vector<5x8xf32> to vector<1x8xf32>
    %893 = vector.broadcast %892 : vector<1x8xf32> to vector<5x8xf32>
    %894 = arith.mulf %879, %893 : vector<5x8xf32>
    %cst_138 = arith.constant dense<0.000000e+00> : vector<5xf32>
    %895 = vector.multi_reduction <add>, %894, %cst_138 [1] : vector<5x8xf32> to vector<5xf32>
    %896 = vector.shape_cast %895 : vector<5xf32> to vector<5x1xf32>
    %897 = vector.extract_strided_slice %880 {offsets = [3, 0], sizes = [1, 8], strides = [1, 1]} : vector<5x8xf32> to vector<1x8xf32>
    %898 = vector.broadcast %897 : vector<1x8xf32> to vector<5x8xf32>
    %899 = arith.mulf %879, %898 : vector<5x8xf32>
    %cst_139 = arith.constant dense<0.000000e+00> : vector<5xf32>
    %900 = vector.multi_reduction <add>, %899, %cst_139 [1] : vector<5x8xf32> to vector<5xf32>
    %901 = vector.shape_cast %900 : vector<5xf32> to vector<5x1xf32>
    %902 = vector.extract_strided_slice %880 {offsets = [4, 0], sizes = [1, 8], strides = [1, 1]} : vector<5x8xf32> to vector<1x8xf32>
    %903 = vector.broadcast %902 : vector<1x8xf32> to vector<5x8xf32>
    %904 = arith.mulf %879, %903 : vector<5x8xf32>
    %cst_140 = arith.constant dense<0.000000e+00> : vector<5xf32>
    %905 = vector.multi_reduction <add>, %904, %cst_140 [1] : vector<5x8xf32> to vector<5xf32>
    %906 = vector.shape_cast %905 : vector<5xf32> to vector<5x1xf32>
    %907 = tpu.concatenate %886, %891, %896, %901, %906 in 1 : vector<5x1xf32>, vector<5x1xf32>, vector<5x1xf32>, vector<5x1xf32>, vector<5x1xf32> -> vector<5x5xf32>
    %cst_141 = arith.constant dense<0xFF800000> : vector<5xf32>
    %908 = vector.multi_reduction <maximumf>, %907, %cst_141 [1] : vector<5x5xf32> to vector<5xf32>
    %909 = vector.shape_cast %908 : vector<5xf32> to vector<5x1xf32>
    %910 = vector.broadcast %909 : vector<5x1xf32> to vector<5x5xf32>
    %911 = arith.subf %907, %910 : vector<5x5xf32>
    %912 = math.exp %911 : vector<5x5xf32>
    %cst_142 = arith.constant dense<0.000000e+00> : vector<5xf32>
    %913 = vector.multi_reduction <add>, %912, %cst_142 [1] : vector<5x5xf32> to vector<5xf32>
    %914 = vector.shape_cast %913 : vector<5xf32> to vector<5x1xf32>
    %915 = vector.broadcast %914 : vector<5x1xf32> to vector<5x5xf32>
    %916 = arith.divf %912, %915 : vector<5x5xf32>
    %917 = vector.extract_strided_slice %916 {offsets = [0, 0], sizes = [5, 1], strides = [1, 1]} : vector<5x5xf32> to vector<5x1xf32>
    %918 = vector.extract_strided_slice %881 {offsets = [0, 0], sizes = [1, 8], strides = [1, 1]} : vector<5x8xf32> to vector<1x8xf32>
    %919 = vector.broadcast %917 : vector<5x1xf32> to vector<5x8xf32>
    %920 = vector.broadcast %918 : vector<1x8xf32> to vector<5x8xf32>
    %921 = arith.mulf %919, %920 : vector<5x8xf32>
    %922 = vector.extract_strided_slice %916 {offsets = [0, 1], sizes = [5, 1], strides = [1, 1]} : vector<5x5xf32> to vector<5x1xf32>
    %923 = vector.extract_strided_slice %881 {offsets = [1, 0], sizes = [1, 8], strides = [1, 1]} : vector<5x8xf32> to vector<1x8xf32>
    %924 = vector.broadcast %922 : vector<5x1xf32> to vector<5x8xf32>
    %925 = vector.broadcast %923 : vector<1x8xf32> to vector<5x8xf32>
    %926 = arith.mulf %924, %925 : vector<5x8xf32>
    %927 = arith.addf %921, %926 : vector<5x8xf32>
    %928 = vector.extract_strided_slice %916 {offsets = [0, 2], sizes = [5, 1], strides = [1, 1]} : vector<5x5xf32> to vector<5x1xf32>
    %929 = vector.extract_strided_slice %881 {offsets = [2, 0], sizes = [1, 8], strides = [1, 1]} : vector<5x8xf32> to vector<1x8xf32>
    %930 = vector.broadcast %928 : vector<5x1xf32> to vector<5x8xf32>
    %931 = vector.broadcast %929 : vector<1x8xf32> to vector<5x8xf32>
    %932 = arith.mulf %930, %931 : vector<5x8xf32>
    %933 = arith.addf %927, %932 : vector<5x8xf32>
    %934 = vector.extract_strided_slice %916 {offsets = [0, 3], sizes = [5, 1], strides = [1, 1]} : vector<5x5xf32> to vector<5x1xf32>
    %935 = vector.extract_strided_slice %881 {offsets = [3, 0], sizes = [1, 8], strides = [1, 1]} : vector<5x8xf32> to vector<1x8xf32>
    %936 = vector.broadcast %934 : vector<5x1xf32> to vector<5x8xf32>
    %937 = vector.broadcast %935 : vector<1x8xf32> to vector<5x8xf32>
    %938 = arith.mulf %936, %937 : vector<5x8xf32>
    %939 = arith.addf %933, %938 : vector<5x8xf32>
    %940 = vector.extract_strided_slice %916 {offsets = [0, 4], sizes = [5, 1], strides = [1, 1]} : vector<5x5xf32> to vector<5x1xf32>
    %941 = vector.extract_strided_slice %881 {offsets = [4, 0], sizes = [1, 8], strides = [1, 1]} : vector<5x8xf32> to vector<1x8xf32>
    %942 = vector.broadcast %940 : vector<5x1xf32> to vector<5x8xf32>
    %943 = vector.broadcast %941 : vector<1x8xf32> to vector<5x8xf32>
    %944 = arith.mulf %942, %943 : vector<5x8xf32>
    %945 = arith.addf %939, %944 : vector<5x8xf32>
    %946 = tpu.concatenate %744, %811, %878, %945 in 1 : vector<5x8xf32>, vector<5x8xf32>, vector<5x8xf32>, vector<5x8xf32> -> vector<5x32xf32>
    %947 = vector.extract_strided_slice %675 {offsets = [5, 0], sizes = [5, 8], strides = [1, 1]} : vector<10x32xf32> to vector<5x8xf32>
    %948 = vector.extract_strided_slice %676 {offsets = [5, 0], sizes = [5, 8], strides = [1, 1]} : vector<10x32xf32> to vector<5x8xf32>
    %949 = vector.extract_strided_slice %677 {offsets = [5, 0], sizes = [5, 8], strides = [1, 1]} : vector<10x32xf32> to vector<5x8xf32>
    %950 = vector.extract_strided_slice %948 {offsets = [0, 0], sizes = [1, 8], strides = [1, 1]} : vector<5x8xf32> to vector<1x8xf32>
    %951 = vector.broadcast %950 : vector<1x8xf32> to vector<5x8xf32>
    %952 = arith.mulf %947, %951 : vector<5x8xf32>
    %cst_143 = arith.constant dense<0.000000e+00> : vector<5xf32>
    %953 = vector.multi_reduction <add>, %952, %cst_143 [1] : vector<5x8xf32> to vector<5xf32>
    %954 = vector.shape_cast %953 : vector<5xf32> to vector<5x1xf32>
    %955 = vector.extract_strided_slice %948 {offsets = [1, 0], sizes = [1, 8], strides = [1, 1]} : vector<5x8xf32> to vector<1x8xf32>
    %956 = vector.broadcast %955 : vector<1x8xf32> to vector<5x8xf32>
    %957 = arith.mulf %947, %956 : vector<5x8xf32>
    %cst_144 = arith.constant dense<0.000000e+00> : vector<5xf32>
    %958 = vector.multi_reduction <add>, %957, %cst_144 [1] : vector<5x8xf32> to vector<5xf32>
    %959 = vector.shape_cast %958 : vector<5xf32> to vector<5x1xf32>
    %960 = vector.extract_strided_slice %948 {offsets = [2, 0], sizes = [1, 8], strides = [1, 1]} : vector<5x8xf32> to vector<1x8xf32>
    %961 = vector.broadcast %960 : vector<1x8xf32> to vector<5x8xf32>
    %962 = arith.mulf %947, %961 : vector<5x8xf32>
    %cst_145 = arith.constant dense<0.000000e+00> : vector<5xf32>
    %963 = vector.multi_reduction <add>, %962, %cst_145 [1] : vector<5x8xf32> to vector<5xf32>
    %964 = vector.shape_cast %963 : vector<5xf32> to vector<5x1xf32>
    %965 = vector.extract_strided_slice %948 {offsets = [3, 0], sizes = [1, 8], strides = [1, 1]} : vector<5x8xf32> to vector<1x8xf32>
    %966 = vector.broadcast %965 : vector<1x8xf32> to vector<5x8xf32>
    %967 = arith.mulf %947, %966 : vector<5x8xf32>
    %cst_146 = arith.constant dense<0.000000e+00> : vector<5xf32>
    %968 = vector.multi_reduction <add>, %967, %cst_146 [1] : vector<5x8xf32> to vector<5xf32>
    %969 = vector.shape_cast %968 : vector<5xf32> to vector<5x1xf32>
    %970 = vector.extract_strided_slice %948 {offsets = [4, 0], sizes = [1, 8], strides = [1, 1]} : vector<5x8xf32> to vector<1x8xf32>
    %971 = vector.broadcast %970 : vector<1x8xf32> to vector<5x8xf32>
    %972 = arith.mulf %947, %971 : vector<5x8xf32>
    %cst_147 = arith.constant dense<0.000000e+00> : vector<5xf32>
    %973 = vector.multi_reduction <add>, %972, %cst_147 [1] : vector<5x8xf32> to vector<5xf32>
    %974 = vector.shape_cast %973 : vector<5xf32> to vector<5x1xf32>
    %975 = tpu.concatenate %954, %959, %964, %969, %974 in 1 : vector<5x1xf32>, vector<5x1xf32>, vector<5x1xf32>, vector<5x1xf32>, vector<5x1xf32> -> vector<5x5xf32>
    %cst_148 = arith.constant dense<0xFF800000> : vector<5xf32>
    %976 = vector.multi_reduction <maximumf>, %975, %cst_148 [1] : vector<5x5xf32> to vector<5xf32>
    %977 = vector.shape_cast %976 : vector<5xf32> to vector<5x1xf32>
    %978 = vector.broadcast %977 : vector<5x1xf32> to vector<5x5xf32>
    %979 = arith.subf %975, %978 : vector<5x5xf32>
    %980 = math.exp %979 : vector<5x5xf32>
    %cst_149 = arith.constant dense<0.000000e+00> : vector<5xf32>
    %981 = vector.multi_reduction <add>, %980, %cst_149 [1] : vector<5x5xf32> to vector<5xf32>
    %982 = vector.shape_cast %981 : vector<5xf32> to vector<5x1xf32>
    %983 = vector.broadcast %982 : vector<5x1xf32> to vector<5x5xf32>
    %984 = arith.divf %980, %983 : vector<5x5xf32>
    %985 = vector.extract_strided_slice %984 {offsets = [0, 0], sizes = [5, 1], strides = [1, 1]} : vector<5x5xf32> to vector<5x1xf32>
    %986 = vector.extract_strided_slice %949 {offsets = [0, 0], sizes = [1, 8], strides = [1, 1]} : vector<5x8xf32> to vector<1x8xf32>
    %987 = vector.broadcast %985 : vector<5x1xf32> to vector<5x8xf32>
    %988 = vector.broadcast %986 : vector<1x8xf32> to vector<5x8xf32>
    %989 = arith.mulf %987, %988 : vector<5x8xf32>
    %990 = vector.extract_strided_slice %984 {offsets = [0, 1], sizes = [5, 1], strides = [1, 1]} : vector<5x5xf32> to vector<5x1xf32>
    %991 = vector.extract_strided_slice %949 {offsets = [1, 0], sizes = [1, 8], strides = [1, 1]} : vector<5x8xf32> to vector<1x8xf32>
    %992 = vector.broadcast %990 : vector<5x1xf32> to vector<5x8xf32>
    %993 = vector.broadcast %991 : vector<1x8xf32> to vector<5x8xf32>
    %994 = arith.mulf %992, %993 : vector<5x8xf32>
    %995 = arith.addf %989, %994 : vector<5x8xf32>
    %996 = vector.extract_strided_slice %984 {offsets = [0, 2], sizes = [5, 1], strides = [1, 1]} : vector<5x5xf32> to vector<5x1xf32>
    %997 = vector.extract_strided_slice %949 {offsets = [2, 0], sizes = [1, 8], strides = [1, 1]} : vector<5x8xf32> to vector<1x8xf32>
    %998 = vector.broadcast %996 : vector<5x1xf32> to vector<5x8xf32>
    %999 = vector.broadcast %997 : vector<1x8xf32> to vector<5x8xf32>
    %1000 = arith.mulf %998, %999 : vector<5x8xf32>
    %1001 = arith.addf %995, %1000 : vector<5x8xf32>
    %1002 = vector.extract_strided_slice %984 {offsets = [0, 3], sizes = [5, 1], strides = [1, 1]} : vector<5x5xf32> to vector<5x1xf32>
    %1003 = vector.extract_strided_slice %949 {offsets = [3, 0], sizes = [1, 8], strides = [1, 1]} : vector<5x8xf32> to vector<1x8xf32>
    %1004 = vector.broadcast %1002 : vector<5x1xf32> to vector<5x8xf32>
    %1005 = vector.broadcast %1003 : vector<1x8xf32> to vector<5x8xf32>
    %1006 = arith.mulf %1004, %1005 : vector<5x8xf32>
    %1007 = arith.addf %1001, %1006 : vector<5x8xf32>
    %1008 = vector.extract_strided_slice %984 {offsets = [0, 4], sizes = [5, 1], strides = [1, 1]} : vector<5x5xf32> to vector<5x1xf32>
    %1009 = vector.extract_strided_slice %949 {offsets = [4, 0], sizes = [1, 8], strides = [1, 1]} : vector<5x8xf32> to vector<1x8xf32>
    %1010 = vector.broadcast %1008 : vector<5x1xf32> to vector<5x8xf32>
    %1011 = vector.broadcast %1009 : vector<1x8xf32> to vector<5x8xf32>
    %1012 = arith.mulf %1010, %1011 : vector<5x8xf32>
    %1013 = arith.addf %1007, %1012 : vector<5x8xf32>
    %1014 = vector.extract_strided_slice %675 {offsets = [5, 8], sizes = [5, 8], strides = [1, 1]} : vector<10x32xf32> to vector<5x8xf32>
    %1015 = vector.extract_strided_slice %676 {offsets = [5, 8], sizes = [5, 8], strides = [1, 1]} : vector<10x32xf32> to vector<5x8xf32>
    %1016 = vector.extract_strided_slice %677 {offsets = [5, 8], sizes = [5, 8], strides = [1, 1]} : vector<10x32xf32> to vector<5x8xf32>
    %1017 = vector.extract_strided_slice %1015 {offsets = [0, 0], sizes = [1, 8], strides = [1, 1]} : vector<5x8xf32> to vector<1x8xf32>
    %1018 = vector.broadcast %1017 : vector<1x8xf32> to vector<5x8xf32>
    %1019 = arith.mulf %1014, %1018 : vector<5x8xf32>
    %cst_150 = arith.constant dense<0.000000e+00> : vector<5xf32>
    %1020 = vector.multi_reduction <add>, %1019, %cst_150 [1] : vector<5x8xf32> to vector<5xf32>
    %1021 = vector.shape_cast %1020 : vector<5xf32> to vector<5x1xf32>
    %1022 = vector.extract_strided_slice %1015 {offsets = [1, 0], sizes = [1, 8], strides = [1, 1]} : vector<5x8xf32> to vector<1x8xf32>
    %1023 = vector.broadcast %1022 : vector<1x8xf32> to vector<5x8xf32>
    %1024 = arith.mulf %1014, %1023 : vector<5x8xf32>
    %cst_151 = arith.constant dense<0.000000e+00> : vector<5xf32>
    %1025 = vector.multi_reduction <add>, %1024, %cst_151 [1] : vector<5x8xf32> to vector<5xf32>
    %1026 = vector.shape_cast %1025 : vector<5xf32> to vector<5x1xf32>
    %1027 = vector.extract_strided_slice %1015 {offsets = [2, 0], sizes = [1, 8], strides = [1, 1]} : vector<5x8xf32> to vector<1x8xf32>
    %1028 = vector.broadcast %1027 : vector<1x8xf32> to vector<5x8xf32>
    %1029 = arith.mulf %1014, %1028 : vector<5x8xf32>
    %cst_152 = arith.constant dense<0.000000e+00> : vector<5xf32>
    %1030 = vector.multi_reduction <add>, %1029, %cst_152 [1] : vector<5x8xf32> to vector<5xf32>
    %1031 = vector.shape_cast %1030 : vector<5xf32> to vector<5x1xf32>
    %1032 = vector.extract_strided_slice %1015 {offsets = [3, 0], sizes = [1, 8], strides = [1, 1]} : vector<5x8xf32> to vector<1x8xf32>
    %1033 = vector.broadcast %1032 : vector<1x8xf32> to vector<5x8xf32>
    %1034 = arith.mulf %1014, %1033 : vector<5x8xf32>
    %cst_153 = arith.constant dense<0.000000e+00> : vector<5xf32>
    %1035 = vector.multi_reduction <add>, %1034, %cst_153 [1] : vector<5x8xf32> to vector<5xf32>
    %1036 = vector.shape_cast %1035 : vector<5xf32> to vector<5x1xf32>
    %1037 = vector.extract_strided_slice %1015 {offsets = [4, 0], sizes = [1, 8], strides = [1, 1]} : vector<5x8xf32> to vector<1x8xf32>
    %1038 = vector.broadcast %1037 : vector<1x8xf32> to vector<5x8xf32>
    %1039 = arith.mulf %1014, %1038 : vector<5x8xf32>
    %cst_154 = arith.constant dense<0.000000e+00> : vector<5xf32>
    %1040 = vector.multi_reduction <add>, %1039, %cst_154 [1] : vector<5x8xf32> to vector<5xf32>
    %1041 = vector.shape_cast %1040 : vector<5xf32> to vector<5x1xf32>
    %1042 = tpu.concatenate %1021, %1026, %1031, %1036, %1041 in 1 : vector<5x1xf32>, vector<5x1xf32>, vector<5x1xf32>, vector<5x1xf32>, vector<5x1xf32> -> vector<5x5xf32>
    %cst_155 = arith.constant dense<0xFF800000> : vector<5xf32>
    %1043 = vector.multi_reduction <maximumf>, %1042, %cst_155 [1] : vector<5x5xf32> to vector<5xf32>
    %1044 = vector.shape_cast %1043 : vector<5xf32> to vector<5x1xf32>
    %1045 = vector.broadcast %1044 : vector<5x1xf32> to vector<5x5xf32>
    %1046 = arith.subf %1042, %1045 : vector<5x5xf32>
    %1047 = math.exp %1046 : vector<5x5xf32>
    %cst_156 = arith.constant dense<0.000000e+00> : vector<5xf32>
    %1048 = vector.multi_reduction <add>, %1047, %cst_156 [1] : vector<5x5xf32> to vector<5xf32>
    %1049 = vector.shape_cast %1048 : vector<5xf32> to vector<5x1xf32>
    %1050 = vector.broadcast %1049 : vector<5x1xf32> to vector<5x5xf32>
    %1051 = arith.divf %1047, %1050 : vector<5x5xf32>
    %1052 = vector.extract_strided_slice %1051 {offsets = [0, 0], sizes = [5, 1], strides = [1, 1]} : vector<5x5xf32> to vector<5x1xf32>
    %1053 = vector.extract_strided_slice %1016 {offsets = [0, 0], sizes = [1, 8], strides = [1, 1]} : vector<5x8xf32> to vector<1x8xf32>
    %1054 = vector.broadcast %1052 : vector<5x1xf32> to vector<5x8xf32>
    %1055 = vector.broadcast %1053 : vector<1x8xf32> to vector<5x8xf32>
    %1056 = arith.mulf %1054, %1055 : vector<5x8xf32>
    %1057 = vector.extract_strided_slice %1051 {offsets = [0, 1], sizes = [5, 1], strides = [1, 1]} : vector<5x5xf32> to vector<5x1xf32>
    %1058 = vector.extract_strided_slice %1016 {offsets = [1, 0], sizes = [1, 8], strides = [1, 1]} : vector<5x8xf32> to vector<1x8xf32>
    %1059 = vector.broadcast %1057 : vector<5x1xf32> to vector<5x8xf32>
    %1060 = vector.broadcast %1058 : vector<1x8xf32> to vector<5x8xf32>
    %1061 = arith.mulf %1059, %1060 : vector<5x8xf32>
    %1062 = arith.addf %1056, %1061 : vector<5x8xf32>
    %1063 = vector.extract_strided_slice %1051 {offsets = [0, 2], sizes = [5, 1], strides = [1, 1]} : vector<5x5xf32> to vector<5x1xf32>
    %1064 = vector.extract_strided_slice %1016 {offsets = [2, 0], sizes = [1, 8], strides = [1, 1]} : vector<5x8xf32> to vector<1x8xf32>
    %1065 = vector.broadcast %1063 : vector<5x1xf32> to vector<5x8xf32>
    %1066 = vector.broadcast %1064 : vector<1x8xf32> to vector<5x8xf32>
    %1067 = arith.mulf %1065, %1066 : vector<5x8xf32>
    %1068 = arith.addf %1062, %1067 : vector<5x8xf32>
    %1069 = vector.extract_strided_slice %1051 {offsets = [0, 3], sizes = [5, 1], strides = [1, 1]} : vector<5x5xf32> to vector<5x1xf32>
    %1070 = vector.extract_strided_slice %1016 {offsets = [3, 0], sizes = [1, 8], strides = [1, 1]} : vector<5x8xf32> to vector<1x8xf32>
    %1071 = vector.broadcast %1069 : vector<5x1xf32> to vector<5x8xf32>
    %1072 = vector.broadcast %1070 : vector<1x8xf32> to vector<5x8xf32>
    %1073 = arith.mulf %1071, %1072 : vector<5x8xf32>
    %1074 = arith.addf %1068, %1073 : vector<5x8xf32>
    %1075 = vector.extract_strided_slice %1051 {offsets = [0, 4], sizes = [5, 1], strides = [1, 1]} : vector<5x5xf32> to vector<5x1xf32>
    %1076 = vector.extract_strided_slice %1016 {offsets = [4, 0], sizes = [1, 8], strides = [1, 1]} : vector<5x8xf32> to vector<1x8xf32>
    %1077 = vector.broadcast %1075 : vector<5x1xf32> to vector<5x8xf32>
    %1078 = vector.broadcast %1076 : vector<1x8xf32> to vector<5x8xf32>
    %1079 = arith.mulf %1077, %1078 : vector<5x8xf32>
    %1080 = arith.addf %1074, %1079 : vector<5x8xf32>
    %1081 = vector.extract_strided_slice %675 {offsets = [5, 16], sizes = [5, 8], strides = [1, 1]} : vector<10x32xf32> to vector<5x8xf32>
    %1082 = vector.extract_strided_slice %676 {offsets = [5, 16], sizes = [5, 8], strides = [1, 1]} : vector<10x32xf32> to vector<5x8xf32>
    %1083 = vector.extract_strided_slice %677 {offsets = [5, 16], sizes = [5, 8], strides = [1, 1]} : vector<10x32xf32> to vector<5x8xf32>
    %1084 = vector.extract_strided_slice %1082 {offsets = [0, 0], sizes = [1, 8], strides = [1, 1]} : vector<5x8xf32> to vector<1x8xf32>
    %1085 = vector.broadcast %1084 : vector<1x8xf32> to vector<5x8xf32>
    %1086 = arith.mulf %1081, %1085 : vector<5x8xf32>
    %cst_157 = arith.constant dense<0.000000e+00> : vector<5xf32>
    %1087 = vector.multi_reduction <add>, %1086, %cst_157 [1] : vector<5x8xf32> to vector<5xf32>
    %1088 = vector.shape_cast %1087 : vector<5xf32> to vector<5x1xf32>
    %1089 = vector.extract_strided_slice %1082 {offsets = [1, 0], sizes = [1, 8], strides = [1, 1]} : vector<5x8xf32> to vector<1x8xf32>
    %1090 = vector.broadcast %1089 : vector<1x8xf32> to vector<5x8xf32>
    %1091 = arith.mulf %1081, %1090 : vector<5x8xf32>
    %cst_158 = arith.constant dense<0.000000e+00> : vector<5xf32>
    %1092 = vector.multi_reduction <add>, %1091, %cst_158 [1] : vector<5x8xf32> to vector<5xf32>
    %1093 = vector.shape_cast %1092 : vector<5xf32> to vector<5x1xf32>
    %1094 = vector.extract_strided_slice %1082 {offsets = [2, 0], sizes = [1, 8], strides = [1, 1]} : vector<5x8xf32> to vector<1x8xf32>
    %1095 = vector.broadcast %1094 : vector<1x8xf32> to vector<5x8xf32>
    %1096 = arith.mulf %1081, %1095 : vector<5x8xf32>
    %cst_159 = arith.constant dense<0.000000e+00> : vector<5xf32>
    %1097 = vector.multi_reduction <add>, %1096, %cst_159 [1] : vector<5x8xf32> to vector<5xf32>
    %1098 = vector.shape_cast %1097 : vector<5xf32> to vector<5x1xf32>
    %1099 = vector.extract_strided_slice %1082 {offsets = [3, 0], sizes = [1, 8], strides = [1, 1]} : vector<5x8xf32> to vector<1x8xf32>
    %1100 = vector.broadcast %1099 : vector<1x8xf32> to vector<5x8xf32>
    %1101 = arith.mulf %1081, %1100 : vector<5x8xf32>
    %cst_160 = arith.constant dense<0.000000e+00> : vector<5xf32>
    %1102 = vector.multi_reduction <add>, %1101, %cst_160 [1] : vector<5x8xf32> to vector<5xf32>
    %1103 = vector.shape_cast %1102 : vector<5xf32> to vector<5x1xf32>
    %1104 = vector.extract_strided_slice %1082 {offsets = [4, 0], sizes = [1, 8], strides = [1, 1]} : vector<5x8xf32> to vector<1x8xf32>
    %1105 = vector.broadcast %1104 : vector<1x8xf32> to vector<5x8xf32>
    %1106 = arith.mulf %1081, %1105 : vector<5x8xf32>
    %cst_161 = arith.constant dense<0.000000e+00> : vector<5xf32>
    %1107 = vector.multi_reduction <add>, %1106, %cst_161 [1] : vector<5x8xf32> to vector<5xf32>
    %1108 = vector.shape_cast %1107 : vector<5xf32> to vector<5x1xf32>
    %1109 = tpu.concatenate %1088, %1093, %1098, %1103, %1108 in 1 : vector<5x1xf32>, vector<5x1xf32>, vector<5x1xf32>, vector<5x1xf32>, vector<5x1xf32> -> vector<5x5xf32>
    %cst_162 = arith.constant dense<0xFF800000> : vector<5xf32>
    %1110 = vector.multi_reduction <maximumf>, %1109, %cst_162 [1] : vector<5x5xf32> to vector<5xf32>
    %1111 = vector.shape_cast %1110 : vector<5xf32> to vector<5x1xf32>
    %1112 = vector.broadcast %1111 : vector<5x1xf32> to vector<5x5xf32>
    %1113 = arith.subf %1109, %1112 : vector<5x5xf32>
    %1114 = math.exp %1113 : vector<5x5xf32>
    %cst_163 = arith.constant dense<0.000000e+00> : vector<5xf32>
    %1115 = vector.multi_reduction <add>, %1114, %cst_163 [1] : vector<5x5xf32> to vector<5xf32>
    %1116 = vector.shape_cast %1115 : vector<5xf32> to vector<5x1xf32>
    %1117 = vector.broadcast %1116 : vector<5x1xf32> to vector<5x5xf32>
    %1118 = arith.divf %1114, %1117 : vector<5x5xf32>
    %1119 = vector.extract_strided_slice %1118 {offsets = [0, 0], sizes = [5, 1], strides = [1, 1]} : vector<5x5xf32> to vector<5x1xf32>
    %1120 = vector.extract_strided_slice %1083 {offsets = [0, 0], sizes = [1, 8], strides = [1, 1]} : vector<5x8xf32> to vector<1x8xf32>
    %1121 = vector.broadcast %1119 : vector<5x1xf32> to vector<5x8xf32>
    %1122 = vector.broadcast %1120 : vector<1x8xf32> to vector<5x8xf32>
    %1123 = arith.mulf %1121, %1122 : vector<5x8xf32>
    %1124 = vector.extract_strided_slice %1118 {offsets = [0, 1], sizes = [5, 1], strides = [1, 1]} : vector<5x5xf32> to vector<5x1xf32>
    %1125 = vector.extract_strided_slice %1083 {offsets = [1, 0], sizes = [1, 8], strides = [1, 1]} : vector<5x8xf32> to vector<1x8xf32>
    %1126 = vector.broadcast %1124 : vector<5x1xf32> to vector<5x8xf32>
    %1127 = vector.broadcast %1125 : vector<1x8xf32> to vector<5x8xf32>
    %1128 = arith.mulf %1126, %1127 : vector<5x8xf32>
    %1129 = arith.addf %1123, %1128 : vector<5x8xf32>
    %1130 = vector.extract_strided_slice %1118 {offsets = [0, 2], sizes = [5, 1], strides = [1, 1]} : vector<5x5xf32> to vector<5x1xf32>
    %1131 = vector.extract_strided_slice %1083 {offsets = [2, 0], sizes = [1, 8], strides = [1, 1]} : vector<5x8xf32> to vector<1x8xf32>
    %1132 = vector.broadcast %1130 : vector<5x1xf32> to vector<5x8xf32>
    %1133 = vector.broadcast %1131 : vector<1x8xf32> to vector<5x8xf32>
    %1134 = arith.mulf %1132, %1133 : vector<5x8xf32>
    %1135 = arith.addf %1129, %1134 : vector<5x8xf32>
    %1136 = vector.extract_strided_slice %1118 {offsets = [0, 3], sizes = [5, 1], strides = [1, 1]} : vector<5x5xf32> to vector<5x1xf32>
    %1137 = vector.extract_strided_slice %1083 {offsets = [3, 0], sizes = [1, 8], strides = [1, 1]} : vector<5x8xf32> to vector<1x8xf32>
    %1138 = vector.broadcast %1136 : vector<5x1xf32> to vector<5x8xf32>
    %1139 = vector.broadcast %1137 : vector<1x8xf32> to vector<5x8xf32>
    %1140 = arith.mulf %1138, %1139 : vector<5x8xf32>
    %1141 = arith.addf %1135, %1140 : vector<5x8xf32>
    %1142 = vector.extract_strided_slice %1118 {offsets = [0, 4], sizes = [5, 1], strides = [1, 1]} : vector<5x5xf32> to vector<5x1xf32>
    %1143 = vector.extract_strided_slice %1083 {offsets = [4, 0], sizes = [1, 8], strides = [1, 1]} : vector<5x8xf32> to vector<1x8xf32>
    %1144 = vector.broadcast %1142 : vector<5x1xf32> to vector<5x8xf32>
    %1145 = vector.broadcast %1143 : vector<1x8xf32> to vector<5x8xf32>
    %1146 = arith.mulf %1144, %1145 : vector<5x8xf32>
    %1147 = arith.addf %1141, %1146 : vector<5x8xf32>
    %1148 = vector.extract_strided_slice %675 {offsets = [5, 24], sizes = [5, 8], strides = [1, 1]} : vector<10x32xf32> to vector<5x8xf32>
    %1149 = vector.extract_strided_slice %676 {offsets = [5, 24], sizes = [5, 8], strides = [1, 1]} : vector<10x32xf32> to vector<5x8xf32>
    %1150 = vector.extract_strided_slice %677 {offsets = [5, 24], sizes = [5, 8], strides = [1, 1]} : vector<10x32xf32> to vector<5x8xf32>
    %1151 = vector.extract_strided_slice %1149 {offsets = [0, 0], sizes = [1, 8], strides = [1, 1]} : vector<5x8xf32> to vector<1x8xf32>
    %1152 = vector.broadcast %1151 : vector<1x8xf32> to vector<5x8xf32>
    %1153 = arith.mulf %1148, %1152 : vector<5x8xf32>
    %cst_164 = arith.constant dense<0.000000e+00> : vector<5xf32>
    %1154 = vector.multi_reduction <add>, %1153, %cst_164 [1] : vector<5x8xf32> to vector<5xf32>
    %1155 = vector.shape_cast %1154 : vector<5xf32> to vector<5x1xf32>
    %1156 = vector.extract_strided_slice %1149 {offsets = [1, 0], sizes = [1, 8], strides = [1, 1]} : vector<5x8xf32> to vector<1x8xf32>
    %1157 = vector.broadcast %1156 : vector<1x8xf32> to vector<5x8xf32>
    %1158 = arith.mulf %1148, %1157 : vector<5x8xf32>
    %cst_165 = arith.constant dense<0.000000e+00> : vector<5xf32>
    %1159 = vector.multi_reduction <add>, %1158, %cst_165 [1] : vector<5x8xf32> to vector<5xf32>
    %1160 = vector.shape_cast %1159 : vector<5xf32> to vector<5x1xf32>
    %1161 = vector.extract_strided_slice %1149 {offsets = [2, 0], sizes = [1, 8], strides = [1, 1]} : vector<5x8xf32> to vector<1x8xf32>
    %1162 = vector.broadcast %1161 : vector<1x8xf32> to vector<5x8xf32>
    %1163 = arith.mulf %1148, %1162 : vector<5x8xf32>
    %cst_166 = arith.constant dense<0.000000e+00> : vector<5xf32>
    %1164 = vector.multi_reduction <add>, %1163, %cst_166 [1] : vector<5x8xf32> to vector<5xf32>
    %1165 = vector.shape_cast %1164 : vector<5xf32> to vector<5x1xf32>
    %1166 = vector.extract_strided_slice %1149 {offsets = [3, 0], sizes = [1, 8], strides = [1, 1]} : vector<5x8xf32> to vector<1x8xf32>
    %1167 = vector.broadcast %1166 : vector<1x8xf32> to vector<5x8xf32>
    %1168 = arith.mulf %1148, %1167 : vector<5x8xf32>
    %cst_167 = arith.constant dense<0.000000e+00> : vector<5xf32>
    %1169 = vector.multi_reduction <add>, %1168, %cst_167 [1] : vector<5x8xf32> to vector<5xf32>
    %1170 = vector.shape_cast %1169 : vector<5xf32> to vector<5x1xf32>
    %1171 = vector.extract_strided_slice %1149 {offsets = [4, 0], sizes = [1, 8], strides = [1, 1]} : vector<5x8xf32> to vector<1x8xf32>
    %1172 = vector.broadcast %1171 : vector<1x8xf32> to vector<5x8xf32>
    %1173 = arith.mulf %1148, %1172 : vector<5x8xf32>
    %cst_168 = arith.constant dense<0.000000e+00> : vector<5xf32>
    %1174 = vector.multi_reduction <add>, %1173, %cst_168 [1] : vector<5x8xf32> to vector<5xf32>
    %1175 = vector.shape_cast %1174 : vector<5xf32> to vector<5x1xf32>
    %1176 = tpu.concatenate %1155, %1160, %1165, %1170, %1175 in 1 : vector<5x1xf32>, vector<5x1xf32>, vector<5x1xf32>, vector<5x1xf32>, vector<5x1xf32> -> vector<5x5xf32>
    %cst_169 = arith.constant dense<0xFF800000> : vector<5xf32>
    %1177 = vector.multi_reduction <maximumf>, %1176, %cst_169 [1] : vector<5x5xf32> to vector<5xf32>
    %1178 = vector.shape_cast %1177 : vector<5xf32> to vector<5x1xf32>
    %1179 = vector.broadcast %1178 : vector<5x1xf32> to vector<5x5xf32>
    %1180 = arith.subf %1176, %1179 : vector<5x5xf32>
    %1181 = math.exp %1180 : vector<5x5xf32>
    %cst_170 = arith.constant dense<0.000000e+00> : vector<5xf32>
    %1182 = vector.multi_reduction <add>, %1181, %cst_170 [1] : vector<5x5xf32> to vector<5xf32>
    %1183 = vector.shape_cast %1182 : vector<5xf32> to vector<5x1xf32>
    %1184 = vector.broadcast %1183 : vector<5x1xf32> to vector<5x5xf32>
    %1185 = arith.divf %1181, %1184 : vector<5x5xf32>
    %1186 = vector.extract_strided_slice %1185 {offsets = [0, 0], sizes = [5, 1], strides = [1, 1]} : vector<5x5xf32> to vector<5x1xf32>
    %1187 = vector.extract_strided_slice %1150 {offsets = [0, 0], sizes = [1, 8], strides = [1, 1]} : vector<5x8xf32> to vector<1x8xf32>
    %1188 = vector.broadcast %1186 : vector<5x1xf32> to vector<5x8xf32>
    %1189 = vector.broadcast %1187 : vector<1x8xf32> to vector<5x8xf32>
    %1190 = arith.mulf %1188, %1189 : vector<5x8xf32>
    %1191 = vector.extract_strided_slice %1185 {offsets = [0, 1], sizes = [5, 1], strides = [1, 1]} : vector<5x5xf32> to vector<5x1xf32>
    %1192 = vector.extract_strided_slice %1150 {offsets = [1, 0], sizes = [1, 8], strides = [1, 1]} : vector<5x8xf32> to vector<1x8xf32>
    %1193 = vector.broadcast %1191 : vector<5x1xf32> to vector<5x8xf32>
    %1194 = vector.broadcast %1192 : vector<1x8xf32> to vector<5x8xf32>
    %1195 = arith.mulf %1193, %1194 : vector<5x8xf32>
    %1196 = arith.addf %1190, %1195 : vector<5x8xf32>
    %1197 = vector.extract_strided_slice %1185 {offsets = [0, 2], sizes = [5, 1], strides = [1, 1]} : vector<5x5xf32> to vector<5x1xf32>
    %1198 = vector.extract_strided_slice %1150 {offsets = [2, 0], sizes = [1, 8], strides = [1, 1]} : vector<5x8xf32> to vector<1x8xf32>
    %1199 = vector.broadcast %1197 : vector<5x1xf32> to vector<5x8xf32>
    %1200 = vector.broadcast %1198 : vector<1x8xf32> to vector<5x8xf32>
    %1201 = arith.mulf %1199, %1200 : vector<5x8xf32>
    %1202 = arith.addf %1196, %1201 : vector<5x8xf32>
    %1203 = vector.extract_strided_slice %1185 {offsets = [0, 3], sizes = [5, 1], strides = [1, 1]} : vector<5x5xf32> to vector<5x1xf32>
    %1204 = vector.extract_strided_slice %1150 {offsets = [3, 0], sizes = [1, 8], strides = [1, 1]} : vector<5x8xf32> to vector<1x8xf32>
    %1205 = vector.broadcast %1203 : vector<5x1xf32> to vector<5x8xf32>
    %1206 = vector.broadcast %1204 : vector<1x8xf32> to vector<5x8xf32>
    %1207 = arith.mulf %1205, %1206 : vector<5x8xf32>
    %1208 = arith.addf %1202, %1207 : vector<5x8xf32>
    %1209 = vector.extract_strided_slice %1185 {offsets = [0, 4], sizes = [5, 1], strides = [1, 1]} : vector<5x5xf32> to vector<5x1xf32>
    %1210 = vector.extract_strided_slice %1150 {offsets = [4, 0], sizes = [1, 8], strides = [1, 1]} : vector<5x8xf32> to vector<1x8xf32>
    %1211 = vector.broadcast %1209 : vector<5x1xf32> to vector<5x8xf32>
    %1212 = vector.broadcast %1210 : vector<1x8xf32> to vector<5x8xf32>
    %1213 = arith.mulf %1211, %1212 : vector<5x8xf32>
    %1214 = arith.addf %1208, %1213 : vector<5x8xf32>
    %1215 = tpu.concatenate %1013, %1080, %1147, %1214 in 1 : vector<5x8xf32>, vector<5x8xf32>, vector<5x8xf32>, vector<5x8xf32> -> vector<5x32xf32>
    %1216 = tpu.concatenate %946, %1215 in 0 : vector<5x32xf32>, vector<5x32xf32> -> vector<10x32xf32>
    %1217 = arith.truncf %1216 : vector<10x32xf32> to vector<10x32xbf16>
    %c1_171 = arith.constant 1 : index
    %c0_172 = arith.constant 0 : index
    %c0_173 = arith.constant 0 : index
    %1218 = vector.load %arg4[%c1_171, %c0_172, %c0_173] : memref<2x32x32xbf16, #tpu.memory_space<vmem>>, vector<1x32x32xbf16>
    %1219 = vector.shape_cast %1218 : vector<1x32x32xbf16> to vector<32x32xbf16>
    %cst_174 = arith.constant dense<0.000000e+00> : vector<10x32xf32>
    %1220 = tpu.matmul %1217, %1219, %cst_174 {dimension_numbers = #tpu.dot_dimension_numbers<[1], [0], [0], [1], [0, 0, 1, 1], [], []>} : vector<10x32xbf16>, vector<32x32xbf16>, vector<10x32xf32> -> vector<10x32xf32>
    %1221 = arith.addf %638, %1220 : vector<10x32xf32>
    %1222 = vector.broadcast %642 : vector<1x32xf32> to vector<10x32xf32>
    %1223 = arith.addf %1221, %1222 : vector<10x32xf32>
    %cst_175 = arith.constant dense<0.000000e+00> : vector<10xf32>
    %1224 = vector.multi_reduction <add>, %1223, %cst_175 [1] : vector<10x32xf32> to vector<10xf32>
    %1225 = vector.shape_cast %1224 : vector<10xf32> to vector<10x1xf32>
    %cst_176 = arith.constant 3.200000e+01 : f32
    %1226 = vector.broadcast %cst_176 : f32 to vector<10x1xf32>
    %1227 = arith.divf %1225, %1226 : vector<10x1xf32>
    %1228 = vector.broadcast %1227 : vector<10x1xf32> to vector<10x32xf32>
    %1229 = arith.subf %1223, %1228 : vector<10x32xf32>
    %1230 = arith.mulf %1229, %1229 : vector<10x32xf32>
    %cst_177 = arith.constant dense<0.000000e+00> : vector<10xf32>
    %1231 = vector.multi_reduction <add>, %1230, %cst_177 [1] : vector<10x32xf32> to vector<10xf32>
    %1232 = vector.shape_cast %1231 : vector<10xf32> to vector<10x1xf32>
    %cst_178 = arith.constant 3.200000e+01 : f32
    %1233 = vector.broadcast %cst_178 : f32 to vector<10x1xf32>
    %1234 = arith.divf %1232, %1233 : vector<10x1xf32>
    %1235 = vector.broadcast %1227 : vector<10x1xf32> to vector<10x32xf32>
    %1236 = arith.subf %1223, %1235 : vector<10x32xf32>
    %cst_179 = arith.constant 9.99999997E-7 : f32
    %1237 = vector.broadcast %cst_179 : f32 to vector<10x1xf32>
    %1238 = arith.addf %1234, %1237 : vector<10x1xf32>
    %1239 = math.rsqrt %1238 : vector<10x1xf32>
    %1240 = vector.broadcast %1239 : vector<10x1xf32> to vector<10x32xf32>
    %1241 = arith.mulf %1236, %1240 : vector<10x32xf32>
    %1242 = vector.broadcast %643 : vector<1x32xf32> to vector<10x32xf32>
    %1243 = arith.mulf %1241, %1242 : vector<10x32xf32>
    %1244 = vector.broadcast %644 : vector<1x32xf32> to vector<10x32xf32>
    %1245 = arith.addf %1243, %1244 : vector<10x32xf32>
    %1246 = arith.truncf %1245 : vector<10x32xf32> to vector<10x32xbf16>
    %c1_180 = arith.constant 1 : index
    %c0_181 = arith.constant 0 : index
    %c0_182 = arith.constant 0 : index
    %1247 = vector.load %arg5[%c1_180, %c0_181, %c0_182] : memref<2x32x64xbf16, #tpu.memory_space<vmem>>, vector<1x32x64xbf16>
    %1248 = vector.shape_cast %1247 : vector<1x32x64xbf16> to vector<32x64xbf16>
    %cst_183 = arith.constant dense<0.000000e+00> : vector<10x64xf32>
    %1249 = tpu.matmul %1246, %1248, %cst_183 {dimension_numbers = #tpu.dot_dimension_numbers<[1], [0], [0], [1], [0, 0, 1, 1], [], []>} : vector<10x32xbf16>, vector<32x64xbf16>, vector<10x64xf32> -> vector<10x64xf32>
    %1250 = vector.broadcast %645 : vector<1x64xf32> to vector<10x64xf32>
    %1251 = arith.addf %1249, %1250 : vector<10x64xf32>
    %cst_184 = arith.constant 5.000000e-01 : f32
    %1252 = vector.broadcast %cst_184 : f32 to vector<10x64xf32>
    %1253 = arith.mulf %1252, %1251 : vector<10x64xf32>
    %cst_185 = arith.constant 4.471500e-02 : f32
    %1254 = vector.broadcast %cst_185 : f32 to vector<10x64xf32>
    %1255 = arith.mulf %1254, %1251 : vector<10x64xf32>
    %1256 = arith.mulf %1255, %1251 : vector<10x64xf32>
    %1257 = arith.mulf %1256, %1251 : vector<10x64xf32>
    %1258 = arith.addf %1251, %1257 : vector<10x64xf32>
    %cst_186 = arith.constant 0.797884583 : f32
    %1259 = vector.broadcast %cst_186 : f32 to vector<10x64xf32>
    %1260 = arith.mulf %1259, %1258 : vector<10x64xf32>
    %1261 = math.tanh %1260 : vector<10x64xf32>
    %cst_187 = arith.constant 1.000000e+00 : f32
    %1262 = vector.broadcast %cst_187 : f32 to vector<10x64xf32>
    %1263 = arith.addf %1262, %1261 : vector<10x64xf32>
    %1264 = arith.mulf %1253, %1263 : vector<10x64xf32>
    %1265 = arith.truncf %1264 : vector<10x64xf32> to vector<10x64xbf16>
    %c1_188 = arith.constant 1 : index
    %c0_189 = arith.constant 0 : index
    %c0_190 = arith.constant 0 : index
    %1266 = vector.load %arg6[%c1_188, %c0_189, %c0_190] : memref<2x64x32xbf16, #tpu.memory_space<vmem>>, vector<1x64x32xbf16>
    %1267 = vector.shape_cast %1266 : vector<1x64x32xbf16> to vector<64x32xbf16>
    %cst_191 = arith.constant dense<0.000000e+00> : vector<10x32xf32>
    %1268 = tpu.matmul %1265, %1267, %cst_191 {dimension_numbers = #tpu.dot_dimension_numbers<[1], [0], [0], [1], [0, 0, 1, 1], [], []>} : vector<10x64xbf16>, vector<64x32xbf16>, vector<10x32xf32> -> vector<10x32xf32>
    %1269 = arith.addf %1223, %1268 : vector<10x32xf32>
    %1270 = vector.broadcast %646 : vector<1x32xf32> to vector<10x32xf32>
    %1271 = arith.addf %1269, %1270 : vector<10x32xf32>
    %c21 = arith.constant 21 : index
    %c0_192 = arith.constant 0 : index
    %1272 = vector.load %arg7[%c21, %c0_192] : memref<24x128xf32, #tpu.memory_space<vmem>>, vector<1x32xf32>
    %c22 = arith.constant 22 : index
    %c0_193 = arith.constant 0 : index
    %1273 = vector.load %arg7[%c22, %c0_193] : memref<24x128xf32, #tpu.memory_space<vmem>>, vector<1x32xf32>
    %1274 = vector.extract_strided_slice %1271 {offsets = [0, 0], sizes = [1, 32], strides = [1, 1]} : vector<10x32xf32> to vector<1x32xf32>
    %1275 = vector.extract_strided_slice %1271 {offsets = [5, 0], sizes = [1, 32], strides = [1, 1]} : vector<10x32xf32> to vector<1x32xf32>
    %1276 = tpu.concatenate %1274, %1275 in 0 : vector<1x32xf32>, vector<1x32xf32> -> vector<2x32xf32>
    %cst_194 = arith.constant dense<0.000000e+00> : vector<2xf32>
    %1277 = vector.multi_reduction <add>, %1276, %cst_194 [1] : vector<2x32xf32> to vector<2xf32>
    %1278 = vector.shape_cast %1277 : vector<2xf32> to vector<2x1xf32>
    %cst_195 = arith.constant 3.200000e+01 : f32
    %1279 = vector.broadcast %cst_195 : f32 to vector<2x1xf32>
    %1280 = arith.divf %1278, %1279 : vector<2x1xf32>
    %1281 = vector.broadcast %1280 : vector<2x1xf32> to vector<2x32xf32>
    %1282 = arith.subf %1276, %1281 : vector<2x32xf32>
    %1283 = arith.mulf %1282, %1282 : vector<2x32xf32>
    %cst_196 = arith.constant dense<0.000000e+00> : vector<2xf32>
    %1284 = vector.multi_reduction <add>, %1283, %cst_196 [1] : vector<2x32xf32> to vector<2xf32>
    %1285 = vector.shape_cast %1284 : vector<2xf32> to vector<2x1xf32>
    %cst_197 = arith.constant 3.200000e+01 : f32
    %1286 = vector.broadcast %cst_197 : f32 to vector<2x1xf32>
    %1287 = arith.divf %1285, %1286 : vector<2x1xf32>
    %1288 = vector.broadcast %1280 : vector<2x1xf32> to vector<2x32xf32>
    %1289 = arith.subf %1276, %1288 : vector<2x32xf32>
    %cst_198 = arith.constant 9.99999997E-7 : f32
    %1290 = vector.broadcast %cst_198 : f32 to vector<2x1xf32>
    %1291 = arith.addf %1287, %1290 : vector<2x1xf32>
    %1292 = math.rsqrt %1291 : vector<2x1xf32>
    %1293 = vector.broadcast %1292 : vector<2x1xf32> to vector<2x32xf32>
    %1294 = arith.mulf %1289, %1293 : vector<2x32xf32>
    %1295 = vector.broadcast %1272 : vector<1x32xf32> to vector<2x32xf32>
    %1296 = arith.mulf %1294, %1295 : vector<2x32xf32>
    %1297 = vector.broadcast %1273 : vector<1x32xf32> to vector<2x32xf32>
    %1298 = arith.addf %1296, %1297 : vector<2x32xf32>
    %cst_199 = arith.constant 0.000000e+00 : f32
    %1299 = vector.broadcast %cst_199 : f32 to vector<2x96xf32>
    %1300 = tpu.concatenate %1298, %1299 in 1 : vector<2x32xf32>, vector<2x96xf32> -> vector<2x128xf32>
    %c0_200 = arith.constant 0 : index
    %c0_201 = arith.constant 0 : index
    %1301 = vector.load %arg8[%c0_200, %c0_201] : memref<2x128xf32, #tpu.memory_space<vmem>>, vector<2x128xf32>
    tpu.vector_store %arg8[%c0_200, %c0_201], %1300 {strides = array<i32>} : memref<2x128xf32, #tpu.memory_space<vmem>>, vector<2x128xf32>,
    return
  }
  func.func @transform_0(%arg0: i32) -> (i32, i32) {
    %c0_i32 = arith.constant 0 : i32
    %c0_i32_0 = arith.constant 0 : i32
    return %arg0, %c0_i32 : i32, i32
  }
  func.func @transform_1(%arg0: i32) -> (i32, i32) {
    %c0_i32 = arith.constant 0 : i32
    %c0_i32_0 = arith.constant 0 : i32
    %c0_i32_1 = arith.constant 0 : i32
    return %c0_i32, %c0_i32_0 : i32, i32
  }
  func.func @transform_2(%arg0: i32) -> (i32, i32, i32) {
    %c0_i32 = arith.constant 0 : i32
    %c0_i32_0 = arith.constant 0 : i32
    %c0_i32_1 = arith.constant 0 : i32
    %c0_i32_2 = arith.constant 0 : i32
    return %c0_i32, %c0_i32_0, %c0_i32_1 : i32, i32, i32
  }
  func.func @transform_3(%arg0: i32) -> (i32, i32, i32) {
    %c0_i32 = arith.constant 0 : i32
    %c0_i32_0 = arith.constant 0 : i32
    %c0_i32_1 = arith.constant 0 : i32
    %c0_i32_2 = arith.constant 0 : i32
    return %c0_i32, %c0_i32_0, %c0_i32_1 : i32, i32, i32
  }
  func.func @transform_4(%arg0: i32) -> (i32, i32, i32) {
    %c0_i32 = arith.constant 0 : i32
    %c0_i32_0 = arith.constant 0 : i32
    %c0_i32_1 = arith.constant 0 : i32
    %c0_i32_2 = arith.constant 0 : i32
    return %c0_i32, %c0_i32_0, %c0_i32_1 : i32, i32, i32
  }
  func.func @transform_5(%arg0: i32) -> (i32, i32, i32) {
    %c0_i32 = arith.constant 0 : i32
    %c0_i32_0 = arith.constant 0 : i32
    %c0_i32_1 = arith.constant 0 : i32
    %c0_i32_2 = arith.constant 0 : i32
    return %c0_i32, %c0_i32_0, %c0_i32_1 : i32, i32, i32
  }
  func.func @transform_6(%arg0: i32) -> (i32, i32) {
    %c0_i32 = arith.constant 0 : i32
    %c0_i32_0 = arith.constant 0 : i32
    %c0_i32_1 = arith.constant 0 : i32
    return %c0_i32, %c0_i32_0 : i32, i32
  }
  func.func @transform_7(%arg0: i32) -> (i32, i32) {
    %c0_i32 = arith.constant 0 : i32
    %c0_i32_0 = arith.constant 0 : i32
    return %arg0, %c0_i32 : i32, i32
  }
}

</mosaic_0001>

<bundles_post_ra>
// kernel: tpu_custom_call.1
= control target key start
LH: loop header
LB: loop body
LE: loop exit
PB: predicated region body
PF: predicated region fallthrough
CT: control target
= control target key end

     0   :  { %v5139_v1 = vmov 0   ;;  %vm141_vm0 = vcmask 523264   ;;  %s5129_s0 = inlined_call_operand.vmem [shape: bf16[10,192], index: 0, kind: input, shape index: {}]   ;;  %s5130_s1 = inlined_call_operand.vmem [shape: bf16[192,32], index: 1, kind: input, shape index: {}]   ;;  %s5131_s2 = inlined_call_operand.vmem [shape: bf16[2,32,96], index: 2, kind: input, shape index: {}]   ;;  %s5132_s3 = inlined_call_operand.vmem [shape: bf16[2,32,32], index: 3, kind: input, shape index: {}]   ;;  %s5133_s4 = inlined_call_operand.vmem [shape: bf16[2,32,64], index: 4, kind: input, shape index: {}]   ;;  %s5134_s5 = inlined_call_operand.vmem [shape: bf16[2,64,32], index: 5, kind: input, shape index: {}]   ;;  %s5135_s6 = inlined_call_operand.vmem [shape: f32[24,128], index: 6, kind: input, shape index: {}]   ;;  %s5136_s7 = inlined_call_operand.hbm [shape: f32[2,128], index: 7, kind: output, shape index: {}]  }
   0x1   :  { %v3418_v0 = vld [vmem:[%s5130_s1 + $0x38] sm:$0xff]   ;;  %145 = vmatprep.subr.bf16.mxu0 %v5139_v1  ;;  %3261 = vset.pattern.permute.xlu1 %v5139_v1  ;;  %v3419_v2 = vld [vmem:[%s5130_s1 + $0x30] sm:$0xff]   ;;  %v3420_v3 = vld [vmem:[%s5130_s1 + $0x28] sm:$0xff]  }
   0x2   :  { %146 = vmatpush1.bf16.msra.mxu0 %v3418_v0  ;;  %v3421_v4 = vld [vmem:[%s5130_s1 + $0x20] sm:$0xff]   ;;  %v3422_v6 = vld [vmem:[%s5130_s1 + $0x18] sm:$0xff]   ;;  %v3423_v7 = vld [vmem:[%s5130_s1 + $0x10] sm:$0xff]  }
   0x3   :  { %147 = vmatprep.subr.bf16.mxu0 %v5139_v1  ;;  %v3432_v5 = vld [vmem:[%s5129_s0 + $0x4] ss:$8 sps:$4 sm:$0x1f]  }
   0x4   :  { %3081 = vmatprep.mubr.msk.bf16.mxu0 %vm141_vm0, %v3432_v5  ;;  %v3424_v8 = vld [vmem:[%s5130_s1 + $0x8] sm:$0xff]   ;;  %v3425_v9 = vld [vmem:[%s5130_s1] sm:$0xff]  }
   0x6   :  { %148 = vmatpush1.bf16.msra.mxu0 %v3419_v2 }
   0x7   :  { %149 = vmatprep.subr.bf16.mxu0 %v5139_v1 }
   0xa   :  { %150 = vmatpush1.bf16.msra.mxu0 %v3420_v3 }
   0xb   :  { %151 = vmatprep.subr.bf16.mxu0 %v5139_v1 }
   0xe   :  { %152 = vmatpush1.bf16.msra.mxu0 %v3421_v4 }
   0xf   :  { %153 = vmatprep.subr.bf16.mxu0 %v5139_v1 }
  0x12   :  { %154 = vmatpush1.bf16.msra.mxu0 %v3422_v6 }
  0x13   :  { %155 = vmatprep.subr.bf16.mxu0 %v5139_v1 }
  0x16   :  { %156 = vmatpush1.bf16.msra.mxu0 %v3423_v7 }
  0x17   :  { %157 = vmatprep.subr.bf16.mxu0 %v5139_v1 }
  0x1a   :  { %158 = vmatpush1.bf16.msra.mxu0 %v3424_v8 }
  0x1b   :  { %159 = vmatprep.subr.bf16.mxu0 %v5139_v1 }
  0x1c   :  { %12 = vsyncpa [#allocation3], 0  ;;  %v3426_v10 = vld [vmem:[%s5130_s1 + $0x58] sm:$0xff]   ;;  %v3427_v11 = vld [vmem:[%s5130_s1 + $0x50] sm:$0xff]   ;;  %vm32_vm1 = vcmask 1044480   ;;  %vm194_vm2 = vcmask 261120   ;;  %v300_v56 = vlaneseq }
  0x1d   :  { %v3428_v12 = vld [vmem:[%s5130_s1 + $0x48] sm:$0xff]   ;;  %v3429_v13 = vld [vmem:[%s5130_s1 + $0x40] sm:$0xff]   ;;  %vm198_vm3 = vcmask 254976   ;;  %v3598_v37 = vmov 0.0   ;;  %vm3599_vm4 = vmmov 0   ;;  %s3600_s16 = smov 96  }
  0x1e   :  { %160 = vmatpush1.bf16.msra.mxu0 %v3425_v9  ;;  %v3430_v14 = vld [vmem:[%s5129_s0] ss:$8 sps:$4 sm:$0x1f]   ;;  %3176 = vmatprep.subr.bf16.mxu1 %v3598_v37  ;;  %v3082_v47 = vld [vmem:[%s5135_s6 + $0x5] ss:$0 sm:$0xff]  ;;  %v3745_v57 = vshrl.u32 %v300_v56, 7 }
  0x1f   :  { %169 = vmatprep.subr.bf16.mxu0 %v5139_v1  ;;  %v28_v15 = vld [vmem:[%s5135_s6] sm:$0x1f]  ;;  %v3433_v36 = vld [vmem:[%s5131_s2 + $0x8] sm:$0xff]   ;;  %3180 = vmatprep.mubr.msk.bf16.mxu1 %vm3599_vm4, %v3598_v37  ;;  %v3083_v51 = vld [vmem:[%s5135_s6 + $0x6] ss:$0 sm:$0xff]  ;;  %s3601_s17 = smov 120  }
  0x20   :  { %v30_v16 = vrot.slane %v28_v15, 3  ;;  %3177 = vmatpush3.bf16.msra.mxu1 %v3433_v36  ;;  %v3434_v38 = vld [vmem:[%s5131_s2] sm:$0xff]   ;;  %v3751_v59 = vsub.s32 1, %v3745_v57  ;;  %v3754_v60 = vsub.s32 0, %v3745_v57  ;;  %v665_v3 = vsub.s32 5, %v3745_v57  ;;  %s3602_s18 = smov 104  }
  0x21   :  { %3178 = vmatprep.subr.bf16.mxu1 %v3598_v37  ;;  %v3084_v58 = vld [vmem:[%s5135_s6 + $0x7] ss:$0 sm:$0xff]  ;;  %v327_v4 = vsub.s32 2, %v3745_v57  ;;  %v5147_v9 = vsub.s32 6, %v3745_v57  ;;  %s3603_s19 = smov 112   ;;  %vm309_vm5 = vcmask 61440  }
  0x22   :  { %170 = vmatpush2.bf16.msra.mxu0 %v3426_v10  ;;  %v33_v17 = vsel %vm32_vm1, %v28_v15, %v30_v16  ;;  %v339_v10 = vsub.s32 3, %v3745_v57  ;;  %vm673_vm6 = vcmask 64517   ;;  %vm677_vm7 = vcmask 58368   ;;  %s3608_s20 = smov 64  }
  0x23   :  { %171 = vmatprep.subr.bf16.mxu0 %v5139_v1  ;;  %vm361_vm8 = vcmask 7168   ;;  %vm363_vm9 = vcmask 15360   ;;  %vm365_vm10 = vcmask 23552   ;;  %vm367_vm11 = vcmask 31744  }
  0x24   :  { %3179 = vmatpush3.bf16.msra.mxu1 %v3434_v38  ;;  %vm369_vm12 = vcmask 36864   ;;  %vm5149_vm13 = vcmask 39941   ;;  %vm5148_vm14 = vcmask 33792   ;;  %vm657_vm15 = vcmask 64512  }
  0x25   :  { %3184 = vmatprep.subr.bf16.mxu1 %v3598_v37 }
  0x26   :  { %172 = vmatpush2.bf16.msra.mxu0 %v3427_v11 }
  0x27   :  { %173 = vmatprep.subr.bf16.mxu0 %v5139_v1 }
  0x2a   :  { %174 = vmatpush2.bf16.msra.mxu0 %v3428_v12 }
  0x2b   :  { %175 = vmatprep.subr.bf16.mxu0 %v5139_v1 }
  0x2e   :  { %176 = vmatpush2.bf16.msra.mxu0 %v3429_v13  ;;  %v699_v13 = vsub.s32 7, %v3745_v57 }
  0x2f   :  { %3236 = vmatprep.subr.bf16.mxu0 %v3598_v37 }
  0x31   :  { %178 = vmatmul.mubr.bf16.vlgmr.msra.gmra.mxu0 %v3430_v14  ;;  %v351_v14 = vsub.s32 4, %v3745_v57 }
  0x32   :  { %3244 = vmatprep.mubr.msk.bf16.mxu0 %vm3599_vm4, %v3598_v37 }
  0xf1   :  { %v179_v18 = vpop.f32.mrf.mxu0 }
  0xf2   :  { %v3710_v19 = vadd.f32 %v179_v18, %v33_v17 }
  0xf3   :  { %v181_v20 = vpop.f32.mrf.mxu0 }
  0xf4   :  { %v195_v21 = vsel %vm194_vm2, %v3710_v19, 0.0 }
  0xf5   :  { %v182_v22 = vpop.f32.mrf.mxu0  ;;  %196 = vadd.xlane.f32.xlu0 %v195_v21 }
  0xf6   :  { %v3714_v23 = vadd.f32 %v182_v22, %v30_v16 }
  0xf7   :  { %v184_v24 = vpop.f32.mrf.mxu0 }
  0xf8   :  { %v199_v25 = vsel %vm198_vm3, %v3714_v23, 0.0 }
  0xf9   :  { %200 = vadd.xlane.f32.xlu0 %v199_v25 }
 0x17e   :  { %v197_v26 = vpop.xlane.xlu0 %196 }
 0x17f   :  { %v203_v27 = vmul.f32 0.03125, %v197_v26 }
 0x181   :  { %v205_v28 = vsub.f32 %v3710_v19, %v203_v27 }
 0x182   :  { %v201_v29 = vpop.xlane.xlu0 %200 }
 0x183   :  { %v204_v30 = vmul.f32 0.03125, %v201_v29  ;;  %v207_v31 = vmul.f32 %v205_v28, %v205_v28 }
 0x185   :  { %v206_v32 = vsub.f32 %v3714_v23, %v204_v30  ;;  %v209_v33 = vsel %vm194_vm2, %v207_v31, 0.0 }
 0x186   :  { %210 = vadd.xlane.f32.xlu1 %v209_v33 }
 0x187   :  { %v208_v34 = vmul.f32 %v206_v32, %v206_v32 }
 0x189   :  { %v212_v35 = vsel %vm198_vm3, %v208_v34, 0.0 }
 0x18a   :  { %213 = vadd.xlane.f32.xlu1 %v212_v35 }
 0x20f   :  { %v211_v39 = vpop.xlane.xlu1 %210 }
 0x210   :  { %v215_v40 = vmul.f32 0.03125, %v211_v39 }
 0x212   :  { %v217_v41 = vadd.f32 1e-06, %v215_v40 }
 0x213   :  { %v214_v42 = vpop.xlane.xlu1 %213 }
 0x214   :  { %3453 = vrsqrt.f32 %v217_v41  ;;  %v216_v43 = vmul.f32 0.03125, %v214_v42 }
 0x216   :  { %v218_v44 = vadd.f32 1e-06, %v216_v43 }
 0x218   :  { %3455 = vrsqrt.f32 %v218_v44 }
 0x221   :  { %v3454_v45 = vpop.eup %3453 }
 0x222   :  { %v221_v46 = vmul.f32 %v3454_v45, %v205_v28 }
 0x224   :  { %v227_v50 = vmul.f32 %v3082_v47, %v221_v46 }
 0x225   :  { %v3456_v48 = vpop.eup %3455 }
 0x226   :  { %v222_v49 = vmul.f32 %v3456_v48, %v206_v32  ;;  %v233_v53 = vadd.f32 %v3083_v51, %v227_v50 }
 0x228   :  { %v228_v52 = vmul.f32 %v3082_v47, %v222_v49 }
 0x22a   :  { %v234_v54 = vadd.f32 %v3083_v51, %v228_v52 }
 0x22c   :  { %v235_v55 = vpack.c.bf16 %v234_v54, %v233_v53 }
 0x22e   :  { %3181 = vmatmul.mubr.msk.bf16.vlgmr.msra.gmra.mxu1 %vm194_vm2, %v235_v55 }
 0x22f   :  { %3188 = vmatprep.mubr.msk.bf16.mxu1 %vm3599_vm4, %v3598_v37 }
 0x2ee   :  { %v293_v61 = vpop.f32.mrf.mxu1 }
 0x2ef   :  { %v3756_v62 = vadd.f32 %v3084_v58, %v293_v61 }
 0x2f0   :  { %v3182_v63 = vpop.f32.mrf.mxu1 }
 0x2f1   :  { %v3760_v0 = vrot.slane %v3756_v62, %v3751_v59  ;;  %v3764_v2 = vrot.slane %v3756_v62, %v3754_v60  ;;  %v3775_v7 = vrot.slane %v3756_v62, %v665_v3  ;;  %v3780_v8 = vrot.slane %v3756_v62, %v327_v4 }
 0x2f2   :  { %v296_v5 = vpop.f32.mrf.mxu1  ;;  %v3791_v11 = vrot.slane %v3756_v62, %v5147_v9  ;;  %v3796_v12 = vrot.slane %v3756_v62, %v339_v10  ;;  %v3809_v16 = vrot.slane %v3756_v62, %v699_v13  ;;  %v3814_v17 = vrot.slane %v3756_v62, %v351_v14 }
 0x2f3   :  { %318 = vrot.lane.b32.xlu1 %v3760_v0, %s3600_s16  ;;  %305 = vrot.lane.b32.xlu0 %v3764_v2, %s3600_s16  ;;  %v3804_v15 = vadd.f32 %v3084_v58, %v296_v5 }
 0x2f4   :  { %v3183_v6 = vpop.f32.mrf.mxu1 }
 0x2f5   :  { %v3822_v18 = vrot.slane %v3804_v15, %v3754_v60  ;;  %v3828_v20 = vrot.slane %v3804_v15, %v3751_v59 }
 0x2f7   :  { %668 = vrot.lane.b32.xlu1 %v3775_v7, %s3600_s16  ;;  %330 = vrot.lane.b32.xlu0 %v3780_v8, %s3600_s16 }
 0x2fb   :  { %686 = vrot.lane.b32.xlu1 %v3791_v11, %s3600_s16  ;;  %342 = vrot.lane.b32.xlu0 %v3796_v12, %s3600_s16 }
 0x2ff   :  { %702 = vrot.lane.b32.xlu1 %v3809_v16, %s3600_s16  ;;  %354 = vrot.lane.b32.xlu0 %v3814_v17, %s3600_s16 }
 0x303   :  { %718 = vrot.lane.b32.xlu1 %v3822_v18, %s3600_s16 }
 0x307   :  { %734 = vrot.lane.b32.xlu1 %v3828_v20, %s3600_s16 }
 0x365   :  { %v319_v21 = vpop.permute.xlu1 %318  ;;  %v306_v22 = vpop.permute.xlu0 %305 }
 0x366   :  { %v308_v24 = vmul.f32 %v306_v22, %v3756_v62  ;;  %v321_v26 = vmul.f32 %v319_v21, %v3756_v62 }
 0x368   :  { %412 = vrot.lane.b32.xlu1 %v308_v24, %s3601_s17  ;;  %v310_v42 = vsel %vm309_vm5, %v308_v24, 0.0  ;;  %v322_v47 = vsel %vm309_vm5, %v321_v26, 0.0 }
 0x369   :  { %v669_v25 = vpop.permute.xlu1 %668  ;;  %v331_v33 = vpop.permute.xlu0 %330 }
 0x36a   :  { %v3836_v27 = vmul.f32 %v669_v25, %v3804_v15  ;;  %v671_v29 = vmul.f32 %v669_v25, %v3756_v62  ;;  %v333_v34 = vmul.f32 %v331_v33, %v3756_v62 }
 0x36c   :  { %419 = vrot.lane.b32.xlu1 %v321_v26, %s3601_s17  ;;  %841 = vrot.lane.b32.xlu0 %v3836_v27, %s3601_s17  ;;  %v674_v50 = vsel %vm673_vm6, %v671_v29, 0.0  ;;  %v334_v52 = vsel %vm309_vm5, %v333_v34, 0.0  ;;  %v678_v53 = vsel %vm677_vm7, %v3836_v27, 0.0 }
 0x36d   :  { %v687_v28 = vpop.permute.xlu1 %686  ;;  %v343_v36 = vpop.permute.xlu0 %342 }
 0x36e   :  { %v689_v31 = vmul.f32 %v687_v28, %v3756_v62  ;;  %v690_v38 = vmul.f32 %v687_v28, %v3804_v15  ;;  %v345_v39 = vmul.f32 %v343_v36, %v3756_v62 }
 0x370   :  { %839 = vrot.lane.b32.xlu1 %v671_v29, %s3601_s17  ;;  %566 = vrot.lane.b32.xlu0 %v308_v24, %s3602_s18  ;;  %v691_v43 = vsel %vm673_vm6, %v689_v31, 0.0  ;;  %v694_v44 = vsel %vm677_vm7, %v690_v38, 0.0  ;;  %v346_v61 = vsel %vm309_vm5, %v345_v39, 0.0 }
 0x371   :  { %v703_v30 = vpop.permute.xlu1 %702  ;;  %v355_v40 = vpop.permute.xlu0 %354 }
 0x372   :  { %v706_v32 = vmul.f32 %v703_v30, %v3804_v15  ;;  %v705_v35 = vmul.f32 %v703_v30, %v3756_v62  ;;  %v357_v41 = vmul.f32 %v355_v40, %v3756_v62 }
 0x374   :  { %853 = vrot.lane.b32.xlu1 %v689_v31, %s3601_s17  ;;  %869 = vrot.lane.b32.xlu0 %v706_v32, %s3601_s17  ;;  %v710_v45 = vsel %vm677_vm7, %v706_v32, 0.0  ;;  %v707_v56 = vsel %vm673_vm6, %v705_v35, 0.0  ;;  %v358_v63 = vsel %vm309_vm5, %v357_v41, 0.0 }
 0x375   :  { %v719_v46 = vpop.permute.xlu1 %718 }
 0x376   :  { %v3887_v49 = vmul.f32 %v719_v46, %v3804_v15  ;;  %v721_v22 = vmul.f32 %v719_v46, %v3756_v62 }
 0x378   :  { %426 = vrot.lane.b32.xlu1 %v333_v34, %s3601_s17  ;;  %999 = vrot.lane.b32.xlu0 %v3836_v27, %s3603_s19 }
 0x379   :  { %v735_v48 = vpop.permute.xlu1 %734 }
 0x37a   :  { %v738_v55 = vmul.f32 %v735_v48, %v3804_v15 }
 0x37c   :  { %491 = vrot.lane.b32.xlu1 %v308_v24, %s3603_s19  ;;  %1021 = vrot.lane.b32.xlu0 %v705_v35, %s3603_s19  ;;  %v737_v24 = vmul.f32 %v735_v48, %v3756_v62 }
 0x37e   :  { %v739_v25 = vsel %vm673_vm6, %v737_v24, 0.0 }
 0x380   :  { %497 = vrot.lane.b32.xlu1 %v321_v26, %s3603_s19  ;;  %1159 = vrot.lane.b32.xlu0 %v689_v31, %s3602_s18 }
 0x384   :  { %855 = vrot.lane.b32.xlu1 %v690_v38, %s3601_s17  ;;  %509 = vrot.lane.b32.xlu0 %v345_v39, %s3603_s19 }
 0x388   :  { %867 = vrot.lane.b32.xlu1 %v705_v35, %s3601_s17  ;;  %1023 = vrot.lane.b32.xlu0 %v706_v32, %s3603_s19 }
 0x38c   :  { %997 = vrot.lane.b32.xlu1 %v671_v29, %s3603_s19  ;;  %1149 = vrot.lane.b32.xlu0 %v3836_v27, %s3602_s18  ;;  %v742_v27 = vsel %vm677_vm7, %v738_v55, 0.0 }
 0x390   :  { %1009 = vrot.lane.b32.xlu1 %v689_v31, %s3603_s19  ;;  %1171 = vrot.lane.b32.xlu0 %v705_v35, %s3602_s18 }
 0x394   :  { %433 = vrot.lane.b32.xlu1 %v345_v39, %s3601_s17  ;;  %584 = vrot.lane.b32.xlu0 %v345_v39, %s3602_s18 }
 0x398   :  { %503 = vrot.lane.b32.xlu1 %v333_v34, %s3603_s19  ;;  %1173 = vrot.lane.b32.xlu0 %v706_v32, %s3602_s18 }
 0x39c   :  { %572 = vrot.lane.b32.xlu1 %v321_v26, %s3602_s18  ;;  %590 = vrot.lane.b32.xlu0 %v357_v41, %s3602_s18 }
 0x3a0   :  { %1011 = vrot.lane.b32.xlu1 %v690_v38, %s3603_s19 }
 0x3a4   :  { %1147 = vrot.lane.b32.xlu1 %v671_v29, %s3602_s18 }
 0x3a8   :  { %440 = vrot.lane.b32.xlu1 %v357_v41, %s3601_s17 }
 0x3ac   :  { %578 = vrot.lane.b32.xlu1 %v333_v34, %s3602_s18 }
 0x3b0   :  { %1161 = vrot.lane.b32.xlu1 %v690_v38, %s3602_s18 }
 0x3b4   :  { %515 = vrot.lane.b32.xlu1 %v357_v41, %s3603_s19 }
 0x3bb   :  { %311 = vadd.xlane.f32.xlu0 %v310_v42 }
 0x3bf   :  { %692 = vadd.xlane.f32.xlu0 %v691_v43 }
 0x3c3   :  { %695 = vadd.xlane.f32.xlu0 %v694_v44 }
 0x3c7   :  { %711 = vadd.xlane.f32.xlu0 %v710_v45 }
 0x3d8   :  { %323 = vadd.xlane.f32.xlu1 %v322_v47 }
 0x3da   :  { %v413_v51 = vpop.permute.xlu1 %412 }
 0x3db   :  { %v415_v29 = vsel %vm309_vm5, %v413_v51, 0.0 }
 0x3dc   :  { %675 = vadd.xlane.f32.xlu1 %v674_v50 }
 0x3dd   :  { %883 = vrot.lane.b32.xlu0 %v3887_v49, %s3601_s17 }
 0x3de   :  { %v420_v54 = vpop.permute.xlu1 %419  ;;  %v842_v30 = vpop.permute.xlu0 %841 }
 0x3df   :  { %v422_v62 = vsel %vm309_vm5, %v420_v54, 0.0  ;;  %v848_v41 = vsel %vm677_vm7, %v842_v30, 0.0 }
 0x3e0   :  { %335 = vadd.xlane.f32.xlu1 %v334_v52 }
 0x3e1   :  { %1035 = vrot.lane.b32.xlu0 %v3887_v49, %s3603_s19 }
 0x3e2   :  { %v3902_v58 = vpop.permute.xlu1 %839  ;;  %v567_v32 = vpop.permute.xlu0 %566 }
 0x3e3   :  { %v569_v51 = vsel %vm309_vm5, %v567_v32, 0.0 }
 0x3e4   :  { %679 = vadd.xlane.f32.xlu1 %v678_v53 }
 0x3e5   :  { %1185 = vrot.lane.b32.xlu0 %v3887_v49, %s3602_s18 }
 0x3e6   :  { %v854_v5 = vpop.permute.xlu1 %853  ;;  %v870_v36 = vpop.permute.xlu0 %869 }
 0x3e7   :  { %v859_v33 = vsel %vm673_vm6, %v854_v5, 0.0  ;;  %v876_v53 = vsel %vm677_vm7, %v870_v36, 0.0 }
 0x3e8   :  { %708 = vadd.xlane.f32.xlu1 %v707_v56 }
 0x3e9   :  { %1197 = vrot.lane.b32.xlu0 %v738_v55, %s3602_s18 }
 0x3ea   :  { %v427_v6 = vpop.permute.xlu1 %426  ;;  %v1000_v40 = vpop.permute.xlu0 %999 }
 0x3eb   :  { %v429_v35 = vsel %vm309_vm5, %v427_v6, 0.0  ;;  %v1006_v56 = vsel %vm677_vm7, %v1000_v40, 0.0  ;;  %v723_v6 = vsel %vm673_vm6, %v721_v22, 0.0 }
 0x3ec   :  { %347 = vadd.xlane.f32.xlu1 %v346_v61 }
 0x3ee   :  { %v3906_v21 = vpop.permute.xlu1 %491  ;;  %v1022_v44 = vpop.permute.xlu0 %1021 }
 0x3ef   :  { %v494_v32 = vsel %vm309_vm5, %v3906_v21, 0.0 }
 0x3f0   :  { %359 = vadd.xlane.f32.xlu1 %v358_v63  ;;  %v1027_v63 = vsel %vm673_vm6, %v1022_v44, 0.0 }
 0x3f2   :  { %v498_v15 = vpop.permute.xlu1 %497  ;;  %v1160_v47 = vpop.permute.xlu0 %1159 }
 0x3f3   :  { %v500_v38 = vsel %vm309_vm5, %v498_v15, 0.0  ;;  %v1165_v15 = vsel %vm673_vm6, %v1160_v47, 0.0 }
 0x3f6   :  { %v3913_v26 = vpop.permute.xlu1 %855  ;;  %v510_v52 = vpop.permute.xlu0 %509 }
 0x3fa   :  { %v868_v28 = vpop.permute.xlu1 %867 }
 0x3fb   :  { %v873_v43 = vsel %vm673_vm6, %v868_v28, 0.0 }
 0x3fe   :  { %v3921_v31 = vpop.permute.xlu1 %997 }
 0x3ff   :  { %v1003_v36 = vsel %vm673_vm6, %v3921_v31, 0.0 }
 0x401   :  { %881 = vrot.lane.b32.xlu1 %v721_v22, %s3601_s17 }
 0x402   :  { %v1010_v34 = vpop.permute.xlu1 %1009 }
 0x403   :  { %v1015_v45 = vsel %vm673_vm6, %v1010_v34, 0.0  ;;  %v862_v34 = vsel %vm677_vm7, %v3913_v26, 0.0 }
 0x405   :  { %895 = vrot.lane.b32.xlu1 %v737_v24, %s3601_s17 }
 0x406   :  { %v434_v39 = vpop.permute.xlu1 %433 }
 0x407   :  { %v436_v48 = vsel %vm309_vm5, %v434_v39, 0.0 }
 0x408   :  { %740 = vadd.xlane.f32.xlu0 %v739_v25  ;;  %v726_v25 = vsel %vm677_vm7, %v3887_v49, 0.0 }
 0x409   :  { %1033 = vrot.lane.b32.xlu1 %v721_v22, %s3603_s19 }
 0x40a   :  { %v504_v42 = vpop.permute.xlu1 %503 }
 0x40b   :  { %v506_v39 = vsel %vm309_vm5, %v504_v42, 0.0  ;;  %v512_v42 = vsel %vm309_vm5, %v510_v52, 0.0 }
 0x40c   :  { %743 = vadd.xlane.f32.xlu0 %v742_v27 }
 0x40d   :  { %897 = vrot.lane.b32.xlu1 %v738_v55, %s3601_s17 }
 0x40e   :  { %v573_v46 = vpop.permute.xlu1 %572 }
 0x40f   :  { %v575_v26 = vsel %vm309_vm5, %v573_v46, 0.0 }
 0x410   :  { %416 = vadd.xlane.f32.xlu0 %v415_v29  ;;  %v845_v29 = vsel %vm673_vm6, %v3902_v58, 0.0 }
 0x411   :  { %1045 = vrot.lane.b32.xlu1 %v737_v24, %s3603_s19 }
 0x412   :  { %v1012_v50 = vpop.permute.xlu1 %1011 }
 0x414   :  { %423 = vadd.xlane.f32.xlu0 %v422_v62 }
 0x415   :  { %1183 = vrot.lane.b32.xlu1 %v721_v22, %s3602_s18 }
 0x416   :  { %v1148_v54 = vpop.permute.xlu1 %1147 }
 0x417   :  { %v1153_v44 = vsel %vm673_vm6, %v1148_v54, 0.0 }
 0x418   :  { %860 = vadd.xlane.f32.xlu0 %v859_v33 }
 0x419   :  { %1047 = vrot.lane.b32.xlu1 %v738_v55, %s3603_s19  ;;  %v1024_v55 = vpop.permute.xlu0 %1023 }
 0x41a   :  { %v441_v61 = vpop.permute.xlu1 %440  ;;  %v1030_v46 = vsel %vm677_vm7, %v1024_v55, 0.0 }
 0x41b   :  { %v443_v28 = vsel %vm309_vm5, %v441_v61, 0.0 }
 0x41c   :  { %430 = vadd.xlane.f32.xlu0 %v429_v35 }
 0x41d   :  { %1195 = vrot.lane.b32.xlu1 %v737_v24, %s3602_s18  ;;  %v1150_v5 = vpop.permute.xlu0 %1149 }
 0x41e   :  { %v579_v24 = vpop.permute.xlu1 %578 }
 0x41f   :  { %v581_v22 = vsel %vm309_vm5, %v579_v24, 0.0 }
 0x420   :  { %501 = vadd.xlane.f32.xlu0 %v500_v38 }
 0x421   :  { %v1172_v27 = vpop.permute.xlu0 %1171 }
 0x422   :  { %v1162_v30 = vpop.permute.xlu1 %1161 }
 0x423   :  { %v1168_v49 = vsel %vm677_vm7, %v1162_v30, 0.0 }
 0x424   :  { %849 = vadd.xlane.f32.xlu0 %v848_v41  ;;  %v1018_v41 = vsel %vm677_vm7, %v1012_v50, 0.0 }
 0x425   :  { %v585_v62 = vpop.permute.xlu0 %584 }
 0x426   :  { %v516_v33 = vpop.permute.xlu1 %515 }
 0x427   :  { %v518_v58 = vsel %vm309_vm5, %v516_v33, 0.0 }
 0x428   :  { %874 = vadd.xlane.f32.xlu0 %v873_v43 }
 0x429   :  { %v1174_v35 = vpop.permute.xlu0 %1173 }
 0x42a   :  { %v1180_v38 = vsel %vm677_vm7, %v1174_v35, 0.0 }
 0x42c   :  { %1016 = vadd.xlane.f32.xlu0 %v1015_v45 }
 0x42d   :  { %v591_v21 = vpop.permute.xlu0 %590 }
 0x42e   :  { %v593_v40 = vsel %vm309_vm5, %v591_v21, 0.0 }
 0x430   :  { %437 = vadd.xlane.f32.xlu0 %v436_v48 }
 0x434   :  { %570 = vadd.xlane.f32.xlu0 %v569_v51 }
 0x438   :  { %877 = vadd.xlane.f32.xlu0 %v876_v53  ;;  %v1156_v53 = vsel %vm677_vm7, %v1150_v5, 0.0 }
 0x43c   :  { %1007 = vadd.xlane.f32.xlu0 %v1006_v56  ;;  %v1177_v56 = vsel %vm673_vm6, %v1172_v27, 0.0 }
 0x440   :  { %1028 = vadd.xlane.f32.xlu0 %v1027_v63  ;;  %v587_v63 = vsel %vm309_vm5, %v585_v62, 0.0 }
 0x441   :  { %724 = vadd.xlane.f32.xlu1 %v723_v6 }
 0x444   :  { %1166 = vadd.xlane.f32.xlu0 %v1165_v15  ;;  %v312_v31 = vpop.xlane.xlu0 %311 }
 0x445   :  { %727 = vadd.xlane.f32.xlu1 %v726_v25 }
 0x448   :  { %444 = vadd.xlane.f32.xlu0 %v443_v28  ;;  %v3964_v47 = vpop.xlane.xlu0 %692 }
 0x449   :  { %846 = vadd.xlane.f32.xlu1 %v845_v29 }
 0x44c   :  { %582 = vadd.xlane.f32.xlu0 %v581_v22  ;;  %v3969_v50 = vpop.xlane.xlu0 %695 }
 0x44d   :  { %495 = vadd.xlane.f32.xlu1 %v494_v32 }
 0x450   :  { %1169 = vadd.xlane.f32.xlu0 %v1168_v49  ;;  %v3975_v61 = vpop.xlane.xlu0 %711 }
 0x451   :  { %863 = vadd.xlane.f32.xlu1 %v862_v34 }
 0x454   :  { %519 = vadd.xlane.f32.xlu0 %v518_v58  ;;  %v884_v6 = vpop.permute.xlu0 %883 }
 0x455   :  { %1004 = vadd.xlane.f32.xlu1 %v1003_v36  ;;  %v890_v28 = vsel %vm677_vm7, %v884_v6, 0.0 }
 0x458   :  { %1181 = vadd.xlane.f32.xlu0 %v1180_v38  ;;  %v1036_v25 = vpop.permute.xlu0 %1035 }
 0x459   :  { %507 = vadd.xlane.f32.xlu1 %v506_v39  ;;  %v1042_v32 = vsel %vm677_vm7, %v1036_v25, 0.0 }
 0x45c   :  { %594 = vadd.xlane.f32.xlu0 %v593_v40  ;;  %v1186_v22 = vpop.permute.xlu0 %1185 }
 0x45d   :  { %576 = vadd.xlane.f32.xlu1 %v575_v26  ;;  %v1192_v35 = vsel %vm677_vm7, %v1186_v22, 0.0 }
 0x460   :  { %v1198_v33 = vpop.permute.xlu0 %1197 }
 0x461   :  { %v3958_v43 = vpop.xlane.xlu1 %323  ;;  %1019 = vadd.xlane.f32.xlu1 %v1018_v41  ;;  %v1204_v21 = vsel %vm677_vm7, %v1198_v33, 0.0 }
 0x465   :  { %v3961_v45 = vpop.xlane.xlu1 %675  ;;  %1154 = vadd.xlane.f32.xlu1 %v1153_v44  ;;  %v362_v44 = vsel %vm361_vm8, %v312_v31, %v3958_v43 }
 0x469   :  { %v336_v48 = vpop.xlane.xlu1 %335  ;;  %513 = vadd.xlane.f32.xlu1 %v512_v42 }
 0x46a   :  { %v364_v42 = vsel %vm363_vm9, %v362_v44, %v336_v48 }
 0x46d   :  { %1031 = vadd.xlane.f32.xlu1 %v1030_v46  ;;  %v3967_v51 = vpop.xlane.xlu1 %679 }
 0x471   :  { %1157 = vadd.xlane.f32.xlu1 %v1156_v53  ;;  %v3972_v54 = vpop.xlane.xlu1 %708 }
 0x475   :  { %1178 = vadd.xlane.f32.xlu1 %v1177_v56  ;;  %v348_v52 = vpop.xlane.xlu1 %347 }
 0x476   :  { %v366_v56 = vsel %vm365_vm10, %v364_v42, %v348_v52 }
 0x479   :  { %588 = vadd.xlane.f32.xlu1 %v587_v63  ;;  %v360_v55 = vpop.xlane.xlu1 %359 }
 0x47a   :  { %v3995_v6 = vsel %vm367_vm11, %v366_v56, %v360_v55 }
 0x47d   :  { %v882_v15 = vpop.permute.xlu1 %881 }
 0x47e   :  { %v887_v24 = vsel %vm673_vm6, %v882_v15, 0.0 }
 0x47f   :  { %888 = vadd.xlane.f32.xlu1 %v887_v24  ;;  %v370_v24 = vsel %vm369_vm12, %v3995_v6, -inf }
 0x481   :  { %v896_v5 = vpop.permute.xlu1 %895 }
 0x482   :  { %v901_v29 = vsel %vm673_vm6, %v896_v5, 0.0 }
 0x483   :  { %891 = vadd.xlane.f32.xlu1 %v890_v28  ;;  %902 = vadd.xlane.f32.xlu0 %v901_v29 }
 0x485   :  { %v1034_v27 = vpop.permute.xlu1 %1033 }
 0x486   :  { %v1039_v30 = vsel %vm673_vm6, %v1034_v27, 0.0 }
 0x487   :  { %1040 = vadd.xlane.f32.xlu0 %v1039_v30  ;;  %v745_v30 = vsel %vm361_vm8, %v3961_v45, %v3964_v47 }
 0x489   :  { %v898_v62 = vpop.permute.xlu1 %897 }
 0x48a   :  { %v904_v49 = vsel %vm677_vm7, %v898_v62, 0.0  ;;  %v747_v62 = vsel %vm363_vm9, %v745_v30, %v3972_v54 }
 0x48b   :  { %1043 = vadd.xlane.f32.xlu0 %v1042_v32  ;;  %905 = vadd.xlane.f32.xlu1 %v904_v49  ;;  %v746_v49 = vsel %vm361_vm8, %v3967_v51, %v3969_v50 }
 0x48c   :  { %v748_v47 = vsel %vm363_vm9, %v746_v49, %v3975_v61 }
 0x48d   :  { %v1046_v34 = vpop.permute.xlu1 %1045 }
 0x48e   :  { %v1051_v58 = vsel %vm673_vm6, %v1046_v34, 0.0 }
 0x48f   :  { %1193 = vadd.xlane.f32.xlu0 %v1192_v35  ;;  %1052 = vadd.xlane.f32.xlu1 %v1051_v58 }
 0x491   :  { %v741_v36 = vpop.xlane.xlu0 %740  ;;  %v1184_v38 = vpop.permute.xlu1 %1183 }
 0x492   :  { %v1189_v39 = vsel %vm673_vm6, %v1184_v38, 0.0 }
 0x493   :  { %1205 = vadd.xlane.f32.xlu0 %v1204_v21  ;;  %1190 = vadd.xlane.f32.xlu1 %v1189_v39 }
 0x495   :  { %v744_v40 = vpop.xlane.xlu0 %743  ;;  %v1048_v26 = vpop.permute.xlu1 %1047 }
 0x496   :  { %v1054_v41 = vsel %vm677_vm7, %v1048_v26, 0.0 }
 0x497   :  { %1055 = vadd.xlane.f32.xlu1 %v1054_v41 }
 0x499   :  { %v417_v46 = vpop.xlane.xlu0 %416  ;;  %v1196_v53 = vpop.permute.xlu1 %1195 }
 0x49a   :  { %v1201_v63 = vsel %vm673_vm6, %v1196_v53, 0.0 }
 0x49b   :  { %1202 = vadd.xlane.f32.xlu1 %v1201_v63 }
 0x49d   :  { %v424_v15 = vpop.xlane.xlu0 %423 }
 0x49e   :  { %v446_v58 = vsel %vm361_vm8, %v417_v46, %v424_v15 }
 0x49f   :  { %371 = vmax.xlane.f32.xlu1 %v370_v24 }
 0x4a1   :  { %v3999_v43 = vpop.xlane.xlu0 %860 }
 0x4a5   :  { %v431_v31 = vpop.xlane.xlu0 %430 }
 0x4a6   :  { %v447_v50 = vsel %vm363_vm9, %v446_v58, %v431_v31 }
 0x4a9   :  { %v502_v48 = vpop.xlane.xlu0 %501 }
 0x4ad   :  { %v4001_v25 = vpop.xlane.xlu0 %849 }
 0x4b1   :  { %v4003_v5 = vpop.xlane.xlu0 %874 }
 0x4b5   :  { %v4005_v52 = vpop.xlane.xlu0 %1016 }
 0x4b9   :  { %v438_v28 = vpop.xlane.xlu0 %437 }
 0x4ba   :  { %v448_v38 = vsel %vm365_vm10, %v447_v50, %v438_v28 }
 0x4bd   :  { %v571_v55 = vpop.xlane.xlu0 %570 }
 0x4c1   :  { %v4007_v29 = vpop.xlane.xlu0 %877 }
 0x4c5   :  { %v4009_v27 = vpop.xlane.xlu0 %1007 }
 0x4c9   :  { %v4014_v22 = vpop.xlane.xlu0 %1028 }
 0x4ca   :  { %v725_v32 = vpop.xlane.xlu1 %724 }
 0x4cb   :  { %v749_v33 = vsel %vm365_vm10, %v747_v62, %v725_v32 }
 0x4cc   :  { %v4023_v34 = vsel %vm367_vm11, %v749_v33, %v741_v36 }
 0x4cd   :  { %v4025_v35 = vpop.xlane.xlu0 %1166  ;;  %v754_v45 = vsel %vm5149_vm13, %v4023_v34, -inf }
 0x4ce   :  { %755 = vmax.xlane.f32.xlu1 %v754_v45  ;;  %v728_v54 = vpop.xlane.xlu1 %727 }
 0x4cf   :  { %v750_v51 = vsel %vm365_vm10, %v748_v47, %v728_v54 }
 0x4d0   :  { %v4035_v36 = vsel %vm367_vm11, %v750_v51, %v744_v40 }
 0x4d1   :  { %v445_v21 = vpop.xlane.xlu0 %444  ;;  %v758_v39 = vsel %vm5148_vm14, %v4035_v36, -inf }
 0x4d2   :  { %v4041_v26 = vsel %vm367_vm11, %v448_v38, %v445_v21  ;;  %759 = vmax.xlane.f32.xlu0 %v758_v39  ;;  %v847_v61 = vpop.xlane.xlu1 %846 }
 0x4d3   :  { %v450_v41 = vsel %vm369_vm12, %v4041_v26, -inf }
 0x4d5   :  { %v583_v56 = vpop.xlane.xlu0 %582 }
 0x4d6   :  { %451 = vmax.xlane.f32.xlu0 %v450_v41  ;;  %v496_v44 = vpop.xlane.xlu1 %495 }
 0x4d7   :  { %v521_v31 = vsel %vm361_vm8, %v496_v44, %v502_v48  ;;  %v907_v44 = vsel %vm361_vm8, %v847_v61, %v3999_v43 }
 0x4d9   :  { %v1170_v15 = vpop.xlane.xlu0 %1169 }
 0x4da   :  { %v864_v42 = vpop.xlane.xlu1 %863 }
 0x4dd   :  { %v520_v62 = vpop.xlane.xlu0 %519 }
 0x4de   :  { %v1005_v46 = vpop.xlane.xlu1 %1004 }
 0x4e1   :  { %v1182_v54 = vpop.xlane.xlu0 %1181 }
 0x4e2   :  { %v508_v40 = vpop.xlane.xlu1 %507 }
 0x4e3   :  { %v522_v28 = vsel %vm363_vm9, %v521_v31, %v508_v40 }
 0x4e5   :  { %v595_v38 = vpop.xlane.xlu0 %594 }
 0x4e6   :  { %v577_v53 = vpop.xlane.xlu1 %576 }
 0x4e7   :  { %v596_v51 = vsel %vm361_vm8, %v571_v55, %v577_v53  ;;  %v909_v55 = vsel %vm363_vm9, %v907_v44, %v4003_v5  ;;  %v1057_v5 = vsel %vm361_vm8, %v1005_v46, %v4005_v52 }
 0x4e8   :  { %v597_v48 = vsel %vm363_vm9, %v596_v51, %v583_v56 }
 0x4ea   :  { %v1020_v63 = vpop.xlane.xlu1 %1019 }
 0x4ee   :  { %v1155_v24 = vpop.xlane.xlu1 %1154 }
 0x4f2   :  { %v514_v30 = vpop.xlane.xlu1 %513 }
 0x4f3   :  { %v523_v32 = vsel %vm365_vm10, %v522_v28, %v514_v30  ;;  %v908_v30 = vsel %vm361_vm8, %v4001_v25, %v864_v42  ;;  %v1059_v25 = vsel %vm363_vm9, %v1057_v5, %v4014_v22 }
 0x4f4   :  { %v4049_v49 = vsel %vm367_vm11, %v523_v32, %v520_v62  ;;  %v910_v43 = vsel %vm363_vm9, %v908_v30, %v4007_v29  ;;  %v1207_v30 = vsel %vm361_vm8, %v1155_v24, %v4025_v35 }
 0x4f5   :  { %v525_v33 = vsel %vm369_vm12, %v4049_v49, -inf }
 0x4f6   :  { %526 = vmax.xlane.f32.xlu1 %v525_v33  ;;  %v1032_v45 = vpop.xlane.xlu1 %1031 }
 0x4fa   :  { %v1158_v47 = vpop.xlane.xlu1 %1157 }
 0x4fb   :  { %v1208_v44 = vsel %vm361_vm8, %v1158_v47, %v1170_v15 }
 0x4fe   :  { %v1179_v58 = vpop.xlane.xlu1 %1178 }
 0x502   :  { %v589_v50 = vpop.xlane.xlu1 %588 }
 0x503   :  { %v598_v21 = vsel %vm365_vm10, %v597_v48, %v589_v50 }
 0x504   :  { %v4057_v39 = vsel %vm367_vm11, %v598_v21, %v595_v38 }
 0x505   :  { %v600_v41 = vsel %vm369_vm12, %v4057_v39, -inf }
 0x506   :  { %601 = vmax.xlane.f32.xlu1 %v600_v41  ;;  %v1058_v41 = vsel %vm361_vm8, %v4009_v27, %v1020_v63  ;;  %v1209_v63 = vsel %vm363_vm9, %v1207_v30, %v1179_v58 }
 0x507   :  { %v1060_v22 = vsel %vm363_vm9, %v1058_v41, %v1032_v45 }
 0x508   :  { %v889_v40 = vpop.xlane.xlu1 %888 }
 0x509   :  { %v911_v53 = vsel %vm365_vm10, %v909_v55, %v889_v40 }
 0x50c   :  { %v903_v56 = vpop.xlane.xlu0 %902  ;;  %v892_v62 = vpop.xlane.xlu1 %891 }
 0x50d   :  { %v4067_v31 = vsel %vm367_vm11, %v911_v53, %v903_v56  ;;  %v912_v61 = vsel %vm365_vm10, %v910_v43, %v892_v62  ;;  %v1210_v56 = vsel %vm363_vm9, %v1208_v44, %v1182_v54 }
 0x50e   :  { %v915_v28 = vsel %vm5149_vm13, %v4067_v31, -inf }
 0x50f   :  { %916 = vmax.xlane.f32.xlu0 %v915_v28 }
 0x510   :  { %v1041_v32 = vpop.xlane.xlu0 %1040 }
 0x511   :  { %v1061_v42 = vsel %vm365_vm10, %v1059_v25, %v1041_v32 }
 0x514   :  { %v1044_v33 = vpop.xlane.xlu0 %1043  ;;  %v906_v51 = vpop.xlane.xlu1 %905 }
 0x515   :  { %v4079_v48 = vsel %vm367_vm11, %v912_v61, %v906_v51  ;;  %v1062_v40 = vsel %vm365_vm10, %v1060_v22, %v1044_v33  ;;  %v5137_v51 = vmov 1  }
 0x516   :  { %v918_v50 = vsel %vm5148_vm14, %v4079_v48, -inf  ;;  %3262 = vset.pattern.permute.xlu0 %v5137_v51 }
 0x517   :  { %919 = vmax.xlane.f32.xlu1 %v918_v50 }
 0x518   :  { %v1053_v29 = vpop.xlane.xlu1 %1052  ;;  %v1194_v52 = vpop.xlane.xlu0 %1193 }
 0x519   :  { %v4087_v38 = vsel %vm367_vm11, %v1061_v42, %v1053_v29  ;;  %v1212_v62 = vsel %vm365_vm10, %v1210_v56, %v1194_v52 }
 0x51a   :  { %v1065_v46 = vsel %vm5149_vm13, %v4087_v38, -inf }
 0x51b   :  { %1066 = vmax.xlane.f32.xlu0 %v1065_v46 }
 0x51c   :  { %v1191_v21 = vpop.xlane.xlu1 %1190  ;;  %v1206_v55 = vpop.xlane.xlu0 %1205 }
 0x51d   :  { %v4107_v15 = vsel %vm367_vm11, %v1212_v62, %v1206_v55  ;;  %v1211_v45 = vsel %vm365_vm10, %v1209_v63, %v1191_v21 }
 0x51e   :  { %v1218_v35 = vsel %vm5148_vm14, %v4107_v15, -inf }
 0x520   :  { %v1056_v53 = vpop.xlane.xlu1 %1055 }
 0x521   :  { %v4098_v28 = vsel %vm367_vm11, %v1062_v40, %v1056_v53 }
 0x522   :  { %v1068_v27 = vsel %vm5148_vm14, %v4098_v28, -inf }
 0x523   :  { %1069 = vmax.xlane.f32.xlu0 %v1068_v27 }
 0x524   :  { %v1203_v47 = vpop.xlane.xlu1 %1202 }
 0x525   :  { %v4111_v54 = vsel %vm367_vm11, %v1211_v45, %v1203_v47 }
 0x526   :  { %v1215_v24 = vsel %vm5149_vm13, %v4111_v54, -inf }
 0x527   :  { %1219 = vmax.xlane.f32.xlu0 %v1218_v35  ;;  %1216 = vmax.xlane.f32.xlu1 %v1215_v24 }
 0x528   :  { %v372_v32 = vpop.xlane.xlu1 %371 }
 0x529   :  { %v373_v58 = vsub.f32 %v3995_v6, %v372_v32 }
 0x52b   :  { %v374_v43 = vmul.f32 1.442695, %v373_v58 }
 0x52d   :  { %3457 = vpow2.f32 %v374_v43 }
 0x53a   :  { %v4118_v5 = vpop.eup %3457 }
 0x53b   :  { %v376_v61 = vsel %vm369_vm12, %v4118_v5, 0.0 }
 0x53c   :  { %377 = vadd.xlane.f32.xlu1 %v376_v61 }
 0x557   :  { %v756_v33 = vpop.xlane.xlu1 %755 }
 0x558   :  { %v761_v50 = vsub.f32 %v4023_v34, %v756_v33 }
 0x55a   :  { %v763_v25 = vmul.f32 1.442695, %v761_v50 }
 0x55b   :  { %v760_v42 = vpop.xlane.xlu0 %759 }
 0x55c   :  { %3459 = vpow2.f32 %v763_v25  ;;  %v762_v29 = vsub.f32 %v4035_v36, %v760_v42 }
 0x55e   :  { %v765_v6 = vmul.f32 1.442695, %v762_v29 }
 0x55f   :  { %v452_v52 = vpop.xlane.xlu0 %451 }
 0x560   :  { %3461 = vpow2.f32 %v765_v6  ;;  %v453_v46 = vsub.f32 %v4041_v26, %v452_v52 }
 0x562   :  { %v454_v21 = vmul.f32 1.442695, %v453_v46 }
 0x564   :  { %3463 = vpow2.f32 %v454_v21 }
 0x569   :  { %v4126_v41 = vpop.eup %3459 }
 0x56a   :  { %v767_v44 = vsel %vm5149_vm13, %v4126_v41, 0.0 }
 0x56b   :  { %768 = vadd.xlane.f32.xlu1 %v767_v44 }
 0x56d   :  { %v4130_v22 = vpop.eup %3461 }
 0x56e   :  { %v770_v34 = vsel %vm5148_vm14, %v4130_v22, 0.0 }
 0x56f   :  { %771 = vadd.xlane.f32.xlu0 %v770_v34 }
 0x571   :  { %v4134_v36 = vpop.eup %3463 }
 0x572   :  { %v456_v40 = vsel %vm369_vm12, %v4134_v36, 0.0 }
 0x573   :  { %457 = vadd.xlane.f32.xlu0 %v456_v40 }
 0x57f   :  { %v527_v26 = vpop.xlane.xlu1 %526 }
 0x580   :  { %v528_v55 = vsub.f32 %v4049_v49, %v527_v26 }
 0x582   :  { %v529_v53 = vmul.f32 1.442695, %v528_v55 }
 0x584   :  { %3465 = vpow2.f32 %v529_v53 }
 0x58f   :  { %v602_v56 = vpop.xlane.xlu1 %601 }
 0x590   :  { %v603_v30 = vsub.f32 %v4057_v39, %v602_v56 }
 0x591   :  { %v4140_v62 = vpop.eup %3465 }
 0x592   :  { %v604_v27 = vmul.f32 1.442695, %v603_v30  ;;  %v531_v63 = vsel %vm369_vm12, %v4140_v62, 0.0 }
 0x593   :  { %532 = vadd.xlane.f32.xlu1 %v531_v63 }
 0x594   :  { %3467 = vpow2.f32 %v604_v27 }
 0x598   :  { %v917_v45 = vpop.xlane.xlu0 %916 }
 0x599   :  { %v921_v47 = vsub.f32 %v4067_v31, %v917_v45  ;;  %v5145_v45 = vmov 2  }
 0x59b   :  { %v923_v35 = vmul.f32 1.442695, %v921_v47  ;;  %v5141_v47 = vmov 4  }
 0x59d   :  { %3469 = vpow2.f32 %v923_v35  ;;  %v5143_v35 = vmov 3  }
 0x5a0   :  { %v920_v24 = vpop.xlane.xlu1 %919 }
 0x5a1   :  { %v4145_v49 = vpop.eup %3467  ;;  %v922_v32 = vsub.f32 %v4079_v48, %v920_v24 }
 0x5a2   :  { %v606_v39 = vsel %vm369_vm12, %v4145_v49, 0.0 }
 0x5a3   :  { %v925_v58 = vmul.f32 1.442695, %v922_v32  ;;  %607 = vadd.xlane.f32.xlu1 %v606_v39 }
 0x5a4   :  { %v1067_v43 = vpop.xlane.xlu0 %1066 }
 0x5a5   :  { %3471 = vpow2.f32 %v925_v58  ;;  %v1071_v61 = vsub.f32 %v4087_v38, %v1067_v43 }
 0x5a7   :  { %v1073_v33 = vmul.f32 1.442695, %v1071_v61 }
 0x5a9   :  { %3473 = vpow2.f32 %v1073_v33 }
 0x5aa   :  { %v4151_v50 = vpop.eup %3469 }
 0x5ab   :  { %v927_v31 = vsel %vm5149_vm13, %v4151_v50, 0.0 }
 0x5ac   :  { %928 = vadd.xlane.f32.xlu0 %v927_v31  ;;  %v1070_v25 = vpop.xlane.xlu0 %1069 }
 0x5ad   :  { %v1072_v48 = vsub.f32 %v4098_v28, %v1070_v25 }
 0x5af   :  { %v1075_v42 = vmul.f32 1.442695, %v1072_v48 }
 0x5b0   :  { %v1220_v29 = vpop.xlane.xlu0 %1219  ;;  %v1217_v6 = vpop.xlane.xlu1 %1216 }
 0x5b1   :  { %3475 = vpow2.f32 %v1075_v42  ;;  %v1222_v52 = vsub.f32 %v4107_v15, %v1220_v29  ;;  %v1221_v46 = vsub.f32 %v4111_v54, %v1217_v6 }
 0x5b2   :  { %v4158_v38 = vpop.eup %3471 }
 0x5b3   :  { %v1225_v21 = vmul.f32 1.442695, %v1222_v52  ;;  %v1223_v44 = vmul.f32 1.442695, %v1221_v46  ;;  %v930_v34 = vsel %vm5148_vm14, %v4158_v38, 0.0 }
 0x5b4   :  { %931 = vadd.xlane.f32.xlu1 %v930_v34 }
 0x5b5   :  { %3477 = vpow2.f32 %v1225_v21 }
 0x5b6   :  { %v4162_v40 = vpop.eup %3473  ;;  %3479 = vpow2.f32 %v1223_v44 }
 0x5b7   :  { %v1077_v28 = vsel %vm5149_vm13, %v4162_v40, 0.0 }
 0x5b8   :  { %1078 = vadd.xlane.f32.xlu0 %v1077_v28 }
 0x5be   :  { %v4166_v26 = vpop.eup %3475 }
 0x5bf   :  { %v1080_v15 = vsel %vm5148_vm14, %v4166_v26, 0.0 }
 0x5c0   :  { %1081 = vadd.xlane.f32.xlu0 %v1080_v15 }
 0x5c2   :  { %v4170_v54 = vpop.eup %3477 }
 0x5c3   :  { %v4172_v55 = vpop.eup %3479  ;;  %v1230_v53 = vsel %vm5148_vm14, %v4170_v54, 0.0  ;;  %vm659_vm14 = vcmask 130048  }
 0x5c4   :  { %1231 = vadd.xlane.f32.xlu0 %v1230_v53  ;;  %v1227_v56 = vsel %vm5149_vm13, %v4172_v55, 0.0  ;;  %vm661_vm13 = vcmask 195584  }
 0x5c5   :  { %1228 = vadd.xlane.f32.xlu1 %v1227_v56  ;;  %v378_v30 = vpop.xlane.xlu1 %377 }
 0x5c6   :  { %3481 = vrcp.f32 %v378_v30 }
 0x5d3   :  { %v3482_v27 = vpop.eup %3481 }
 0x5d4   :  { %v380_v63 = vmul.f32 %v3482_v27, %v4118_v5 }
 0x5d6   :  { %383 = vperm.xlu1 %3261, %v380_v63  }
 0x5da   :  { %388 = vperm.xlu0 %3262, %v380_v63   ;;  %3263 = vset.pattern.permute.xlu1 %v5145_v45 }
 0x5db   :  { %394 = vperm.xlu1 %3263, %v380_v63  }
 0x5de   :  { %3265 = vset.pattern.permute.xlu0 %v5141_v47 }
 0x5df   :  { %406 = vperm.xlu0 %3265, %v380_v63   ;;  %3264 = vset.pattern.permute.xlu1 %v5143_v35 }
 0x5e0   :  { %400 = vperm.xlu1 %3264, %v380_v63  }
 0x5e3   :  { %3269 = vset.pattern.permute.xlu0 %v5137_v51 }
 0x5e4   :  { %3266 = vset.pattern.permute.xlu1 %v5139_v1 }
 0x5f4   :  { %v769_v24 = vpop.xlane.xlu1 %768 }
 0x5f5   :  { %3483 = vrcp.f32 %v769_v24 }
 0x5f8   :  { %v772_v5 = vpop.xlane.xlu0 %771 }
 0x5f9   :  { %3485 = vrcp.f32 %v772_v5 }
 0x5fc   :  { %v458_v61 = vpop.xlane.xlu0 %457 }
 0x5fd   :  { %3487 = vrcp.f32 %v458_v61 }
 0x602   :  { %v3484_v32 = vpop.eup %3483 }
 0x603   :  { %v774_v39 = vmul.f32 %v3484_v32, %v4126_v41 }
 0x605   :  { %779 = vperm.xlu1 %3266, %v774_v39  }
 0x606   :  { %v3486_v58 = vpop.eup %3485 }
 0x607   :  { %v776_v43 = vmul.f32 %v3486_v58, %v4130_v22 }
 0x609   :  { %794 = vperm.xlu0 %3269, %v776_v43   ;;  %3267 = vset.pattern.permute.xlu1 %v5137_v51 }
 0x60a   :  { %790 = vperm.xlu1 %3267, %v774_v39   ;;  %v3488_v22 = vpop.eup %3487 }
 0x60b   :  { %v460_v33 = vmul.f32 %v3488_v22, %v4134_v36 }
 0x60d   :  { %3270 = vset.pattern.permute.xlu0 %v5145_v45 }
 0x60e   :  { %802 = vperm.xlu0 %3270, %v774_v39   ;;  %3268 = vset.pattern.permute.xlu1 %v5139_v1 }
 0x60f   :  { %784 = vperm.xlu1 %3268, %v776_v43  }
 0x612   :  { %3273 = vset.pattern.permute.xlu0 %v5141_v47 }
 0x613   :  { %826 = vperm.xlu0 %3273, %v774_v39   ;;  %3271 = vset.pattern.permute.xlu1 %v5145_v45 }
 0x614   :  { %806 = vperm.xlu1 %3271, %v776_v43  }
 0x617   :  { %830 = vperm.xlu0 %3273, %v776_v43  }
 0x618   :  { %3272 = vset.pattern.permute.xlu1 %v5143_v35 }
 0x619   :  { %814 = vperm.xlu1 %3272, %v774_v39  }
 0x61b   :  { %3277 = vset.pattern.permute.xlu0 %v5137_v51 }
 0x61c   :  { %v533_v41 = vpop.xlane.xlu1 %532 }
 0x61d   :  { %3489 = vrcp.f32 %v533_v41  ;;  %818 = vperm.xlu1 %3272, %v776_v43  }
 0x621   :  { %3274 = vset.pattern.permute.xlu1 %v5139_v1 }
 0x622   :  { %463 = vperm.xlu1 %3274, %v460_v33  }
 0x626   :  { %3275 = vset.pattern.permute.xlu1 %v5137_v51 }
 0x627   :  { %468 = vperm.xlu1 %3275, %v460_v33  }
 0x62a   :  { %v3490_v31 = vpop.eup %3489 }
 0x62b   :  { %3276 = vset.pattern.permute.xlu1 %v5139_v1  ;;  %v535_v25 = vmul.f32 %v3490_v31, %v4140_v62 }
 0x62c   :  { %v608_v48 = vpop.xlane.xlu1 %607 }
 0x62d   :  { %3491 = vrcp.f32 %v608_v48  ;;  %543 = vperm.xlu0 %3277, %v535_v25   ;;  %538 = vperm.xlu1 %3276, %v535_v25  }
 0x631   :  { %3278 = vset.pattern.permute.xlu0 %v5145_v45 }
 0x632   :  { %474 = vperm.xlu0 %3278, %v460_v33  }
 0x635   :  { %v929_v29 = vpop.xlane.xlu0 %928 }
 0x63a   :  { %v3492_v42 = vpop.eup %3491 }
 0x63b   :  { %v610_v36 = vmul.f32 %v3492_v42, %v4145_v49 }
 0x63d   :  { %624 = vperm.xlu0 %3278, %v610_v36   ;;  %613 = vperm.xlu1 %3276, %v610_v36   ;;  %v932_v6 = vpop.xlane.xlu1 %931 }
 0x63e   :  { %3493 = vrcp.f32 %v932_v6 }
 0x641   :  { %v1079_v52 = vpop.xlane.xlu0 %1078  ;;  %3282 = vset.pattern.permute.xlu0 %v5143_v35  ;;  %3279 = vset.pattern.permute.xlu1 %v5137_v51 }
 0x642   :  { %3495 = vrcp.f32 %v1079_v52  ;;  %555 = vperm.xlu0 %3282, %v535_v25   ;;  %618 = vperm.xlu1 %3279, %v610_v36  }
 0x646   :  { %3280 = vset.pattern.permute.xlu1 %v5145_v45  ;;  %3289 = vset.pattern.permute.xlu0 %v5137_v51 }
 0x647   :  { %549 = vperm.xlu1 %3280, %v535_v25  }
 0x649   :  { %v1082_v62 = vpop.xlane.xlu0 %1081 }
 0x64a   :  { %3497 = vrcp.f32 %v1082_v62 }
 0x64b   :  { %v3494_v49 = vpop.eup %3493  ;;  %3281 = vset.pattern.permute.xlu1 %v5143_v35 }
 0x64c   :  { %480 = vperm.xlu1 %3281, %v460_v33   ;;  %v4206_v46 = vmul.f32 %v3494_v49, %v4158_v38 }
 0x64d   :  { %v1232_v28 = vpop.xlane.xlu0 %1231 }
 0x64e   :  { %v1229_v21 = vpop.xlane.xlu1 %1228  ;;  %954 = vperm.xlu0 %3289, %v4206_v46  }
 0x64f   :  { %v3496_v44 = vpop.eup %3495  ;;  %3499 = vrcp.f32 %v1229_v21 }
 0x650   :  { %3283 = vset.pattern.permute.xlu1 %v5141_v47  ;;  %v4211_v34 = vmul.f32 %v3496_v44, %v4162_v40  ;;  %3501 = vrcp.f32 %v929_v29 }
 0x651   :  { %486 = vperm.xlu1 %3283, %v460_v33   ;;  %3503 = vrcp.f32 %v1232_v28 }
 0x652   :  { %1100 = vperm.xlu0 %3289, %v4211_v34  }
 0x655   :  { %3284 = vset.pattern.permute.xlu1 %v5143_v35  ;;  %v389_v39 = vpop.permute.xlu0 %388 }
 0x656   :  { %630 = vperm.xlu1 %3284, %v610_v36   ;;  %3291 = vset.pattern.permute.xlu0 %v5139_v1  ;;  %v391_v52 = vmul.f32 %v389_v39, %v3760_v0 }
 0x657   :  { %v3498_v38 = vpop.eup %3497 }
 0x658   :  { %v4217_v15 = vmul.f32 %v3498_v38, %v4166_v26 }
 0x65a   :  { %3285 = vset.pattern.permute.xlu1 %v5141_v47  ;;  %1094 = vperm.xlu0 %3291, %v4217_v15   ;;  %v407_v43 = vpop.permute.xlu0 %406 }
 0x65b   :  { %561 = vperm.xlu1 %3285, %v535_v25  }
 0x65c   :  { %v3500_v40 = vpop.eup %3499 }
 0x65d   :  { %v1234_v53 = vmul.f32 %v3500_v40, %v4172_v55  ;;  %v3502_v56 = vpop.eup %3501 }
 0x65e   :  { %3294 = vset.pattern.permute.xlu0 %v5137_v51  ;;  %v934_v30 = vmul.f32 %v3502_v56, %v4151_v50  ;;  %v3504_v26 = vpop.eup %3503  ;;  %v384_v50 = vpop.permute.xlu1 %383 }
 0x65f   :  { %636 = vperm.xlu1 %3285, %v610_v36   ;;  %1250 = vperm.xlu0 %3294, %v1234_v53   ;;  %v1236_v27 = vmul.f32 %v3504_v26, %v4170_v54  ;;  %v386_v62 = vmul.f32 %v384_v50, %v3764_v2  ;;  %v409_v50 = vmul.f32 %v407_v43, %v3814_v17 }
 0x662   :  { %v395_v54 = vpop.permute.xlu1 %394 }
 0x663   :  { %3286 = vset.pattern.permute.xlu1 %v5139_v1  ;;  %3295 = vset.pattern.permute.xlu0 %v5145_v45  ;;  %v397_v21 = vmul.f32 %v395_v54, %v3780_v8 }
 0x664   :  { %939 = vperm.xlu1 %3286, %v934_v30   ;;  %966 = vperm.xlu0 %3295, %v4206_v46  }
 0x666   :  { %v401_v55 = vpop.permute.xlu1 %400 }
 0x667   :  { %v403_v28 = vmul.f32 %v401_v55, %v3796_v12 }
 0x668   :  { %3287 = vset.pattern.permute.xlu1 %v5137_v51  ;;  %3298 = vset.pattern.permute.xlu0 %v5137_v51 }
 0x669   :  { %950 = vperm.xlu1 %3287, %v934_v30   ;;  %1254 = vperm.xlu0 %3298, %v1236_v27  }
 0x66d   :  { %3288 = vset.pattern.permute.xlu1 %v5139_v1  ;;  %3300 = vset.pattern.permute.xlu0 %v5145_v45 }
 0x66e   :  { %944 = vperm.xlu1 %3288, %v4206_v46   ;;  %1116 = vperm.xlu0 %3300, %v4217_v15  }
 0x672   :  { %1089 = vperm.xlu1 %3288, %v4211_v34   ;;  %3303 = vset.pattern.permute.xlu0 %v5143_v35 }
 0x673   :  { %1124 = vperm.xlu0 %3303, %v4211_v34  }
 0x676   :  { %3290 = vset.pattern.permute.xlu1 %v5145_v45 }
 0x677   :  { %962 = vperm.xlu1 %3290, %v934_v30   ;;  %1128 = vperm.xlu0 %3303, %v4217_v15  }
 0x67b   :  { %3292 = vset.pattern.permute.xlu1 %v5137_v51  ;;  %1278 = vperm.xlu0 %3303, %v1236_v27  }
 0x67c   :  { %1104 = vperm.xlu1 %3292, %v4217_v15  }
 0x67f   :  { %3308 = vset.pattern.permute.xlu0 %v5141_v47 }
 0x680   :  { %3293 = vset.pattern.permute.xlu1 %v5139_v1  ;;  %1286 = vperm.xlu0 %3308, %v1234_v53   ;;  %v4245_v63 = vpop.permute.xlu1 %779 }
 0x681   :  { %1239 = vperm.xlu1 %3293, %v1234_v53  }
 0x684   :  { %3339 = vset.pattern.permute.xlu0 %v5139_v1  ;;  %v795_v41 = vpop.permute.xlu0 %794 }
 0x685   :  { %3296 = vset.pattern.permute.xlu1 %v5145_v45  ;;  %v4249_v24 = vpop.permute.xlu1 %790 }
 0x686   :  { %1112 = vperm.xlu1 %3296, %v4211_v34  }
 0x689   :  { %v4261_v33 = vpop.permute.xlu0 %802 }
 0x68a   :  { %3297 = vset.pattern.permute.xlu1 %v5139_v1  ;;  %v785_v5 = vpop.permute.xlu1 %784 }
 0x68b   :  { %1244 = vperm.xlu1 %3297, %v1236_v27   ;;  %v788_v54 = vmul.f32 %v785_v5, %v3775_v7 }
 0x68e   :  { %v4265_v25 = vpop.permute.xlu0 %826 }
 0x68f   :  { %3299 = vset.pattern.permute.xlu1 %v5143_v35  ;;  %v807_v32 = vpop.permute.xlu1 %806 }
 0x690   :  { %974 = vperm.xlu1 %3299, %v934_v30  }
 0x692   :  { %v831_v36 = vpop.permute.xlu0 %830 }
 0x694   :  { %3301 = vset.pattern.permute.xlu1 %v5145_v45  ;;  %v4255_v58 = vpop.permute.xlu1 %814 }
 0x695   :  { %1262 = vperm.xlu1 %3301, %v1234_v53  }
 0x698   :  { %v819_v61 = vpop.permute.xlu1 %818 }
 0x699   :  { %3302 = vset.pattern.permute.xlu1 %v5143_v35  ;;  %v822_v5 = vmul.f32 %v819_v61, %v3822_v18 }
 0x69a   :  { %978 = vperm.xlu1 %3302, %v4206_v46  }
 0x69d   :  { %v464_v22 = vpop.permute.xlu1 %463 }
 0x69e   :  { %3304 = vset.pattern.permute.xlu1 %v5145_v45  ;;  %v466_v38 = vmul.f32 %v464_v22, %v3764_v2 }
 0x69f   :  { %1266 = vperm.xlu1 %3304, %v1236_v27  }
 0x6a2   :  { %v469_v31 = vpop.permute.xlu1 %468 }
 0x6a3   :  { %3305 = vset.pattern.permute.xlu1 %v5141_v47 }
 0x6a4   :  { %986 = vperm.xlu1 %3305, %v934_v30  }
 0x6a8   :  { %3306 = vset.pattern.permute.xlu1 %v5143_v35  ;;  %v539_v48 = vpop.permute.xlu1 %538  ;;  %v544_v6 = vpop.permute.xlu0 %543 }
 0x6a9   :  { %1274 = vperm.xlu1 %3306, %v1234_v53   ;;  %v546_v55 = vmul.f32 %v544_v6, %v3760_v0  ;;  %v541_v22 = vmul.f32 %v539_v48, %v3764_v2 }
 0x6ad   :  { %3307 = vset.pattern.permute.xlu1 %v5141_v47  ;;  %v475_v44 = vpop.permute.xlu0 %474 }
 0x6ae   :  { %990 = vperm.xlu1 %3307, %v4206_v46   ;;  %v392_v46 = vadd.f32 %v391_v52, %v386_v62 }
 0x6b0   :  { %v398_v53 = vadd.f32 %v397_v21, %v392_v46  ;;  %v798_v21 = vmul.f32 %v795_v41, %v3791_v11 }
 0x6b2   :  { %1136 = vperm.xlu1 %3307, %v4211_v34   ;;  %v471_v34 = vmul.f32 %v469_v31, %v3760_v0  ;;  %v404_v26 = vadd.f32 %v403_v28, %v398_v53  ;;  %v800_v28 = vadd.f32 %v798_v21, %v788_v54 }
 0x6b4   :  { %v472_v56 = vadd.f32 %v471_v34, %v466_v38  ;;  %v410_v46 = vadd.f32 %v409_v50, %v404_v26  ;;  %v547_v38 = vadd.f32 %v546_v55, %v541_v22 }
 0x6b6   :  { %1140 = vperm.xlu1 %3307, %v4217_v15   ;;  %v477_v15 = vmul.f32 %v475_v44, %v3780_v8  ;;  %v810_v44 = vmul.f32 %v807_v32, %v3809_v16 }
 0x6b8   :  { %v4268_v42 = vpop.permute.xlu1 %613  ;;  %v4283_v39 = vpop.permute.xlu0 %624  ;;  %v812_v48 = vadd.f32 %v810_v44, %v800_v28 }
 0x6ba   :  { %1290 = vperm.xlu1 %3307, %v1236_v27   ;;  %v478_v27 = vadd.f32 %v477_v15, %v472_v56  ;;  %v824_v56 = vadd.f32 %v822_v5, %v812_v48 }
 0x6bd   :  { %v4270_v29 = vpop.permute.xlu1 %618  ;;  %v556_v6 = vpop.permute.xlu0 %555 }
 0x6be   :  { %3340 = vset.pattern.permute.xlu1 %v5137_v51  ;;  %v558_v41 = vmul.f32 %v556_v6, %v3796_v12 }
 0x6c2   :  { %v550_v49 = vpop.permute.xlu1 %549 }
 0x6c3   :  { %v552_v34 = vmul.f32 %v550_v49, %v3780_v8  ;;  %v834_v49 = vmul.f32 %v831_v36, %v3828_v20 }
 0x6c5   :  { %v553_v53 = vadd.f32 %v552_v34, %v547_v38  ;;  %v836_v61 = vadd.f32 %v834_v49, %v824_v56  ;;  %v797_v56 = vmul.f32 %v4249_v24, %v3791_v11 }
 0x6c7   :  { %v481_v40 = vpop.permute.xlu1 %480 }
 0x6c8   :  { %v483_v30 = vmul.f32 %v481_v40, %v3796_v12 }
 0x6c9   :  { %v955_v21 = vpop.permute.xlu0 %954 }
 0x6ca   :  { %v484_v52 = vadd.f32 %v483_v30, %v478_v27  ;;  %v559_v30 = vadd.f32 %v558_v41, %v553_v53  ;;  %v787_v41 = vmul.f32 %v4245_v63, %v3775_v7 }
 0x6cc   :  { %v487_v31 = vpop.permute.xlu1 %486 }
 0x6cd   :  { %v489_v62 = vmul.f32 %v487_v31, %v3814_v17  ;;  %v1101_v34 = vpop.permute.xlu0 %1100 }
 0x6cf   :  { %v490_v43 = vadd.f32 %v489_v62, %v484_v52 }
 0x6d1   :  { %v3309_v15 = vpack.i.bf16 %v490_v43, %v410_v46  ;;  %v4292_v40 = vpop.permute.xlu1 %630 }
 0x6d3   :  { %3310 = vrot.lane.b32.xlu1 %v3309_v15, %s3608_s20 }
 0x6d5   :  { %v1095_v43 = vpop.permute.xlu0 %1094 }
 0x6d6   :  { %v562_v32 = vpop.permute.xlu1 %561 }
 0x6d7   :  { %v564_v26 = vmul.f32 %v562_v32, %v3814_v17  ;;  %v809_v32 = vmul.f32 %v4261_v33, %v3809_v16  ;;  %v833_v33 = vmul.f32 %v4265_v25, %v3828_v20  ;;  %v958_v25 = vmul.f32 %v955_v21, %v3791_v11 }
 0x6d9   :  { %v565_v27 = vadd.f32 %v564_v26, %v559_v30  ;;  %v799_v30 = vadd.f32 %v797_v56, %v787_v41  ;;  %v821_v26 = vmul.f32 %v4255_v58, %v3822_v18 }
 0x6da   :  { %v4298_v50 = vpop.permute.xlu1 %636  ;;  %v1251_v5 = vpop.permute.xlu0 %1250 }
 0x6db   :  { %v3314_v54 = vpack.i.bf16 %v836_v61, %v565_v27  ;;  %v811_v1 = vadd.f32 %v809_v32, %v799_v30 }
 0x6dd   :  { %3315 = vrot.lane.b32.xlu1 %v3314_v54, %s3608_s20  ;;  %v823_v63 = vadd.f32 %v821_v26, %v811_v1  ;;  %v616_v26 = vmul.f32 %v4268_v42, %v3764_v2  ;;  %v633_v2 = vmul.f32 %v4292_v40, %v3796_v12 }
 0x6df   :  { %v940_v31 = vpop.permute.xlu1 %939  ;;  %v967_v15 = vpop.permute.xlu0 %966  ;;  %v835_v41 = vadd.f32 %v833_v33, %v823_v63 }
 0x6e0   :  { %v947_v61 = vmul.f32 %v940_v31, %v3775_v7  ;;  %v970_v21 = vmul.f32 %v967_v15, %v3809_v16 }
 0x6e4   :  { %v951_v55 = vpop.permute.xlu1 %950  ;;  %v1255_v48 = vpop.permute.xlu0 %1254 }
 0x6e5   :  { %v957_v49 = vmul.f32 %v951_v55, %v3791_v11 }
 0x6e7   :  { %v959_v24 = vadd.f32 %v957_v49, %v947_v61 }
 0x6e9   :  { %v945_v22 = vpop.permute.xlu1 %944  ;;  %v1117_v51 = vpop.permute.xlu0 %1116 }
 0x6ea   :  { %v948_v9 = vmul.f32 %v945_v22, %v3775_v7 }
 0x6ec   :  { %v960_v22 = vadd.f32 %v958_v25, %v948_v9 }
 0x6ed   :  { %v1090_v52 = vpop.permute.xlu1 %1089 }
 0x6ee   :  { %v1125_v58 = vpop.permute.xlu0 %1124 }
 0x6f2   :  { %v963_v62 = vpop.permute.xlu1 %962 }
 0x6f3   :  { %v969_v27 = vmul.f32 %v963_v62, %v3809_v16  ;;  %v1097_v62 = vmul.f32 %v1090_v52, %v3775_v7  ;;  %v1129_v52 = vpop.permute.xlu0 %1128 }
 0x6f5   :  { %v971_v35 = vadd.f32 %v969_v27, %v959_v24 }
 0x6f7   :  { %v1105_v46 = vpop.permute.xlu1 %1104  ;;  %v1279_v15 = vpop.permute.xlu0 %1278 }
 0x6f8   :  { %v1108_v1 = vmul.f32 %v1105_v46, %v3791_v11 }
 0x6fc   :  { %v1240_v44 = vpop.permute.xlu1 %1239 }
 0x6fd   :  { %v1247_v9 = vmul.f32 %v1240_v44, %v3775_v7  ;;  %v3435_v44 = vld [vmem:[%s5132_s3 + $0x8] sm:$0xff]  }
 0x6fe   :  { %3185 = vmatpush3.bf16.msra.mxu1 %v3435_v44 }
 0x6ff   :  { %3186 = vmatprep.subr.bf16.mxu1 %v3598_v37 }
 0x701   :  { %v1113_v36 = vpop.permute.xlu1 %1112 }
 0x702   :  { %v1119_v30 = vmul.f32 %v1113_v36, %v3809_v16  ;;  %v627_v36 = vmul.f32 %v4283_v39, %v3780_v8  ;;  %v1257_v8 = vmul.f32 %v1251_v5, %v3791_v11  ;;  %v1258_v39 = vmul.f32 %v1255_v48, %v3791_v11 }
 0x703   :  { %v639_v5 = vmul.f32 %v4298_v50, %v3814_v17 }
 0x704   :  { %v1259_v48 = vadd.f32 %v1257_v8, %v1247_v9 }
 0x706   :  { %v1245_v28 = vpop.permute.xlu1 %1244 }
 0x707   :  { %v1248_v42 = vmul.f32 %v1245_v28, %v3775_v7 }
 0x70b   :  { %v975_v38 = vpop.permute.xlu1 %974 }
 0x70c   :  { %v981_v47 = vmul.f32 %v975_v38, %v3822_v18  ;;  %v1107_v38 = vmul.f32 %v1101_v34, %v3791_v11  ;;  %v1132_v11 = vmul.f32 %v1129_v52, %v3822_v18 }
 0x70e   :  { %v983_v55 = vadd.f32 %v981_v47, %v971_v35  ;;  %v1098_v47 = vmul.f32 %v1095_v43, %v3775_v7  ;;  %v1109_v35 = vadd.f32 %v1107_v38, %v1097_v62  ;;  %v972_v43 = vadd.f32 %v970_v21, %v960_v22 }
 0x710   :  { %v1263_v6 = vpop.permute.xlu1 %1262  ;;  %v1110_v34 = vadd.f32 %v1108_v1, %v1098_v47  ;;  %v1121_v61 = vadd.f32 %v1119_v30, %v1109_v35  ;;  %v1287_v30 = vpop.permute.xlu0 %1286 }
 0x711   :  { %v1293_v35 = vmul.f32 %v1287_v30, %v3828_v20 }
 0x715   :  { %v979_v53 = vpop.permute.xlu1 %978 }
 0x716   :  { %v982_v27 = vmul.f32 %v979_v53, %v3822_v18 }
 0x718   :  { %v984_v12 = vadd.f32 %v982_v27, %v972_v43 }
 0x71a   :  { %v1267_v54 = vpop.permute.xlu1 %1266 }
 0x71b   :  { %v1270_v7 = vmul.f32 %v1267_v54, %v3809_v16  ;;  %v3436_v54 = vld [vmem:[%s5132_s3] sm:$0xff]  }
 0x71c   :  { %3187 = vmatpush3.bf16.msra.mxu1 %v3436_v54 }
 0x71d   :  { %3192 = vmatprep.subr.bf16.mxu1 %v3598_v37 }
 0x71f   :  { %v987_v45 = vpop.permute.xlu1 %986 }
 0x720   :  { %v993_v56 = vmul.f32 %v987_v45, %v3828_v20  ;;  %v621_v45 = vmul.f32 %v4270_v29, %v3760_v0  ;;  %v1120_v0 = vmul.f32 %v1117_v51, %v3809_v16  ;;  %v1131_v29 = vmul.f32 %v1125_v58, %v3822_v18 }
 0x722   :  { %v995_v31 = vadd.f32 %v993_v56, %v983_v55  ;;  %v622_v24 = vadd.f32 %v621_v45, %v616_v26  ;;  %v1122_v53 = vadd.f32 %v1120_v0, %v1110_v34  ;;  %v1133_v33 = vadd.f32 %v1131_v29, %v1121_v61 }
 0x723   :  { %v1269_v55 = vmul.f32 %v1263_v6, %v3809_v16  ;;  %v1260_v56 = vadd.f32 %v1258_v39, %v1248_v42 }
 0x724   :  { %v3319_v32 = vpack.i.bf16 %v995_v31, %v835_v41  ;;  %v1275_v49 = vpop.permute.xlu1 %1274  ;;  %v628_v28 = vadd.f32 %v627_v36, %v622_v24  ;;  %v1134_v62 = vadd.f32 %v1132_v11, %v1122_v53 }
 0x725   :  { %v1281_v58 = vmul.f32 %v1275_v49, %v3822_v18  ;;  %v1272_v17 = vadd.f32 %v1270_v7, %v1260_v56  ;;  %v1282_v49 = vmul.f32 %v1279_v15, %v3822_v18 }
 0x726   :  { %3320 = vrot.lane.b32.xlu0 %v3319_v32, %s3608_s20  ;;  %v634_v6 = vadd.f32 %v633_v2, %v628_v28  ;;  %v1271_v32 = vadd.f32 %v1269_v55, %v1259_v48 }
 0x727   :  { %v1284_v22 = vadd.f32 %v1282_v49, %v1272_v17 }
 0x728   :  { %v640_v1 = vadd.f32 %v639_v5, %v634_v6  ;;  %v1283_v25 = vadd.f32 %v1281_v58, %v1271_v32  ;;  %v3091_v58 = vld [vmem:[%s5135_s6 + $0x8] ss:$0 sm:$0xff] }
 0x729   :  { %v991_v46 = vpop.permute.xlu1 %990 }
 0x72a   :  { %v994_v63 = vmul.f32 %v991_v46, %v3828_v20  ;;  %v1295_v34 = vadd.f32 %v1293_v35, %v1283_v25 }
 0x72c   :  { %v996_v41 = vadd.f32 %v994_v63, %v984_v12 }
 0x72d   :  { %v1137_v51 = vpop.permute.xlu1 %1136 }
 0x72e   :  { %v1143_v40 = vmul.f32 %v1137_v51, %v3828_v20 }
 0x730   :  { %v1145_v31 = vadd.f32 %v1143_v40, %v1133_v33 }
 0x731   :  { %v1141_v16 = vpop.permute.xlu1 %1140 }
 0x732   :  { %v3324_v50 = vpack.i.bf16 %v1145_v31, %v996_v41  ;;  %v1144_v38 = vmul.f32 %v1141_v16, %v3828_v20 }
 0x734   :  { %v1146_v45 = vadd.f32 %v1144_v38, %v1134_v62  ;;  %3325 = vrot.lane.b32.xlu0 %v3324_v50, %s3608_s20 }
 0x735   :  { %v1291_v47 = vpop.permute.xlu1 %1290 }
 0x736   :  { %v3329_v52 = vpack.i.bf16 %v1146_v45, %v640_v1  ;;  %v1294_v26 = vmul.f32 %v1291_v47, %v3828_v20 }
 0x738   :  { %v1296_v61 = vadd.f32 %v1294_v26, %v1284_v22  ;;  %3330 = vrot.lane.b32.xlu1 %v3329_v52, %s3608_s20  ;;  %v3437_v22 = vld [vmem:[%s5133_s4 + $0x8] sm:$0xff]   ;;  %v3438_v26 = vld [vmem:[%s5133_s4] sm:$0xff]  }
 0x73a   :  { %v3334_v46 = vpack.i.bf16 %v1296_v61, %v1295_v34 }
 0x73c   :  { %3335 = vrot.lane.b32.xlu0 %v3334_v46, %s3608_s20 }
 0x745   :  { %v3311_v18 = vpop.permute.xlu1 %3310 }
 0x746   :  { %v3313_v24 = vunpack.i.h.bf16 %v3311_v18  ;;  %v3312_v0 = vunpack.i.l.bf16 %v3311_v18 }
 0x748   :  { %v658_v15 = vsel %vm657_vm15, %v3312_v0, %v3313_v24  ;;  %v3092_v0 = vld [vmem:[%s5135_s6 + $0x9] ss:$0 sm:$0xff] }
 0x74f   :  { %v3316_v21 = vpop.permute.xlu1 %3315 }
 0x750   :  { %v3317_v43 = vunpack.i.l.bf16 %v3316_v21  ;;  %v3318_v8 = vunpack.i.h.bf16 %v3316_v21 }
 0x752   :  { %v660_v12 = vsel %vm659_vm14, %v658_v15, %v3317_v43  ;;  %v3440_v15 = vld [vmem:[%s5134_s5 + $0x10] sm:$0xff]  }
 0x798   :  { %v3321_v36 = vpop.permute.xlu0 %3320 }
 0x799   :  { %v3323_v9 = vunpack.i.h.bf16 %v3321_v36  ;;  %v3322_v2 = vunpack.i.l.bf16 %v3321_v36 }
 0x79b   :  { %v1329_v33 = vsel %vm657_vm15, %v3322_v2, %v3323_v9 }
 0x7a6   :  { %v3326_v27 = vpop.permute.xlu0 %3325 }
 0x7a7   :  { %v3327_v42 = vunpack.i.l.bf16 %v3326_v27  ;;  %v3328_v20 = vunpack.i.h.bf16 %v3326_v27 }
 0x7a9   :  { %v1330_v51 = vsel %vm657_vm15, %v3318_v8, %v3327_v42  ;;  %v1331_v7 = vsel %vm659_vm14, %v1329_v33, %v3328_v20  ;;  %v3093_v42 = vld [vmem:[%s5135_s6 + $0xa] ss:$0 sm:$0xff]  ;;  %v3442_v33 = vld [vmem:[%s5134_s5] sm:$0xff]  }
 0x7aa   :  { %v3331_v29 = vpop.permute.xlu1 %3330 }
 0x7ab   :  { %v3333_v63 = vunpack.i.h.bf16 %v3331_v29  ;;  %v3332_v39 = vunpack.i.l.bf16 %v3331_v29 }
 0x7ad   :  { %v1332_v40 = vsel %vm659_vm14, %v1330_v51, %v3333_v63  ;;  %v662_v28 = vsel %vm661_vm13, %v660_v12, %v3332_v39  ;;  %v3439_v39 = vld [vmem:[%s5134_s5 + $0x18] sm:$0xff]   ;;  %v3094_v51 = vld [vmem:[%s5135_s6 + $0xb] ss:$0 sm:$0xff] }
 0x7ae   :  { %v3336_v53 = vpop.permute.xlu0 %3335 }
 0x7af   :  { %v3338_v44 = vunpack.i.h.bf16 %v3336_v53  ;;  %v3337_v55 = vunpack.i.l.bf16 %v3336_v53  ;;  %v3441_v53 = vld [vmem:[%s5134_s5 + $0x8] sm:$0xff]  }
 0x7b1   :  { %v1333_v5 = vsel %vm661_vm13, %v1331_v7, %v3337_v55  ;;  %v1334_v11 = vsel %vm661_vm13, %v1332_v40, %v3338_v44 }
 0x7b2   :  { %v1335_v48 = vsel %vm32_vm1, %v662_v28, %v1333_v5 }
 0x7b3   :  { %v1336_v56 = vpack.c.bf16 %v1334_v11, %v1335_v48 }
 0x7b5   :  { %3189 = vmatmul.mubr.msk.bf16.vlgmr.msra.gmra.mxu1 %vm194_vm2, %v1336_v56 }
 0x7b6   :  { %3196 = vmatprep.mubr.msk.bf16.mxu1 %vm3599_vm4, %v3598_v37  ;;  %3193 = vmatpush3.bf16.msra.mxu1 %v3437_v22 }
 0x7b7   :  { %3194 = vmatprep.subr.bf16.mxu1 %v3598_v37 }
 0x7ba   :  { %3195 = vmatpush3.bf16.msra.mxu1 %v3438_v26 }
 0x7bb   :  { %3200 = vmatprep.subr.bf16.mxu1 %v3598_v37 }
 0x875   :  { %v1390_v41 = vpop.f32.mrf.mxu1 }
 0x876   :  { %v1397_v31 = vadd.f32 %v1390_v41, %v3710_v19 }
 0x877   :  { %v3190_v6 = vpop.f32.mrf.mxu1 }
 0x878   :  { %v4380_v62 = vadd.f32 %v3091_v58, %v1397_v31 }
 0x879   :  { %v1393_v16 = vpop.f32.mrf.mxu1 }
 0x87a   :  { %v1398_v54 = vadd.f32 %v1393_v16, %v3714_v23  ;;  %v1405_v32 = vsel %vm194_vm2, %v4380_v62, 0.0 }
 0x87b   :  { %1406 = vadd.xlane.f32.xlu1 %v1405_v32  ;;  %v3191_v17 = vpop.f32.mrf.mxu1 }
 0x87c   :  { %v4385_v50 = vadd.f32 %v3091_v58, %v1398_v54 }
 0x87e   :  { %v1408_v38 = vsel %vm198_vm3, %v4385_v50, 0.0 }
 0x87f   :  { %1409 = vadd.xlane.f32.xlu0 %v1408_v38 }
 0x904   :  { %v1407_v1 = vpop.xlane.xlu1 %1406 }
 0x905   :  { %v1411_v30 = vmul.f32 0.03125, %v1407_v1 }
 0x907   :  { %v1413_v19 = vsub.f32 %v4380_v62, %v1411_v30 }
 0x908   :  { %v1410_v49 = vpop.xlane.xlu0 %1409 }
 0x909   :  { %v1412_v25 = vmul.f32 0.03125, %v1410_v49  ;;  %v1415_v45 = vmul.f32 %v1413_v19, %v1413_v19 }
 0x90b   :  { %v1414_v23 = vsub.f32 %v4385_v50, %v1412_v25  ;;  %v1417_v47 = vsel %vm194_vm2, %v1415_v45, 0.0 }
 0x90c   :  { %1418 = vadd.xlane.f32.xlu0 %v1417_v47 }
 0x90d   :  { %v1416_v35 = vmul.f32 %v1414_v23, %v1414_v23 }
 0x90f   :  { %v1420_v52 = vsel %vm198_vm3, %v1416_v35, 0.0 }
 0x910   :  { %1421 = vadd.xlane.f32.xlu1 %v1420_v52 }
 0x995   :  { %v1419_v34 = vpop.xlane.xlu0 %1418 }
 0x996   :  { %v1423_v61 = vmul.f32 0.03125, %v1419_v34 }
 0x998   :  { %v1425_v46 = vadd.f32 1e-06, %v1423_v61 }
 0x999   :  { %v1422_v18 = vpop.xlane.xlu1 %1421 }
 0x99a   :  { %3505 = vrsqrt.f32 %v1425_v46  ;;  %v1424_v36 = vmul.f32 0.03125, %v1422_v18 }
 0x99c   :  { %v1426_v21 = vadd.f32 1e-06, %v1424_v36 }
 0x99e   :  { %3507 = vrsqrt.f32 %v1426_v21 }
 0x9a7   :  { %v3506_v27 = vpop.eup %3505 }
 0x9a8   :  { %v1429_v24 = vmul.f32 %v3506_v27, %v1413_v19 }
 0x9aa   :  { %v1435_v2 = vmul.f32 %v3092_v0, %v1429_v24 }
 0x9ab   :  { %v3508_v29 = vpop.eup %3507 }
 0x9ac   :  { %v1430_v9 = vmul.f32 %v3508_v29, %v1414_v23  ;;  %v1441_v20 = vadd.f32 %v3093_v42, %v1435_v2  ;;  %v3103_v23 = vld [vmem:[%s5135_s6 + $0xc] ss:$0 sm:$0xff] }
 0x9ae   :  { %v1436_v43 = vmul.f32 %v3092_v0, %v1430_v9 }
 0x9b0   :  { %v1442_v63 = vadd.f32 %v3093_v42, %v1436_v43  ;;  %v3443_v43 = vld [vmem:[%s5131_s2 + $0x18] sm:$0xff]  }
 0x9b2   :  { %v1443_v8 = vpack.c.bf16 %v1442_v63, %v1441_v20  ;;  %v3444_v20 = vld [vmem:[%s5131_s2 + $0x10] sm:$0xff]  }
 0x9b4   :  { %3197 = vmatmul.mubr.msk.bf16.vlgmr.msra.gmra.mxu1 %vm194_vm2, %v1443_v8 }
 0x9b5   :  { %3208 = vmatprep.mubr.msk.bf16.mxu1 %vm3599_vm4, %v3598_v37  ;;  %3201 = vmatpush3.bf16.msra.mxu1 %v3439_v39 }
 0x9b6   :  { %3202 = vmatprep.subr.bf16.mxu1 %v3598_v37 }
 0x9b9   :  { %3203 = vmatpush3.bf16.msra.mxu1 %v3440_v15 }
 0x9ba   :  { %3204 = vmatprep.subr.bf16.mxu1 %v3598_v37 }
 0x9bd   :  { %3205 = vmatpush3.bf16.msra.mxu1 %v3441_v53 }
 0x9be   :  { %3206 = vmatprep.subr.bf16.mxu1 %v3598_v37 }
 0x9c1   :  { %3207 = vmatpush3.bf16.msra.mxu1 %v3442_v33 }
 0x9c2   :  { %3212 = vmatprep.subr.bf16.mxu1 %v3598_v37 }
 0xa74   :  { %v1501_v44 = vpop.f32.mrf.mxu1 }
 0xa75   :  { %v1502_v55 = vadd.f32 %v3094_v51, %v1501_v44 }
 0xa76   :  { %v3198_v12 = vpop.f32.mrf.mxu1 }
 0xa77   :  { %v1510_v7 = vmul.f32 0.044715, %v1502_v55  ;;  %v1508_v1 = vmul.f32 0.5, %v1502_v55 }
 0xa78   :  { %v1504_v40 = vpop.f32.mrf.mxu1 }
 0xa79   :  { %v1512_v28 = vmul.f32 %v1510_v7, %v1502_v55  ;;  %v1505_v5 = vadd.f32 %v3094_v51, %v1504_v40 }
 0xa7a   :  { %v3199_v11 = vpop.f32.mrf.mxu1 }
 0xa7b   :  { %v1514_v48 = vmul.f32 %v1512_v28, %v1502_v55  ;;  %v1511_v56 = vmul.f32 0.044715, %v1505_v5  ;;  %v1509_v30 = vmul.f32 0.5, %v1505_v5  ;;  %v3105_v28 = vld [vmem:[%s5135_s6 + $0xe] ss:$0 sm:$0xff] }
 0xa7d   :  { %v1516_v58 = vadd.f32 %v1514_v48, %v1502_v55  ;;  %v1513_v41 = vmul.f32 %v1511_v56, %v1505_v5  ;;  %v3104_v55 = vld [vmem:[%s5135_s6 + $0xd] ss:$0 sm:$0xff] }
 0xa7f   :  { %v1518_v31 = vmul.f32 0.7978846, %v1516_v58  ;;  %v1515_v6 = vmul.f32 %v1513_v41, %v1505_v5  ;;  %v3110_v58 = vld [vmem:[%s5135_s6 + $0xf] ss:$0 sm:$0xff] }
 0xa81   :  { %3509 = vtanh.f32 %v1518_v31  ;;  %v1517_v16 = vadd.f32 %v1515_v6, %v1505_v5 }
 0xa83   :  { %v1519_v54 = vmul.f32 0.7978846, %v1517_v16 }
 0xa85   :  { %3511 = vtanh.f32 %v1519_v54 }
 0xa8e   :  { %v3510_v32 = vpop.eup %3509 }
 0xa8f   :  { %v1522_v17 = vadd.f32 1.0, %v3510_v32 }
 0xa91   :  { %v1524_v49 = vmul.f32 %v1522_v17, %v1508_v1 }
 0xa92   :  { %v3512_v38 = vpop.eup %3511 }
 0xa93   :  { %v1523_v19 = vadd.f32 1.0, %v3512_v38 }
 0xa95   :  { %v1525_v25 = vmul.f32 %v1523_v19, %v1509_v30 }
 0xa97   :  { %v1526_v45 = vpack.c.bf16 %v1525_v25, %v1524_v49 }
 0xa99   :  { %3209 = vmatmul.mubr.msk.bf16.vlgmr.msra.gmra.mxu1 %vm141_vm0, %v1526_v45 }
 0xa9a   :  { %3216 = vmatprep.mubr.msk.bf16.mxu1 %vm3599_vm4, %v3598_v37  ;;  %3213 = vmatpush3.bf16.msra.mxu1 %v3443_v43 }
 0xa9b   :  { %3214 = vmatprep.subr.bf16.mxu1 %v3598_v37 }
 0xa9e   :  { %3215 = vmatpush3.bf16.msra.mxu1 %v3444_v20 }
 0xa9f   :  { %3220 = vmatprep.subr.bf16.mxu1 %v3598_v37 }
 0xb59   :  { %v1596_v47 = vpop.f32.mrf.mxu1 }
 0xb5a   :  { %v1603_v35 = vadd.f32 %v1596_v47, %v4380_v62 }
 0xb5b   :  { %v3210_v52 = vpop.f32.mrf.mxu1 }
 0xb5c   :  { %v4436_v22 = vadd.f32 %v3103_v23, %v1603_v35 }
 0xb5d   :  { %v1599_v26 = vpop.f32.mrf.mxu1 }
 0xb5e   :  { %v1604_v34 = vadd.f32 %v1599_v26, %v4385_v50  ;;  %v1619_v61 = vsel %vm194_vm2, %v4436_v22, 0.0 }
 0xb5f   :  { %1620 = vadd.xlane.f32.xlu0 %v1619_v61  ;;  %v3211_v46 = vpop.f32.mrf.mxu1 }
 0xb60   :  { %v4441_v18 = vadd.f32 %v3103_v23, %v1604_v34 }
 0xb62   :  { %v1622_v36 = vsel %vm198_vm3, %v4441_v18, 0.0 }
 0xb63   :  { %1623 = vadd.xlane.f32.xlu1 %v1622_v36 }
 0xbe8   :  { %v1621_v21 = vpop.xlane.xlu0 %1620 }
 0xbe9   :  { %v1625_v27 = vmul.f32 0.03125, %v1621_v21 }
 0xbeb   :  { %v1627_v62 = vsub.f32 %v4436_v22, %v1625_v27 }
 0xbec   :  { %v1624_v24 = vpop.xlane.xlu1 %1623 }
 0xbed   :  { %v1626_v0 = vmul.f32 0.03125, %v1624_v24  ;;  %v1629_v29 = vmul.f32 %v1627_v62, %v1627_v62 }
 0xbef   :  { %v1628_v50 = vsub.f32 %v4441_v18, %v1626_v0  ;;  %v1631_v9 = vsel %vm194_vm2, %v1629_v29, 0.0 }
 0xbf0   :  { %1632 = vadd.xlane.f32.xlu0 %v1631_v9 }
 0xbf1   :  { %v1630_v2 = vmul.f32 %v1628_v50, %v1628_v50 }
 0xbf3   :  { %v1634_v42 = vsel %vm198_vm3, %v1630_v2, 0.0 }
 0xbf4   :  { %1635 = vadd.xlane.f32.xlu1 %v1634_v42 }
 0xc79   :  { %v1633_v63 = vpop.xlane.xlu0 %1632 }
 0xc7a   :  { %v1637_v8 = vmul.f32 0.03125, %v1633_v63 }
 0xc7c   :  { %v1639_v39 = vadd.f32 1e-06, %v1637_v8 }
 0xc7d   :  { %v1636_v15 = vpop.xlane.xlu1 %1635 }
 0xc7e   :  { %3513 = vrsqrt.f32 %v1639_v39  ;;  %v1638_v53 = vmul.f32 0.03125, %v1636_v15 }
 0xc80   :  { %v1640_v33 = vadd.f32 1e-06, %v1638_v53 }
 0xc82   :  { %3515 = vrsqrt.f32 %v1640_v33 }
 0xc8b   :  { %v3514_v51 = vpop.eup %3513 }
 0xc8c   :  { %v1643_v44 = vmul.f32 %v3514_v51, %v1627_v62 }
 0xc8e   :  { %v1649_v40 = vmul.f32 %v3104_v55, %v1643_v44 }
 0xc8f   :  { %v3516_v12 = vpop.eup %3515 }
 0xc90   :  { %v1644_v7 = vmul.f32 %v3516_v12, %v1628_v50  ;;  %v1655_v11 = vadd.f32 %v3105_v28, %v1649_v40 }
 0xc92   :  { %v1650_v5 = vmul.f32 %v3104_v55, %v1644_v7 }
 0xc94   :  { %v1656_v48 = vadd.f32 %v3105_v28, %v1650_v5 }
 0xc96   :  { %v1657_v56 = vpack.c.bf16 %v1656_v48, %v1655_v11 }
 0xc98   :  { %3217 = vmatmul.mubr.msk.bf16.vlgmr.msra.gmra.mxu1 %vm194_vm2, %v1657_v56 }
 0xc99   :  { %3224 = vmatprep.mubr.msk.bf16.mxu1 %vm3599_vm4, %v3598_v37 }
 0xd58   :  { %v1716_v41 = vpop.f32.mrf.mxu1 }
 0xd59   :  { %v4469_v31 = vadd.f32 %v3110_v58, %v1716_v41 }
 0xd5a   :  { %v3218_v6 = vpop.f32.mrf.mxu1 }
 0xd5b   :  { %v4473_v16 = vrot.slane %v4469_v31, %v3751_v59  ;;  %v4477_v54 = vrot.slane %v4469_v31, %v3754_v60  ;;  %v4486_v38 = vrot.slane %v4469_v31, %v327_v4  ;;  %v4491_v1 = vrot.slane %v4469_v31, %v339_v10 }
 0xd5c   :  { %v1719_v32 = vpop.f32.mrf.mxu1  ;;  %v4500_v30 = vrot.slane %v4469_v31, %v351_v14  ;;  %v4505_v4 = vrot.slane %v4469_v31, %v665_v3  ;;  %v4516_v19 = vrot.slane %v4469_v31, %v699_v13  ;;  %v5150_v14 = vsub.s32 6, %v3745_v57 }
 0xd5d   :  { %1740 = vrot.lane.b32.xlu1 %v4473_v16, %s3600_s16  ;;  %1728 = vrot.lane.b32.xlu0 %v4477_v54, %s3600_s16  ;;  %v4511_v10 = vadd.f32 %v3110_v58, %v1719_v32 }
 0xd5e   :  { %v3219_v17 = vpop.f32.mrf.mxu1  ;;  %v4521_v49 = vrot.slane %v4469_v31, %v5150_v14 }
 0xd5f   :  { %v4529_v3 = vrot.slane %v4511_v10, %v3754_v60  ;;  %v4533_v25 = vrot.slane %v4511_v10, %v3751_v59 }
 0xd61   :  { %1752 = vrot.lane.b32.xlu1 %v4486_v38, %s3600_s16  ;;  %1764 = vrot.lane.b32.xlu0 %v4491_v1, %s3600_s16 }
 0xd65   :  { %1776 = vrot.lane.b32.xlu1 %v4500_v30, %s3600_s16  ;;  %2082 = vrot.lane.b32.xlu0 %v4505_v4, %s3600_s16 }
 0xd69   :  { %2114 = vrot.lane.b32.xlu1 %v4516_v19, %s3600_s16  ;;  %2098 = vrot.lane.b32.xlu0 %v4521_v49, %s3600_s16 }
 0xd6d   :  { %2146 = vrot.lane.b32.xlu1 %v4533_v25, %s3600_s16  ;;  %2130 = vrot.lane.b32.xlu0 %v4529_v3, %s3600_s16 }
 0xdcf   :  { %v1741_v57 = vpop.permute.xlu1 %1740  ;;  %v1729_v13 = vpop.permute.xlu0 %1728 }
 0xdd0   :  { %v1743_v45 = vmul.f32 %v1741_v57, %v4469_v31  ;;  %v1731_v23 = vmul.f32 %v1729_v13, %v4469_v31 }
 0xdd2   :  { %1829 = vrot.lane.b32.xlu1 %v1731_v23, %s3601_s17  ;;  %1836 = vrot.lane.b32.xlu0 %v1743_v45, %s3601_s17  ;;  %v1744_v29 = vsel %vm309_vm5, %v1743_v45, 0.0  ;;  %v1732_v20 = vsel %vm309_vm5, %v1731_v23, 0.0 }
 0xdd3   :  { %v1753_v60 = vpop.permute.xlu1 %1752  ;;  %v1765_v47 = vpop.permute.xlu0 %1764 }
 0xdd4   :  { %v1755_v59 = vmul.f32 %v1753_v60, %v4469_v31  ;;  %v1767_v35 = vmul.f32 %v1765_v47, %v4469_v31 }
 0xdd6   :  { %1843 = vrot.lane.b32.xlu1 %v1755_v59, %s3601_s17  ;;  %1850 = vrot.lane.b32.xlu0 %v1767_v35, %s3601_s17  ;;  %v1756_v39 = vsel %vm309_vm5, %v1755_v59, 0.0  ;;  %v1768_v15 = vsel %vm309_vm5, %v1767_v35, 0.0 }
 0xdd7   :  { %v1777_v52 = vpop.permute.xlu1 %1776  ;;  %v2083_v34 = vpop.permute.xlu0 %2082 }
 0xdd8   :  { %v1779_v26 = vmul.f32 %v1777_v52, %v4469_v31  ;;  %v2085_v21 = vmul.f32 %v2083_v34, %v4469_v31  ;;  %v2086_v62 = vmul.f32 %v2083_v34, %v4511_v10 }
 0xdda   :  { %1908 = vrot.lane.b32.xlu1 %v1731_v23, %s3603_s19  ;;  %1857 = vrot.lane.b32.xlu0 %v1779_v26, %s3601_s17  ;;  %v1780_v50 = vsel %vm309_vm5, %v1779_v26, 0.0  ;;  %v2090_v9 = vsel %vm677_vm7, %v2086_v62, 0.0  ;;  %v2087_v33 = vsel %vm673_vm6, %v2085_v21, 0.0 }
 0xddb   :  { %v2099_v61 = vpop.permute.xlu0 %2098  ;;  %v2115_v36 = vpop.permute.xlu1 %2114 }
 0xddc   :  { %v2101_v46 = vmul.f32 %v2099_v61, %v4469_v31  ;;  %v2117_v27 = vmul.f32 %v2115_v36, %v4469_v31  ;;  %v2102_v24 = vmul.f32 %v2099_v61, %v4511_v10  ;;  %v2118_v0 = vmul.f32 %v2115_v36, %v4511_v10 }
 0xdde   :  { %1920 = vrot.lane.b32.xlu1 %v1755_v59, %s3603_s19  ;;  %1914 = vrot.lane.b32.xlu0 %v1743_v45, %s3603_s19  ;;  %v2119_v2 = vsel %vm673_vm6, %v2117_v27, 0.0  ;;  %v2103_v44 = vsel %vm673_vm6, %v2101_v46, 0.0  ;;  %v2106_v12 = vsel %vm677_vm7, %v2102_v24, 0.0  ;;  %v2122_v40 = vsel %vm677_vm7, %v2118_v0, 0.0 }
 0xddf   :  { %v2131_v42 = vpop.permute.xlu0 %2130  ;;  %v2147_v63 = vpop.permute.xlu1 %2146 }
 0xde0   :  { %v4588_v43 = vmul.f32 %v2131_v42, %v4469_v31  ;;  %v2149_v8 = vmul.f32 %v2147_v63, %v4469_v31  ;;  %v4600_v53 = vmul.f32 %v2131_v42, %v4511_v10  ;;  %v4606_v51 = vmul.f32 %v2147_v63, %v4511_v10 }
 0xde2   :  { %1983 = vrot.lane.b32.xlu1 %v1731_v23, %s3602_s18  ;;  %1926 = vrot.lane.b32.xlu0 %v1767_v35, %s3603_s19  ;;  %v2151_v6 = vsel %vm673_vm6, %v2149_v8, 0.0  ;;  %v2135_v42 = vsel %vm673_vm6, %v4588_v43, 0.0 }
 0xde6   :  { %1989 = vrot.lane.b32.xlu1 %v1743_v45, %s3602_s18  ;;  %1932 = vrot.lane.b32.xlu0 %v1779_v26, %s3603_s19 }
 0xdea   :  { %2001 = vrot.lane.b32.xlu1 %v1767_v35, %s3602_s18  ;;  %1995 = vrot.lane.b32.xlu0 %v1755_v59, %s3602_s18 }
 0xdee   :  { %2007 = vrot.lane.b32.xlu1 %v1779_v26, %s3602_s18  ;;  %2263 = vrot.lane.b32.xlu0 %v2101_v46, %s3601_s17 }
 0xdf2   :  { %2249 = vrot.lane.b32.xlu1 %v2085_v21, %s3601_s17  ;;  %2277 = vrot.lane.b32.xlu0 %v2117_v27, %s3601_s17 }
 0xdf6   :  { %2431 = vrot.lane.b32.xlu0 %v2117_v27, %s3603_s19  ;;  %2251 = vrot.lane.b32.xlu1 %v2086_v62, %s3601_s17 }
 0xdfa   :  { %2569 = vrot.lane.b32.xlu0 %v2101_v46, %s3602_s18  ;;  %2265 = vrot.lane.b32.xlu1 %v2102_v24, %s3601_s17 }
 0xdfe   :  { %2571 = vrot.lane.b32.xlu0 %v2102_v24, %s3602_s18  ;;  %2279 = vrot.lane.b32.xlu1 %v2118_v0, %s3601_s17 }
 0xe02   :  { %2583 = vrot.lane.b32.xlu0 %v2118_v0, %s3602_s18  ;;  %2407 = vrot.lane.b32.xlu1 %v2085_v21, %s3603_s19 }
 0xe06   :  { %2419 = vrot.lane.b32.xlu1 %v2101_v46, %s3603_s19 }
 0xe0a   :  { %2409 = vrot.lane.b32.xlu1 %v2086_v62, %s3603_s19 }
 0xe0e   :  { %2421 = vrot.lane.b32.xlu1 %v2102_v24, %s3603_s19 }
 0xe12   :  { %2557 = vrot.lane.b32.xlu1 %v2085_v21, %s3602_s18 }
 0xe16   :  { %2433 = vrot.lane.b32.xlu1 %v2118_v0, %s3603_s19 }
 0xe1a   :  { %2559 = vrot.lane.b32.xlu1 %v2086_v62, %s3602_s18 }
 0xe1e   :  { %2581 = vrot.lane.b32.xlu1 %v2117_v27, %s3602_s18 }
 0xe21   :  { %1745 = vadd.xlane.f32.xlu0 %v1744_v29 }
 0xe25   :  { %1781 = vadd.xlane.f32.xlu0 %v1780_v50 }
 0xe29   :  { %2091 = vadd.xlane.f32.xlu0 %v2090_v9 }
 0xe2d   :  { %2120 = vadd.xlane.f32.xlu0 %v2119_v2 }
 0xe42   :  { %1733 = vadd.xlane.f32.xlu1 %v1732_v20 }
 0xe43   :  { %2291 = vrot.lane.b32.xlu0 %v4588_v43, %s3601_s17 }
 0xe44   :  { %v4609_v55 = vpop.permute.xlu1 %1829  ;;  %v1837_v28 = vpop.permute.xlu0 %1836 }
 0xe45   :  { %v1839_v10 = vsel %vm309_vm5, %v1837_v28, 0.0 }
 0xe46   :  { %1757 = vadd.xlane.f32.xlu1 %v1756_v39  ;;  %v2138_v39 = vsel %vm677_vm7, %v4600_v53, 0.0 }
 0xe47   :  { %2305 = vrot.lane.b32.xlu0 %v2149_v8, %s3601_s17 }
 0xe48   :  { %v1844_v7 = vpop.permute.xlu1 %1843  ;;  %v4618_v11 = vpop.permute.xlu0 %1850 }
 0xe49   :  { %v1846_v13 = vsel %vm309_vm5, %v1844_v7, 0.0  ;;  %v1832_v7 = vsel %vm309_vm5, %v4609_v55, 0.0 }
 0xe4a   :  { %1769 = vadd.xlane.f32.xlu1 %v1768_v15 }
 0xe4b   :  { %2443 = vrot.lane.b32.xlu0 %v4588_v43, %s3603_s19 }
 0xe4c   :  { %v4616_v5 = vpop.permute.xlu1 %1908  ;;  %v1858_v56 = vpop.permute.xlu0 %1857 }
 0xe4d   :  { %v1860_v45 = vsel %vm309_vm5, %v1858_v56, 0.0  ;;  %v1911_v55 = vsel %vm309_vm5, %v4616_v5, 0.0 }
 0xe4e   :  { %2088 = vadd.xlane.f32.xlu1 %v2087_v33 }
 0xe4f   :  { %2445 = vrot.lane.b32.xlu0 %v4600_v53, %s3603_s19 }
 0xe50   :  { %v1921_v48 = vpop.permute.xlu1 %1920  ;;  %v1915_v41 = vpop.permute.xlu0 %1914 }
 0xe51   :  { %v1917_v47 = vsel %vm309_vm5, %v1915_v41, 0.0  ;;  %v1923_v52 = vsel %vm309_vm5, %v1921_v48, 0.0  ;;  %v1853_v48 = vsel %vm309_vm5, %v4618_v11, 0.0 }
 0xe52   :  { %2104 = vadd.xlane.f32.xlu1 %v2103_v44  ;;  %v2154_v44 = vsel %vm677_vm7, %v4606_v51, 0.0 }
 0xe53   :  { %2457 = vrot.lane.b32.xlu0 %v4606_v51, %s3603_s19 }
 0xe54   :  { %v1984_v58 = vpop.permute.xlu1 %1983  ;;  %v4628_v32 = vpop.permute.xlu0 %1926 }
 0xe55   :  { %v1986_v46 = vsel %vm309_vm5, %v1984_v58, 0.0 }
 0xe56   :  { %2107 = vadd.xlane.f32.xlu1 %v2106_v12 }
 0xe57   :  { %2605 = vrot.lane.b32.xlu0 %v2149_v8, %s3602_s18 }
 0xe58   :  { %v4624_v31 = vpop.permute.xlu1 %1989  ;;  %v1933_v14 = vpop.permute.xlu0 %1932 }
 0xe59   :  { %v1935_v26 = vsel %vm309_vm5, %v1933_v14, 0.0 }
 0xe5a   :  { %2123 = vadd.xlane.f32.xlu1 %v2122_v40 }
 0xe5c   :  { %v2002_v17 = vpop.permute.xlu1 %2001  ;;  %v4641_v23 = vpop.permute.xlu0 %1995 }
 0xe5d   :  { %v2004_v27 = vsel %vm309_vm5, %v2002_v17, 0.0  ;;  %v1929_v17 = vsel %vm309_vm5, %v4628_v32, 0.0 }
 0xe60   :  { %v4635_v57 = vpop.permute.xlu1 %2007  ;;  %v2264_v59 = vpop.permute.xlu0 %2263 }
 0xe61   :  { %v2269_v29 = vsel %vm673_vm6, %v2264_v59, 0.0 }
 0xe64   :  { %v2250_v60 = vpop.permute.xlu1 %2249  ;;  %v2278_v34 = vpop.permute.xlu0 %2277 }
 0xe65   :  { %v2255_v62 = vsel %vm673_vm6, %v2250_v60, 0.0  ;;  %v2283_v2 = vsel %vm673_vm6, %v2278_v34, 0.0 }
 0xe68   :  { %v4644_v35 = vpop.permute.xlu1 %2251  ;;  %v2432_v36 = vpop.permute.xlu0 %2431 }
 0xe6b   :  { %2293 = vrot.lane.b32.xlu1 %v4600_v53, %s3601_s17 }
 0xe6c   :  { %v4648_v61 = vpop.permute.xlu1 %2265  ;;  %v2570_v24 = vpop.permute.xlu0 %2569 }
 0xe6f   :  { %2307 = vrot.lane.b32.xlu1 %v4606_v51, %s3601_s17  ;;  %s3609_s17 = smov [#allocation2]  }
 0xe70   :  { %v4651_v21 = vpop.permute.xlu1 %2279  ;;  %v2572_v50 = vpop.permute.xlu0 %2571 }
 0xe71   :  { %v2578_v56 = vsel %vm677_vm7, %v2572_v50, 0.0 }
 0xe73   :  { %2455 = vrot.lane.b32.xlu1 %v2149_v8, %s3603_s19 }
 0xe74   :  { %v4655_v0 = vpop.permute.xlu1 %2407  ;;  %v2584_v63 = vpop.permute.xlu0 %2583 }
 0xe75   :  { %v2590_v41 = vsel %vm677_vm7, %v2584_v63, 0.0 }
 0xe76   :  { %2152 = vadd.xlane.f32.xlu0 %v2151_v6 }
 0xe77   :  { %2593 = vrot.lane.b32.xlu1 %v4588_v43, %s3602_s18  ;;  %v2437_v43 = vsel %vm673_vm6, %v2432_v36, 0.0 }
 0xe78   :  { %v2420_v9 = vpop.permute.xlu1 %2419 }
 0xe79   :  { %v2425_v20 = vsel %vm673_vm6, %v2420_v9, 0.0 }
 0xe7a   :  { %1840 = vadd.xlane.f32.xlu0 %v1839_v10 }
 0xe7b   :  { %2595 = vrot.lane.b32.xlu1 %v4600_v53, %s3602_s18  ;;  %v2575_v53 = vsel %vm673_vm6, %v2570_v24, 0.0 }
 0xe7c   :  { %v2410_v8 = vpop.permute.xlu1 %2409 }
 0xe7d   :  { %v2416_v15 = vsel %vm677_vm7, %v2410_v8, 0.0 }
 0xe7e   :  { %1847 = vadd.xlane.f32.xlu0 %v1846_v13  ;;  %v1992_v13 = vsel %vm309_vm5, %v4624_v31, 0.0 }
 0xe7f   :  { %2607 = vrot.lane.b32.xlu1 %v4606_v51, %s3602_s18  ;;  %s3059_s18 = sshll.u32 %s3609_s17, 4  ;;  %s3060_s18 = int_to_ptr.vmem [resolvable:$true] %s3059_s18 }
 0xe80   :  { %v2422_v40 = vpop.permute.xlu1 %2421  ;;  %s3575_s19 = scalar_lea.vmem %s3060_s18, 32  ;;  %p3580_p1 = scmp.lt.s32.totalorder %s3060_s18, %s3060_s18 }
 0xe81   :  { %p3576_p0 = scmp.ne.s32.totalorder %s3060_s18, %s3575_s19  ;;  %p3581_p2 = scmp.lt.s32.totalorder %s3575_s19, %s3575_s19 }
 0xe82   :  { %1861 = vadd.xlane.f32.xlu0 %v1860_v45 }
 0xe83   :  { %p3582_p3 = por %p3581_p2, %p3580_p1 }
 0xe84   :  { %v2558_v51 = vpop.permute.xlu1 %2557 }
 0xe85   :  { %p3583_p4 = pnand %p3582_p3, %p3576_p0 }
 0xe86   :  { %1918 = vadd.xlane.f32.xlu0 %v1917_v47  ;;  %v1998_v47 = vsel %vm309_vm5, %v4641_v23, 0.0 }
 0xe88   :  { %v2434_v10 = vpop.permute.xlu1 %2433 }
 0xe89   :  { %v2440_v63 = vsel %vm677_vm7, %v2434_v10, 0.0 }
 0xe8a   :  { %1924 = vadd.xlane.f32.xlu0 %v1923_v52  ;;  %v2010_v52 = vsel %vm309_vm5, %v4635_v57, 0.0  ;;  %vm5151_vm5 = vcmask 39941  }
 0xe8c   :  { %v2560_v45 = vpop.permute.xlu1 %2559 }
 0xe8e   :  { %1936 = vadd.xlane.f32.xlu0 %v1935_v26 }
 0xe90   :  { %v2582_v26 = vpop.permute.xlu1 %2581 }
 0xe92   :  { %1987 = vadd.xlane.f32.xlu0 %v1986_v46  ;;  %v2258_v46 = vsel %vm677_vm7, %v4644_v35, 0.0  ;;  %v2413_v35 = vsel %vm673_vm6, %v4655_v0, 0.0  ;;  %v2587_v0 = vsel %vm673_vm6, %v2582_v26, 0.0 }
 0xe96   :  { %2005 = vadd.xlane.f32.xlu0 %v2004_v27 }
 0xe9a   :  { %2256 = vadd.xlane.f32.xlu0 %v2255_v62  ;;  %v2272_v62 = vsel %vm677_vm7, %v4648_v61, 0.0  ;;  %v2563_v61 = vsel %vm673_vm6, %v2558_v51, 0.0 }
 0xe9e   :  { %2270 = vadd.xlane.f32.xlu0 %v2269_v29  ;;  %v2286_v29 = vsel %vm677_vm7, %v4651_v21, 0.0  ;;  %v2566_v21 = vsel %vm677_vm7, %v2560_v45, 0.0 }
 0xea2   :  { %2284 = vadd.xlane.f32.xlu0 %v2283_v2  ;;  %v2428_v2 = vsel %vm677_vm7, %v2422_v40, 0.0 }
 0xea3   :  { %2136 = vadd.xlane.f32.xlu1 %v2135_v42 }
 0xea6   :  { %2426 = vadd.xlane.f32.xlu0 %v2425_v20 }
 0xea7   :  { %2139 = vadd.xlane.f32.xlu1 %v2138_v39 }
 0xeaa   :  { %v4665_v33 = vpop.xlane.xlu0 %1745  ;;  %2417 = vadd.xlane.f32.xlu0 %v2416_v15 }
 0xeab   :  { %2155 = vadd.xlane.f32.xlu1 %v2154_v44 }
 0xeae   :  { %v4670_v12 = vpop.xlane.xlu0 %1781  ;;  %2438 = vadd.xlane.f32.xlu0 %v2437_v43 }
 0xeaf   :  { %1833 = vadd.xlane.f32.xlu1 %v1832_v7 }
 0xeb2   :  { %2576 = vadd.xlane.f32.xlu0 %v2575_v53  ;;  %v4675_v28 = vpop.xlane.xlu0 %2091 }
 0xeb3   :  { %1854 = vadd.xlane.f32.xlu1 %v1853_v48 }
 0xeb6   :  { %2579 = vadd.xlane.f32.xlu0 %v2578_v56  ;;  %v4680_v58 = vpop.xlane.xlu0 %2120 }
 0xeb7   :  { %1912 = vadd.xlane.f32.xlu1 %v1911_v55 }
 0xeba   :  { %2591 = vadd.xlane.f32.xlu0 %v2590_v41  ;;  %v2292_v6 = vpop.permute.xlu0 %2291 }
 0xebb   :  { %1930 = vadd.xlane.f32.xlu1 %v1929_v17  ;;  %v2297_v11 = vsel %vm673_vm6, %v2292_v6, 0.0 }
 0xebe   :  { %2298 = vadd.xlane.f32.xlu0 %v2297_v11  ;;  %v2306_v14 = vpop.permute.xlu0 %2305 }
 0xebf   :  { %1993 = vadd.xlane.f32.xlu1 %v1992_v13  ;;  %v2311_v5 = vsel %vm673_vm6, %v2306_v14, 0.0 }
 0xec2   :  { %2312 = vadd.xlane.f32.xlu0 %v2311_v5  ;;  %v2444_v60 = vpop.permute.xlu0 %2443 }
 0xec3   :  { %1999 = vadd.xlane.f32.xlu1 %v1998_v47  ;;  %v2449_v32 = vsel %vm673_vm6, %v2444_v60, 0.0 }
 0xec6   :  { %2450 = vadd.xlane.f32.xlu0 %v2449_v32  ;;  %v2446_v59 = vpop.permute.xlu0 %2445 }
 0xec7   :  { %2011 = vadd.xlane.f32.xlu1 %v2010_v52  ;;  %v2452_v31 = vsel %vm677_vm7, %v2446_v59, 0.0 }
 0xeca   :  { %2453 = vadd.xlane.f32.xlu0 %v2452_v31  ;;  %v2458_v34 = vpop.permute.xlu0 %2457 }
 0xecb   :  { %2259 = vadd.xlane.f32.xlu1 %v2258_v46  ;;  %v1734_v36 = vpop.xlane.xlu1 %1733  ;;  %v2464_v23 = vsel %vm677_vm7, %v2458_v34, 0.0 }
 0xecc   :  { %v1783_v56 = vsel %vm361_vm8, %v1734_v36, %v4665_v33 }
 0xece   :  { %2465 = vadd.xlane.f32.xlu0 %v2464_v23  ;;  %v2606_v27 = vpop.permute.xlu0 %2605 }
 0xecf   :  { %2273 = vadd.xlane.f32.xlu1 %v2272_v62  ;;  %v1758_v57 = vpop.xlane.xlu1 %1757  ;;  %v2611_v24 = vsel %vm673_vm6, %v2606_v27, 0.0 }
 0xed0   :  { %v1784_v41 = vsel %vm363_vm9, %v1783_v56, %v1758_v57 }
 0xed2   :  { %2612 = vadd.xlane.f32.xlu0 %v2611_v24 }
 0xed3   :  { %2287 = vadd.xlane.f32.xlu1 %v2286_v29  ;;  %v1770_v50 = vpop.xlane.xlu1 %1769 }
 0xed4   :  { %v1785_v10 = vsel %vm365_vm10, %v1784_v41, %v1770_v50 }
 0xed5   :  { %v4724_v13 = vsel %vm367_vm11, %v1785_v10, %v4670_v12 }
 0xed6   :  { %v1787_v33 = vsel %vm369_vm12, %v4724_v13, -inf }
 0xed7   :  { %2414 = vadd.xlane.f32.xlu1 %v2413_v35  ;;  %v2089_v9 = vpop.xlane.xlu1 %2088 }
 0xedb   :  { %2429 = vadd.xlane.f32.xlu1 %v2428_v2  ;;  %v2105_v42 = vpop.xlane.xlu1 %2104 }
 0xedc   :  { %v2157_v34 = vsel %vm361_vm8, %v2089_v9, %v2105_v42 }
 0xedd   :  { %v2159_v12 = vsel %vm363_vm9, %v2157_v34, %v4680_v58 }
 0xedf   :  { %2564 = vadd.xlane.f32.xlu1 %v2563_v61  ;;  %v2108_v20 = vpop.xlane.xlu1 %2107 }
 0xee0   :  { %v2158_v29 = vsel %vm361_vm8, %v4675_v28, %v2108_v20 }
 0xee3   :  { %2441 = vadd.xlane.f32.xlu1 %v2440_v63  ;;  %v2124_v8 = vpop.xlane.xlu1 %2123 }
 0xee4   :  { %v2160_v50 = vsel %vm363_vm9, %v2158_v29, %v2124_v8 }
 0xee7   :  { %2567 = vadd.xlane.f32.xlu1 %v2566_v21  ;;  %v2294_v39 = vpop.permute.xlu1 %2293 }
 0xee8   :  { %v2300_v44 = vsel %vm677_vm7, %v2294_v39, 0.0 }
 0xeeb   :  { %2588 = vadd.xlane.f32.xlu1 %v2587_v0  ;;  %v2308_v15 = vpop.permute.xlu1 %2307 }
 0xeec   :  { %v2314_v7 = vsel %vm677_vm7, %v2308_v15, 0.0 }
 0xeef   :  { %2301 = vadd.xlane.f32.xlu1 %v2300_v44  ;;  %v2456_v43 = vpop.permute.xlu1 %2455 }
 0xef0   :  { %v2461_v53 = vsel %vm673_vm6, %v2456_v43, 0.0 }
 0xef3   :  { %2315 = vadd.xlane.f32.xlu1 %v2314_v7  ;;  %v2594_v40 = vpop.permute.xlu1 %2593 }
 0xef4   :  { %v2599_v51 = vsel %vm673_vm6, %v2594_v40, 0.0  ;;  %vm5152_vm6 = vcmask 33792  }
 0xef7   :  { %2462 = vadd.xlane.f32.xlu1 %v2461_v53  ;;  %v2596_v48 = vpop.permute.xlu1 %2595 }
 0xef8   :  { %v2602_v55 = vsel %vm677_vm7, %v2596_v48, 0.0 }
 0xefb   :  { %2600 = vadd.xlane.f32.xlu1 %v2599_v51  ;;  %v2608_v6 = vpop.permute.xlu1 %2607 }
 0xefc   :  { %v2614_v11 = vsel %vm677_vm7, %v2608_v6, 0.0  ;;  %vm5153_vm7 = vmmov %vm5151_vm5 }
 0xeff   :  { %2603 = vadd.xlane.f32.xlu1 %v2602_v55  ;;  %v2153_v17 = vpop.xlane.xlu0 %2152 }
 0xf03   :  { %2615 = vadd.xlane.f32.xlu1 %v2614_v11  ;;  %v1841_v14 = vpop.xlane.xlu0 %1840 }
 0xf07   :  { %1788 = vmax.xlane.f32.xlu1 %v1787_v33  ;;  %v1848_v45 = vpop.xlane.xlu0 %1847 }
 0xf0b   :  { %v1862_v5 = vpop.xlane.xlu0 %1861 }
 0xf0f   :  { %v1919_v60 = vpop.xlane.xlu0 %1918 }
 0xf13   :  { %v1925_v47 = vpop.xlane.xlu0 %1924 }
 0xf17   :  { %v1937_v32 = vpop.xlane.xlu0 %1936 }
 0xf1b   :  { %v1988_v59 = vpop.xlane.xlu0 %1987 }
 0xf1f   :  { %v2006_v52 = vpop.xlane.xlu0 %2005 }
 0xf23   :  { %v2257_v26 = vpop.xlane.xlu0 %2256 }
 0xf27   :  { %v2271_v31 = vpop.xlane.xlu0 %2270 }
 0xf2b   :  { %v2285_v46 = vpop.xlane.xlu0 %2284 }
 0xf2c   :  { %v2137_v36 = vpop.xlane.xlu1 %2136 }
 0xf2d   :  { %v2161_v23 = vsel %vm365_vm10, %v2159_v12, %v2137_v36 }
 0xf2e   :  { %v4733_v27 = vsel %vm367_vm11, %v2161_v23, %v2153_v17 }
 0xf2f   :  { %v4735_v62 = vpop.xlane.xlu0 %2426  ;;  %v2165_v57 = vsel %vm5151_vm5, %v4733_v27, -inf  ;;  %vm5154_vm5 = vmmov %vm5152_vm6 }
 0xf30   :  { %v2140_v24 = vpop.xlane.xlu1 %2139  ;;  %2166 = vmax.xlane.f32.xlu0 %v2165_v57 }
 0xf31   :  { %v2162_v58 = vsel %vm365_vm10, %v2160_v50, %v2140_v24 }
 0xf33   :  { %v2418_v35 = vpop.xlane.xlu0 %2417 }
 0xf34   :  { %v2156_v9 = vpop.xlane.xlu1 %2155 }
 0xf35   :  { %v4744_v2 = vsel %vm367_vm11, %v2162_v58, %v2156_v9 }
 0xf36   :  { %v2168_v42 = vsel %vm5152_vm6, %v4744_v2, -inf  ;;  %vm5155_vm6 = vmmov %vm5154_vm5 }
 0xf37   :  { %2169 = vmax.xlane.f32.xlu0 %v2168_v42  ;;  %v2439_v61 = vpop.xlane.xlu0 %2438 }
 0xf38   :  { %v1834_v63 = vpop.xlane.xlu1 %1833 }
 0xf39   :  { %v1863_v21 = vsel %vm361_vm8, %v1834_v63, %v1841_v14  ;;  %v2317_v14 = vsel %vm361_vm8, %v2257_v26, %v2271_v31 }
 0xf3a   :  { %v1864_v20 = vsel %vm363_vm9, %v1863_v21, %v1848_v45 }
 0xf3b   :  { %v4749_v39 = vpop.xlane.xlu0 %2576 }
 0xf3c   :  { %v1855_v28 = vpop.xlane.xlu1 %1854 }
 0xf3d   :  { %v1865_v8 = vsel %vm365_vm10, %v1864_v20, %v1855_v28 }
 0xf3e   :  { %v4754_v0 = vsel %vm367_vm11, %v1865_v8, %v1862_v5 }
 0xf3f   :  { %v4756_v15 = vpop.xlane.xlu0 %2579  ;;  %v1867_v44 = vsel %vm369_vm12, %v4754_v0, -inf }
 0xf40   :  { %v1913_v43 = vpop.xlane.xlu1 %1912  ;;  %1868 = vmax.xlane.f32.xlu1 %v1867_v44 }
 0xf41   :  { %v1938_v7 = vsel %vm361_vm8, %v1913_v43, %v1919_v60  ;;  %v2319_v60 = vsel %vm363_vm9, %v2317_v14, %v2285_v46 }
 0xf42   :  { %v1939_v48 = vsel %vm363_vm9, %v1938_v7, %v1925_v47 }
 0xf43   :  { %v4761_v40 = vpop.xlane.xlu0 %2591 }
 0xf44   :  { %v1931_v53 = vpop.xlane.xlu1 %1930 }
 0xf45   :  { %v1940_v51 = vsel %vm365_vm10, %v1939_v48, %v1931_v53 }
 0xf46   :  { %v4766_v56 = vsel %vm367_vm11, %v1940_v51, %v1937_v32 }
 0xf47   :  { %v1942_v55 = vsel %vm369_vm12, %v4766_v56, -inf  ;;  %v2299_v6 = vpop.xlane.xlu0 %2298 }
 0xf48   :  { %v1994_v41 = vpop.xlane.xlu1 %1993  ;;  %1943 = vmax.xlane.f32.xlu1 %v1942_v55  ;;  %v2321_v32 = vsel %vm365_vm10, %v2319_v60, %v2299_v6 }
 0xf49   :  { %v2013_v17 = vsel %vm361_vm8, %v1988_v59, %v1994_v41 }
 0xf4b   :  { %v2313_v33 = vpop.xlane.xlu0 %2312 }
 0xf4c   :  { %v2000_v10 = vpop.xlane.xlu1 %1999  ;;  %v4782_v59 = vsel %vm367_vm11, %v2321_v32, %v2313_v33 }
 0xf4d   :  { %v2014_v11 = vsel %vm363_vm9, %v2013_v17, %v2000_v10  ;;  %v2325_v26 = vsel %vm5153_vm7, %v4782_v59, -inf }
 0xf4e   :  { %v2015_v5 = vsel %vm365_vm10, %v2014_v11, %v2006_v52 }
 0xf4f   :  { %v2451_v12 = vpop.xlane.xlu0 %2450 }
 0xf50   :  { %v2012_v45 = vpop.xlane.xlu1 %2011 }
 0xf51   :  { %v4776_v47 = vsel %vm367_vm11, %v2015_v5, %v2012_v45 }
 0xf52   :  { %v2017_v34 = vsel %vm369_vm12, %v4776_v47, -inf }
 0xf53   :  { %2018 = vmax.xlane.f32.xlu0 %v2017_v34  ;;  %v2454_v57 = vpop.xlane.xlu0 %2453 }
 0xf54   :  { %v2260_v36 = vpop.xlane.xlu1 %2259 }
 0xf57   :  { %2326 = vmax.xlane.f32.xlu0 %v2325_v26  ;;  %v2466_v9 = vpop.xlane.xlu0 %2465 }
 0xf58   :  { %v2274_v52 = vpop.xlane.xlu1 %2273 }
 0xf59   :  { %v2318_v44 = vsel %vm361_vm8, %v2260_v36, %v2274_v52 }
 0xf5b   :  { %v2613_v14 = vpop.xlane.xlu0 %2612 }
 0xf5c   :  { %v2288_v31 = vpop.xlane.xlu1 %2287 }
 0xf5d   :  { %v2320_v43 = vsel %vm363_vm9, %v2318_v44, %v2288_v31 }
 0xf60   :  { %v2415_v46 = vpop.xlane.xlu1 %2414 }
 0xf64   :  { %v2430_v23 = vpop.xlane.xlu1 %2429 }
 0xf65   :  { %v2468_v29 = vsel %vm361_vm8, %v2418_v35, %v2430_v23  ;;  %v2467_v35 = vsel %vm361_vm8, %v2415_v46, %v4735_v62 }
 0xf66   :  { %v2469_v48 = vsel %vm363_vm9, %v2467_v35, %v2439_v61 }
 0xf67   :  { %v2471_v6 = vsel %vm365_vm10, %v2469_v48, %v2451_v12 }
 0xf68   :  { %v2565_v24 = vpop.xlane.xlu1 %2564 }
 0xf69   :  { %v2617_v10 = vsel %vm361_vm8, %v2565_v24, %v4749_v39 }
 0xf6c   :  { %v2442_v50 = vpop.xlane.xlu1 %2441 }
 0xf6d   :  { %v2470_v58 = vsel %vm363_vm9, %v2468_v29, %v2442_v50 }
 0xf6e   :  { %v2472_v42 = vsel %vm365_vm10, %v2470_v58, %v2454_v57 }
 0xf6f   :  { %v4790_v63 = vsel %vm367_vm11, %v2472_v42, %v2466_v9 }
 0xf70   :  { %v2568_v21 = vpop.xlane.xlu1 %2567  ;;  %v2478_v28 = vsel %vm5154_vm5, %v4790_v63, -inf  ;;  %vm5156_vm5 = vmmov %vm5153_vm7 }
 0xf71   :  { %2479 = vmax.xlane.f32.xlu1 %v2478_v28  ;;  %v2618_v60 = vsel %vm361_vm8, %v2568_v21, %v4756_v15  ;;  %vm5157_vm8 = vmmov %vm5156_vm5 }
 0xf72   :  { %v2620_v39 = vsel %vm363_vm9, %v2618_v60, %v4761_v40 }
 0xf74   :  { %v2589_v20 = vpop.xlane.xlu1 %2588 }
 0xf75   :  { %v2619_v61 = vsel %vm363_vm9, %v2617_v10, %v2589_v20  ;;  %vm5158_vm9 = vmmov %vm5155_vm6 }
 0xf78   :  { %v2302_v8 = vpop.xlane.xlu1 %2301 }
 0xf79   :  { %v2322_v7 = vsel %vm365_vm10, %v2320_v43, %v2302_v8 }
 0xf7c   :  { %v2316_v53 = vpop.xlane.xlu1 %2315 }
 0xf7d   :  { %v4801_v51 = vsel %vm367_vm11, %v2322_v7, %v2316_v53 }
 0xf7e   :  { %v2328_v55 = vsel %vm5155_vm6, %v4801_v51, -inf }
 0xf7f   :  { %2329 = vmax.xlane.f32.xlu0 %v2328_v55 }
 0xf80   :  { %v2463_v41 = vpop.xlane.xlu1 %2462 }
 0xf81   :  { %v4807_v17 = vsel %vm367_vm11, %v2471_v6, %v2463_v41 }
 0xf82   :  { %v2475_v62 = vsel %vm5153_vm7, %v4807_v17, -inf  ;;  %vm5162_vm7 = vmmov %vm5156_vm5 }
 0xf83   :  { %2476 = vmax.xlane.f32.xlu0 %v2475_v62 }
 0xf84   :  { %v2601_v11 = vpop.xlane.xlu1 %2600 }
 0xf85   :  { %v2621_v33 = vsel %vm365_vm10, %v2619_v61, %v2601_v11 }
 0xf86   :  { %v4816_v45 = vsel %vm367_vm11, %v2621_v33, %v2613_v14 }
 0xf87   :  { %v2625_v5 = vsel %vm5156_vm5, %v4816_v45, -inf }
 0xf88   :  { %v2604_v32 = vpop.xlane.xlu1 %2603  ;;  %2626 = vmax.xlane.f32.xlu1 %v2625_v5 }
 0xf89   :  { %v2622_v34 = vsel %vm365_vm10, %v2620_v39, %v2604_v32  ;;  %vm5159_vm10 = vmmov %vm5156_vm5 }
 0xf8c   :  { %v2616_v36 = vpop.xlane.xlu1 %2615 }
 0xf8d   :  { %v4826_v26 = vsel %vm367_vm11, %v2622_v34, %v2616_v36  ;;  %vm5160_vm11 = vmmov %vm5155_vm6 }
 0xf8e   :  { %v2628_v52 = vsel %vm5155_vm6, %v4826_v26, -inf }
 0xf8f   :  { %2629 = vmax.xlane.f32.xlu1 %v2628_v52 }
 0xf90   :  { %v1789_v31 = vpop.xlane.xlu1 %1788 }
 0xf91   :  { %v1790_v46 = vsub.f32 %v4724_v13, %v1789_v31 }
 0xf93   :  { %v1791_v12 = vmul.f32 1.442695, %v1790_v46 }
 0xf95   :  { %3517 = vpow2.f32 %v1791_v12 }
 0xfa2   :  { %v4831_v15 = vpop.eup %3517 }
 0xfa3   :  { %v1793_v40 = vsel %vm369_vm12, %v4831_v15, 0.0 }
 0xfa4   :  { %1794 = vadd.xlane.f32.xlu0 %v1793_v40 }
 0xfb9   :  { %v2167_v23 = vpop.xlane.xlu0 %2166 }
 0xfba   :  { %v2171_v57 = vsub.f32 %v4733_v27, %v2167_v23 }
 0xfbc   :  { %v2173_v24 = vmul.f32 1.442695, %v2171_v57 }
 0xfbe   :  { %3519 = vpow2.f32 %v2173_v24 }
 0xfc0   :  { %v2170_v29 = vpop.xlane.xlu0 %2169 }
 0xfc1   :  { %v2172_v50 = vsub.f32 %v4744_v2, %v2170_v29 }
 0xfc3   :  { %v2175_v58 = vmul.f32 1.442695, %v2172_v50 }
 0xfc5   :  { %3521 = vpow2.f32 %v2175_v58 }
 0xfc9   :  { %v1869_v9 = vpop.xlane.xlu1 %1868 }
 0xfca   :  { %v1870_v13 = vsub.f32 %v4754_v0, %v1869_v9 }
 0xfcb   :  { %v4838_v42 = vpop.eup %3519 }
 0xfcc   :  { %v1871_v21 = vmul.f32 1.442695, %v1870_v13  ;;  %v2177_v28 = vsel %vm5157_vm8, %v4838_v42, 0.0 }
 0xfcd   :  { %2178 = vadd.xlane.f32.xlu0 %v2177_v28  ;;  %v5164_v28 = vmov 3  }
 0xfce   :  { %3523 = vpow2.f32 %v1871_v21  ;;  %v5163_v21 = vmov 2  }
 0xfd1   :  { %v1944_v20 = vpop.xlane.xlu1 %1943 }
 0xfd2   :  { %v4842_v27 = vpop.eup %3521  ;;  %v1945_v8 = vsub.f32 %v4766_v56, %v1944_v20  ;;  %v5165_v20 = vmov 4  }
 0xfd3   :  { %v2180_v2 = vsel %vm5158_vm9, %v4842_v27, 0.0 }
 0xfd4   :  { %v1946_v44 = vmul.f32 1.442695, %v1945_v8  ;;  %2181 = vadd.xlane.f32.xlu0 %v2180_v2  ;;  %v5166_v8 = vmov 0  }
 0xfd6   :  { %3525 = vpow2.f32 %v1946_v44 }
 0xfdb   :  { %v4847_v0 = vpop.eup %3523 }
 0xfdc   :  { %v2019_v35 = vpop.xlane.xlu0 %2018  ;;  %v1873_v43 = vsel %vm369_vm12, %v4847_v0, 0.0 }
 0xfdd   :  { %v2020_v7 = vsub.f32 %v4776_v47, %v2019_v35  ;;  %1874 = vadd.xlane.f32.xlu1 %v1873_v43 }
 0xfdf   :  { %v2021_v53 = vmul.f32 1.442695, %v2020_v7 }
 0xfe0   :  { %v2327_v48 = vpop.xlane.xlu0 %2326 }
 0xfe1   :  { %3527 = vpow2.f32 %v2021_v53  ;;  %v2331_v56 = vsub.f32 %v4782_v59, %v2327_v48  ;;  %v5167_v53 = vmov 1  }
 0xfe3   :  { %v4853_v55 = vpop.eup %3525  ;;  %v2333_v41 = vmul.f32 1.442695, %v2331_v56 }
 0xfe4   :  { %v1948_v6 = vsel %vm369_vm12, %v4853_v55, 0.0 }
 0xfe5   :  { %3529 = vpow2.f32 %v2333_v41  ;;  %1949 = vadd.xlane.f32.xlu1 %v1948_v6 }
 0xfee   :  { %v4857_v62 = vpop.eup %3527 }
 0xfef   :  { %v2023_v10 = vsel %vm369_vm12, %v4857_v62, 0.0  ;;  %vm5161_vm12 = vmmov %vm5155_vm6 }
 0xff0   :  { %2024 = vadd.xlane.f32.xlu0 %v2023_v10 }
 0xff2   :  { %v4861_v47 = vpop.eup %3529 }
 0xff3   :  { %v2337_v61 = vsel %vm5159_vm10, %v4861_v47, 0.0 }
 0xff4   :  { %2338 = vadd.xlane.f32.xlu1 %v2337_v61 }
 0xffa   :  { %v2480_v59 = vpop.xlane.xlu1 %2479 }
 0xffb   :  { %v2482_v11 = vsub.f32 %v4790_v63, %v2480_v59 }
 0xffd   :  { %v2485_v14 = vmul.f32 1.442695, %v2482_v11 }
 0xfff   :  { %3531 = vpow2.f32 %v2485_v14 }
0x1008   :  { %v2330_v33 = vpop.xlane.xlu0 %2329 }
0x1009   :  { %v2332_v5 = vsub.f32 %v4801_v51, %v2330_v33 }
0x100b   :  { %v2335_v60 = vmul.f32 1.442695, %v2332_v5 }
0x100c   :  { %v4867_v32 = vpop.eup %3531  ;;  %v2477_v39 = vpop.xlane.xlu0 %2476 }
0x100d   :  { %3533 = vpow2.f32 %v2335_v60  ;;  %v2481_v34 = vsub.f32 %v4807_v17, %v2477_v39  ;;  %v2490_v36 = vsel %vm5160_vm11, %v4867_v32, 0.0 }
0x100e   :  { %2491 = vadd.xlane.f32.xlu1 %v2490_v36 }
0x100f   :  { %v2483_v52 = vmul.f32 1.442695, %v2481_v34 }
0x1011   :  { %3535 = vpow2.f32 %v2483_v52  ;;  %v2627_v31 = vpop.xlane.xlu1 %2626 }
0x1012   :  { %v2631_v63 = vsub.f32 %v4816_v45, %v2627_v31 }
0x1014   :  { %v2633_v46 = vmul.f32 1.442695, %v2631_v63 }
0x1016   :  { %3537 = vpow2.f32 %v2633_v46 }
0x1018   :  { %v2630_v12 = vpop.xlane.xlu1 %2629 }
0x1019   :  { %v2632_v51 = vsub.f32 %v4826_v26, %v2630_v12 }
0x101a   :  { %v4874_v40 = vpop.eup %3533 }
0x101b   :  { %v2635_v23 = vmul.f32 1.442695, %v2632_v51  ;;  %v2340_v17 = vsel %vm5161_vm12, %v4874_v40, 0.0 }
0x101c   :  { %2341 = vadd.xlane.f32.xlu0 %v2340_v17 }
0x101d   :  { %3539 = vpow2.f32 %v2635_v23 }
0x101e   :  { %v4878_v57 = vpop.eup %3535 }
0x101f   :  { %v2487_v24 = vsel %vm5162_vm7, %v4878_v57, 0.0 }
0x1020   :  { %2488 = vadd.xlane.f32.xlu0 %v2487_v24 }
0x1023   :  { %v4882_v45 = vpop.eup %3537 }
0x1024   :  { %v2637_v29 = vsel %vm5156_vm5, %v4882_v45, 0.0 }
0x1025   :  { %2638 = vadd.xlane.f32.xlu0 %v2637_v29 }
0x102a   :  { %v4886_v26 = vpop.eup %3539 }
0x102b   :  { %v2640_v50 = vsel %vm5155_vm6, %v4886_v26, 0.0 }
0x102c   :  { %2641 = vadd.xlane.f32.xlu1 %v2640_v50 }
0x102d   :  { %v1795_v58 = vpop.xlane.xlu0 %1794 }
0x102e   :  { %3541 = vrcp.f32 %v1795_v58 }
0x103b   :  { %v3542_v9 = vpop.eup %3541 }
0x103c   :  { %v1797_v13 = vmul.f32 %v3542_v9, %v4831_v15 }
0x103e   :  { %1805 = vperm.xlu1 %3340, %v1797_v13   ;;  %1800 = vperm.xlu0 %3339, %v1797_v13  }
0x1042   :  { %3341 = vset.pattern.permute.xlu1 %v5163_v21 }
0x1043   :  { %1811 = vperm.xlu1 %3341, %v1797_v13  }
0x1047   :  { %3342 = vset.pattern.permute.xlu1 %v5164_v28 }
0x1048   :  { %1817 = vperm.xlu1 %3342, %v1797_v13  }
0x104c   :  { %3343 = vset.pattern.permute.xlu1 %v5165_v20 }
0x104d   :  { %1823 = vperm.xlu1 %3343, %v1797_v13  }
0x1051   :  { %3344 = vset.pattern.permute.xlu1 %v5166_v8 }
0x1056   :  { %v2179_v2 = vpop.xlane.xlu0 %2178 }
0x1057   :  { %3543 = vrcp.f32 %v2179_v2 }
0x105d   :  { %v2182_v44 = vpop.xlane.xlu0 %2181 }
0x105e   :  { %3545 = vrcp.f32 %v2182_v44 }
0x1064   :  { %v3544_v35 = vpop.eup %3543 }
0x1065   :  { %v2184_v15 = vmul.f32 %v3544_v35, %v4838_v42 }
0x1066   :  { %v1875_v43 = vpop.xlane.xlu1 %1874 }
0x1067   :  { %2189 = vperm.xlu0 %3339, %v2184_v15   ;;  %3547 = vrcp.f32 %v1875_v43 }
0x106b   :  { %v3546_v7 = vpop.eup %3545  ;;  %3346 = vset.pattern.permute.xlu0 %v5167_v53 }
0x106c   :  { %v2186_v48 = vmul.f32 %v3546_v7, %v4842_v27 }
0x106e   :  { %v1950_v56 = vpop.xlane.xlu1 %1949  ;;  %2204 = vperm.xlu0 %3346, %v2186_v48   ;;  %2194 = vperm.xlu1 %3344, %v2186_v48  }
0x106f   :  { %3549 = vrcp.f32 %v1950_v56 }
0x1072   :  { %3348 = vset.pattern.permute.xlu0 %v5164_v28  ;;  %3345 = vset.pattern.permute.xlu1 %v5167_v53 }
0x1073   :  { %2224 = vperm.xlu0 %3348, %v2184_v15   ;;  %2200 = vperm.xlu1 %3345, %v2184_v15  }
0x1074   :  { %v3548_v42 = vpop.eup %3547 }
0x1075   :  { %v1877_v27 = vmul.f32 %v3548_v42, %v4847_v0 }
0x1077   :  { %3351 = vset.pattern.permute.xlu0 %v5165_v20  ;;  %3347 = vset.pattern.permute.xlu1 %v5163_v21 }
0x1078   :  { %2240 = vperm.xlu0 %3351, %v2186_v48   ;;  %2212 = vperm.xlu1 %3347, %v2184_v15  }
0x1079   :  { %v2025_v41 = vpop.xlane.xlu0 %2024 }
0x107a   :  { %3551 = vrcp.f32 %v2025_v41 }
0x107c   :  { %v3550_v6 = vpop.eup %3549  ;;  %3353 = vset.pattern.permute.xlu0 %v5167_v53  ;;  %2216 = vperm.xlu1 %3347, %v2186_v48  }
0x107d   :  { %1885 = vperm.xlu0 %3353, %v1877_v27   ;;  %v1952_v10 = vmul.f32 %v3550_v6, %v4853_v55  ;;  %v2339_v55 = vpop.xlane.xlu1 %2338 }
0x1080   :  { %3349 = vset.pattern.permute.xlu1 %v5164_v28 }
0x1081   :  { %1960 = vperm.xlu0 %3353, %v1952_v10   ;;  %2228 = vperm.xlu1 %3349, %v2186_v48  }
0x1085   :  { %3350 = vset.pattern.permute.xlu1 %v5165_v20  ;;  %3361 = vset.pattern.permute.xlu0 %v5166_v8 }
0x1086   :  { %2236 = vperm.xlu1 %3350, %v2184_v15  }
0x1087   :  { %v3552_v61 = vpop.eup %3551 }
0x1088   :  { %v2027_v59 = vmul.f32 %v3552_v61, %v4857_v62 }
0x108a   :  { %3352 = vset.pattern.permute.xlu1 %v5166_v8  ;;  %2030 = vperm.xlu0 %3361, %v2027_v59  }
0x108b   :  { %1880 = vperm.xlu1 %3352, %v1877_v27  }
0x108f   :  { %3354 = vset.pattern.permute.xlu1 %v5163_v21 }
0x1090   :  { %1891 = vperm.xlu1 %3354, %v1877_v27  }
0x1094   :  { %3355 = vset.pattern.permute.xlu1 %v5164_v28 }
0x1095   :  { %1897 = vperm.xlu1 %3355, %v1877_v27  }
0x1097   :  { %v2492_v11 = vpop.xlane.xlu1 %2491 }
0x1099   :  { %3356 = vset.pattern.permute.xlu1 %v5165_v20 }
0x109a   :  { %1903 = vperm.xlu1 %3356, %v1877_v27  }
0x109e   :  { %3357 = vset.pattern.permute.xlu1 %v5166_v8 }
0x109f   :  { %1955 = vperm.xlu1 %3357, %v1952_v10  }
0x10a3   :  { %3358 = vset.pattern.permute.xlu1 %v5163_v21 }
0x10a4   :  { %1966 = vperm.xlu1 %3358, %v1952_v10  }
0x10a5   :  { %v2342_v0 = vpop.xlane.xlu0 %2341 }
0x10a6   :  { %3553 = vrcp.f32 %v2342_v0 }
0x10a7   :  { %3555 = vrcp.f32 %v2339_v55 }
0x10a8   :  { %3359 = vset.pattern.permute.xlu1 %v5164_v28 }
0x10a9   :  { %1972 = vperm.xlu1 %3359, %v1952_v10   ;;  %v2489_v62 = vpop.xlane.xlu0 %2488 }
0x10aa   :  { %3557 = vrcp.f32 %v2489_v62 }
0x10ab   :  { %3559 = vrcp.f32 %v2492_v11 }
0x10ad   :  { %3360 = vset.pattern.permute.xlu1 %v5165_v20 }
0x10ae   :  { %1978 = vperm.xlu1 %3360, %v1952_v10   ;;  %v2639_v39 = vpop.xlane.xlu0 %2638 }
0x10af   :  { %3561 = vrcp.f32 %v2639_v39 }
0x10b2   :  { %3362 = vset.pattern.permute.xlu1 %v5167_v53 }
0x10b3   :  { %v3554_v14 = vpop.eup %3553  ;;  %2035 = vperm.xlu1 %3362, %v2027_v59  }
0x10b4   :  { %v2346_v33 = vmul.f32 %v3554_v14, %v4874_v40  ;;  %v3556_v34 = vpop.eup %3555 }
0x10b5   :  { %v2642_v5 = vpop.xlane.xlu1 %2641  ;;  %v2344_v31 = vmul.f32 %v3556_v34, %v4861_v47 }
0x10b6   :  { %2354 = vperm.xlu0 %3361, %v2346_v33   ;;  %3563 = vrcp.f32 %v2642_v5 }
0x10b7   :  { %3363 = vset.pattern.permute.xlu1 %v5163_v21  ;;  %v3558_v63 = vpop.eup %3557 }
0x10b8   :  { %2041 = vperm.xlu1 %3363, %v2027_v59   ;;  %v4929_v23 = vmul.f32 %v3558_v63, %v4878_v57  ;;  %v3560_v47 = vpop.eup %3559 }
0x10b9   :  { %v1806_v60 = vpop.permute.xlu1 %1805  ;;  %v1801_v36 = vpop.permute.xlu0 %1800  ;;  %v4936_v58 = vmul.f32 %v3560_v47, %v4867_v32 }
0x10ba   :  { %3369 = vset.pattern.permute.xlu0 %v5163_v21  ;;  %v1808_v46 = vmul.f32 %v1806_v60, %v4473_v16  ;;  %v1803_v12 = vmul.f32 %v1801_v36, %v4477_v54 }
0x10bb   :  { %2376 = vperm.xlu0 %3369, %v2346_v33  }
0x10bc   :  { %3364 = vset.pattern.permute.xlu1 %v5164_v28  ;;  %v1809_v17 = vadd.f32 %v1808_v46, %v1803_v12  ;;  %v3562_v13 = vpop.eup %3561 }
0x10bd   :  { %2047 = vperm.xlu1 %3364, %v2027_v59   ;;  %v4945_v44 = vmul.f32 %v3562_v13, %v4882_v45 }
0x10be   :  { %v1812_v52 = vpop.permute.xlu1 %1811 }
0x10bf   :  { %3371 = vset.pattern.permute.xlu0 %v5165_v20  ;;  %v1814_v51 = vmul.f32 %v1812_v52, %v4486_v38 }
0x10c0   :  { %2396 = vperm.xlu0 %3371, %v2344_v31  }
0x10c1   :  { %3365 = vset.pattern.permute.xlu1 %v5165_v20  ;;  %v1815_v29 = vadd.f32 %v1814_v51, %v1809_v17 }
0x10c2   :  { %2053 = vperm.xlu1 %3365, %v2027_v59  }
0x10c3   :  { %v1818_v40 = vpop.permute.xlu1 %1817  ;;  %v3564_v32 = vpop.eup %3563 }
0x10c4   :  { %3373 = vset.pattern.permute.xlu0 %v5166_v8  ;;  %v1820_v24 = vmul.f32 %v1818_v40, %v4491_v1  ;;  %v4950_v35 = vmul.f32 %v3564_v32, %v4886_v26 }
0x10c5   :  { %2499 = vperm.xlu0 %3373, %v4929_v23  }
0x10c6   :  { %3366 = vset.pattern.permute.xlu1 %v5166_v8  ;;  %v1821_v9 = vadd.f32 %v1820_v24, %v1815_v29 }
0x10c7   :  { %2349 = vperm.xlu1 %3366, %v2344_v31  }
0x10c8   :  { %v1824_v50 = vpop.permute.xlu1 %1823 }
0x10c9   :  { %v1826_v57 = vmul.f32 %v1824_v50, %v4500_v30  ;;  %3378 = vset.pattern.permute.xlu0 %v5164_v28 }
0x10ca   :  { %2538 = vperm.xlu0 %3378, %v4936_v58  }
0x10cb   :  { %v4941_v2 = vadd.f32 %v1826_v57, %v1821_v9  ;;  %3367 = vset.pattern.permute.xlu1 %v5167_v53 }
0x10cc   :  { %2360 = vperm.xlu1 %3367, %v2344_v31  }
0x10ce   :  { %3380 = vset.pattern.permute.xlu0 %v5166_v8 }
0x10cf   :  { %2649 = vperm.xlu0 %3380, %v4945_v44  }
0x10d0   :  { %2364 = vperm.xlu1 %3367, %v2346_v33  }
0x10d3   :  { %3385 = vset.pattern.permute.xlu0 %v5164_v28 }
0x10d4   :  { %3368 = vset.pattern.permute.xlu1 %v5163_v21  ;;  %2688 = vperm.xlu0 %3385, %v4950_v35  }
0x10d5   :  { %2372 = vperm.xlu1 %3368, %v2344_v31  }
0x10d8   :  { %3417 = vset.pattern.permute.xlu0 %v5165_v20 }
0x10d9   :  { %3370 = vset.pattern.permute.xlu1 %v5164_v28 }
0x10da   :  { %2384 = vperm.xlu1 %3370, %v2344_v31  }
0x10de   :  { %2388 = vperm.xlu1 %3370, %v2346_v33  }
0x10e2   :  { %3372 = vset.pattern.permute.xlu1 %v5165_v20  ;;  %v2190_v15 = vpop.permute.xlu0 %2189 }
0x10e3   :  { %2400 = vperm.xlu1 %3372, %v2346_v33   ;;  %v2197_v6 = vmul.f32 %v2190_v15, %v4505_v4 }
0x10e7   :  { %3374 = vset.pattern.permute.xlu1 %v5166_v8 }
0x10e8   :  { %2504 = vperm.xlu1 %3374, %v4936_v58  }
0x10e9   :  { %v2195_v45 = vpop.permute.xlu1 %2194  ;;  %v2205_v43 = vpop.permute.xlu0 %2204 }
0x10ea   :  { %v2198_v56 = vmul.f32 %v2195_v45, %v4505_v4  ;;  %v2208_v42 = vmul.f32 %v2205_v43, %v4521_v49 }
0x10ec   :  { %3375 = vset.pattern.permute.xlu1 %v5167_v53  ;;  %v2210_v59 = vadd.f32 %v2208_v42, %v2198_v56 }
0x10ed   :  { %2510 = vperm.xlu1 %3375, %v4929_v23  }
0x10ee   :  { %v2201_v26 = vpop.permute.xlu1 %2200  ;;  %v2225_v27 = vpop.permute.xlu0 %2224 }
0x10ef   :  { %v2207_v41 = vmul.f32 %v2201_v26, %v4521_v49  ;;  %v2231_v5 = vmul.f32 %v2225_v27, %v4529_v3 }
0x10f1   :  { %2514 = vperm.xlu1 %3375, %v4936_v58   ;;  %v2209_v0 = vadd.f32 %v2207_v41, %v2197_v6 }
0x10f3   :  { %v2213_v7 = vpop.permute.xlu1 %2212  ;;  %v2241_v33 = vpop.permute.xlu0 %2240 }
0x10f4   :  { %v2219_v10 = vmul.f32 %v2213_v7, %v4516_v19  ;;  %v2244_v34 = vmul.f32 %v2241_v33, %v4533_v25 }
0x10f5   :  { %3376 = vset.pattern.permute.xlu1 %v5163_v21 }
0x10f6   :  { %2522 = vperm.xlu1 %3376, %v4929_v23   ;;  %v2221_v11 = vadd.f32 %v2219_v10, %v2209_v0 }
0x10f7   :  { %v2217_v48 = vpop.permute.xlu1 %2216 }
0x10f8   :  { %v2220_v61 = vmul.f32 %v2217_v48, %v4516_v19  ;;  %v2233_v36 = vadd.f32 %v2231_v5, %v2221_v11  ;;  %v1886_v24 = vpop.permute.xlu0 %1885 }
0x10f9   :  { %v1888_v29 = vmul.f32 %v1886_v24, %v4473_v16 }
0x10fa   :  { %2526 = vperm.xlu1 %3376, %v4936_v58   ;;  %v2222_v14 = vadd.f32 %v2220_v61, %v2210_v59 }
0x10fc   :  { %v2229_v55 = vpop.permute.xlu1 %2228  ;;  %v1961_v15 = vpop.permute.xlu0 %1960 }
0x10fd   :  { %v2232_v62 = vmul.f32 %v2229_v55, %v4529_v3 }
0x10fe   :  { %3377 = vset.pattern.permute.xlu1 %v5164_v28 }
0x10ff   :  { %2534 = vperm.xlu1 %3377, %v4929_v23   ;;  %v2234_v60 = vadd.f32 %v2232_v62, %v2222_v14 }
0x1101   :  { %v2237_v39 = vpop.permute.xlu1 %2236  ;;  %v2246_v31 = vadd.f32 %v2244_v34, %v2234_v60 }
0x1102   :  { %v2243_v52 = vmul.f32 %v2237_v39, %v4533_v25 }
0x1103   :  { %3379 = vset.pattern.permute.xlu1 %v5165_v20 }
0x1104   :  { %v2245_v63 = vadd.f32 %v2243_v52, %v2233_v36  ;;  %2546 = vperm.xlu1 %3379, %v4929_v23  }
0x1105   :  { %v2031_v7 = vpop.permute.xlu0 %2030 }
0x1106   :  { %v3387_v46 = vpack.i.bf16 %v2246_v31, %v2245_v63  ;;  %v1881_v12 = vpop.permute.xlu1 %1880  ;;  %v2033_v42 = vmul.f32 %v2031_v7, %v4477_v54 }
0x1108   :  { %2550 = vperm.xlu1 %3379, %v4936_v58   ;;  %3388 = vrot.lane.b32.xlu0 %v3387_v46, %s3608_s20 }
0x110b   :  { %v1892_v51 = vpop.permute.xlu1 %1891 }
0x110c   :  { %3381 = vset.pattern.permute.xlu1 %v5166_v8  ;;  %v1883_v8 = vmul.f32 %v1881_v12, %v4477_v54 }
0x110d   :  { %2654 = vperm.xlu1 %3381, %v4950_v35  }
0x110e   :  { %v1889_v58 = vadd.f32 %v1888_v29, %v1883_v8 }
0x1110   :  { %v1898_v40 = vpop.permute.xlu1 %1897 }
0x1111   :  { %3382 = vset.pattern.permute.xlu1 %v5167_v53  ;;  %v1894_v53 = vmul.f32 %v1892_v51, %v4486_v38 }
0x1112   :  { %2660 = vperm.xlu1 %3382, %v4945_v44  }
0x1113   :  { %v1895_v9 = vadd.f32 %v1894_v53, %v1889_v58 }
0x1115   :  { %v1904_v47 = vpop.permute.xlu1 %1903 }
0x1116   :  { %2664 = vperm.xlu1 %3382, %v4950_v35   ;;  %v1906_v57 = vmul.f32 %v1904_v47, %v4500_v30 }
0x111a   :  { %v1956_v23 = vpop.permute.xlu1 %1955  ;;  %3383 = vset.pattern.permute.xlu1 %v5163_v21  ;;  %v1900_v21 = vmul.f32 %v1898_v40, %v4491_v1 }
0x111b   :  { %2672 = vperm.xlu1 %3383, %v4945_v44   ;;  %v1958_v48 = vmul.f32 %v1956_v23, %v4477_v54 }
0x111c   :  { %v1901_v13 = vadd.f32 %v1900_v21, %v1895_v9 }
0x111e   :  { %v1907_v45 = vadd.f32 %v1906_v57, %v1901_v13 }
0x111f   :  { %v1967_v17 = vpop.permute.xlu1 %1966  ;;  %2676 = vperm.xlu1 %3383, %v4950_v35  }
0x1123   :  { %3384 = vset.pattern.permute.xlu1 %v5164_v28  ;;  %v3392_v28 = vpack.i.bf16 %v1907_v45, %v4941_v2 }
0x1124   :  { %v1973_v50 = vpop.permute.xlu1 %1972  ;;  %2684 = vperm.xlu1 %3384, %v4945_v44  }
0x1125   :  { %v1975_v2 = vmul.f32 %v1973_v50, %v4491_v1 }
0x1128   :  { %3386 = vset.pattern.permute.xlu1 %v5165_v20  ;;  %v1963_v20 = vmul.f32 %v1961_v15, %v4473_v16 }
0x1129   :  { %v1979_v32 = vpop.permute.xlu1 %1978  ;;  %2696 = vperm.xlu1 %3386, %v4945_v44   ;;  %v1969_v44 = vmul.f32 %v1967_v17, %v4486_v38 }
0x112a   :  { %v1964_v27 = vadd.f32 %v1963_v20, %v1958_v48  ;;  %v1981_v59 = vmul.f32 %v1979_v32, %v4500_v30 }
0x112c   :  { %v1970_v61 = vadd.f32 %v1969_v44, %v1964_v27 }
0x112d   :  { %2700 = vperm.xlu1 %3386, %v4950_v35  }
0x112e   :  { %v2036_v26 = vpop.permute.xlu1 %2035  ;;  %v1976_v62 = vadd.f32 %v1975_v2, %v1970_v61 }
0x112f   :  { %v2038_v56 = vmul.f32 %v2036_v26, %v4473_v16 }
0x1130   :  { %v1982_v11 = vadd.f32 %v1981_v59, %v1976_v62 }
0x1131   :  { %3393 = vrot.lane.b32.xlu1 %v3392_v28, %s3608_s20  ;;  %v2039_v6 = vadd.f32 %v2038_v56, %v2033_v42  ;;  %v2355_v39 = vpop.permute.xlu0 %2354 }
0x1132   :  { %v2358_v63 = vmul.f32 %v2355_v39, %v4505_v4 }
0x1133   :  { %v2042_v43 = vpop.permute.xlu1 %2041 }
0x1134   :  { %v2044_v35 = vmul.f32 %v2042_v43, %v4486_v38 }
0x1136   :  { %v2045_v0 = vadd.f32 %v2044_v35, %v2039_v6  ;;  %v2377_v31 = vpop.permute.xlu0 %2376 }
0x1137   :  { %v2380_v23 = vmul.f32 %v2377_v31, %v4516_v19 }
0x1138   :  { %v2048_v41 = vpop.permute.xlu1 %2047 }
0x1139   :  { %v2050_v10 = vmul.f32 %v2048_v41, %v4491_v1 }
0x113b   :  { %v2051_v16 = vadd.f32 %v2050_v10, %v2045_v0  ;;  %v2397_v8 = vpop.permute.xlu0 %2396  ;;  %v3445_v10 = vld [vmem:[%s5132_s3 + $0x18] sm:$0xff]  }
0x113c   :  { %v2403_v58 = vmul.f32 %v2397_v8, %v4533_v25  ;;  %3221 = vmatpush3.bf16.msra.mxu1 %v3445_v10  ;;  %v3446_v8 = vld [vmem:[%s5132_s3 + $0x10] sm:$0xff]  }
0x113d   :  { %v2054_v55 = vpop.permute.xlu1 %2053  ;;  %3222 = vmatprep.subr.bf16.mxu1 %v3598_v37 }
0x113e   :  { %v2056_v54 = vmul.f32 %v2054_v55, %v4500_v30 }
0x1140   :  { %v2057_v14 = vadd.f32 %v2056_v54, %v2051_v16  ;;  %v2500_v7 = vpop.permute.xlu0 %2499  ;;  %3223 = vmatpush3.bf16.msra.mxu1 %v3446_v8 }
0x1141   :  { %v2507_v35 = vmul.f32 %v2500_v7, %v4505_v4  ;;  %3228 = vmatprep.subr.bf16.mxu1 %v3598_v37 }
0x1142   :  { %v3397_v33 = vpack.i.bf16 %v2057_v14, %v1982_v11  ;;  %v2350_v38 = vpop.permute.xlu1 %2349 }
0x1143   :  { %v2357_v30 = vmul.f32 %v2350_v38, %v4505_v4 }
0x1144   :  { %3398 = vrot.lane.b32.xlu1 %v3397_v33, %s3608_s20 }
0x1145   :  { %v2539_v2 = vpop.permute.xlu0 %2538 }
0x1146   :  { %v2542_v55 = vmul.f32 %v2539_v2, %v4529_v3 }
0x1147   :  { %v2361_v5 = vpop.permute.xlu1 %2360 }
0x1148   :  { %v2367_v1 = vmul.f32 %v2361_v5, %v4521_v49 }
0x114a   :  { %v2369_v12 = vadd.f32 %v2367_v1, %v2357_v30  ;;  %v2650_v31 = vpop.permute.xlu0 %2649 }
0x114b   :  { %v2365_v60 = vpop.permute.xlu1 %2364 }
0x114c   :  { %v2368_v36 = vmul.f32 %v2365_v60, %v4521_v49 }
0x114e   :  { %v2370_v51 = vadd.f32 %v2368_v36, %v2358_v63 }
0x1150   :  { %v2373_v34 = vpop.permute.xlu1 %2372  ;;  %v2382_v53 = vadd.f32 %v2380_v23, %v2370_v51 }
0x1151   :  { %v2379_v46 = vmul.f32 %v2373_v34, %v4516_v19 }
0x1153   :  { %v2381_v17 = vadd.f32 %v2379_v46, %v2369_v12 }
0x1155   :  { %v2385_v52 = vpop.permute.xlu1 %2384 }
0x1156   :  { %v2391_v40 = vmul.f32 %v2385_v52, %v4529_v3 }
0x1158   :  { %v2393_v29 = vadd.f32 %v2391_v40, %v2381_v17  ;;  %v2657_v40 = vmul.f32 %v2650_v31, %v4505_v4  ;;  %v2689_v17 = vpop.permute.xlu0 %2688 }
0x1159   :  { %v2389_v47 = vpop.permute.xlu1 %2388 }
0x115a   :  { %v2392_v24 = vmul.f32 %v2389_v47, %v4529_v3  ;;  %v2405_v57 = vadd.f32 %v2403_v58, %v2393_v29 }
0x115c   :  { %v2394_v21 = vadd.f32 %v2392_v24, %v2382_v53 }
0x115e   :  { %v2401_v50 = vpop.permute.xlu1 %2400 }
0x115f   :  { %v2404_v9 = vmul.f32 %v2401_v50, %v4533_v25 }
0x1161   :  { %v2406_v13 = vadd.f32 %v2404_v9, %v2394_v21 }
0x1163   :  { %v3402_v32 = vpack.i.bf16 %v2406_v13, %v2405_v57  ;;  %v2505_v45 = vpop.permute.xlu1 %2504 }
0x1164   :  { %v2508_v20 = vmul.f32 %v2505_v45, %v4505_v4 }
0x1165   :  { %3403 = vrot.lane.b32.xlu1 %v3402_v32, %s3608_s20 }
0x1168   :  { %v2511_v26 = vpop.permute.xlu1 %2510 }
0x1169   :  { %v2517_v42 = vmul.f32 %v2511_v26, %v4521_v49 }
0x116b   :  { %v2519_v61 = vadd.f32 %v2517_v42, %v2507_v35 }
0x116c   :  { %v2515_v28 = vpop.permute.xlu1 %2514 }
0x116d   :  { %v2518_v48 = vmul.f32 %v2515_v28, %v4521_v49 }
0x116f   :  { %v2520_v41 = vadd.f32 %v2518_v48, %v2508_v20 }
0x1171   :  { %v2523_v15 = vpop.permute.xlu1 %2522 }
0x1172   :  { %v2529_v27 = vmul.f32 %v2523_v15, %v4516_v19 }
0x1174   :  { %v2531_v62 = vadd.f32 %v2529_v27, %v2519_v61 }
0x1175   :  { %v2527_v43 = vpop.permute.xlu1 %2526 }
0x1176   :  { %v2530_v44 = vmul.f32 %v2527_v43, %v4516_v19 }
0x1178   :  { %v2532_v59 = vadd.f32 %v2530_v44, %v2520_v41 }
0x117a   :  { %v2535_v56 = vpop.permute.xlu1 %2534  ;;  %v2544_v14 = vadd.f32 %v2542_v55, %v2532_v59  ;;  %v3389_v15 = vpop.permute.xlu0 %3388 }
0x117b   :  { %v2541_v0 = vmul.f32 %v2535_v56, %v4529_v3  ;;  %v3391_v41 = vunpack.i.h.bf16 %v3389_v15  ;;  %v3390_v27 = vunpack.i.l.bf16 %v3389_v15 }
0x117d   :  { %v2543_v11 = vadd.f32 %v2541_v0, %v2531_v62 }
0x117f   :  { %v2547_v6 = vpop.permute.xlu1 %2546 }
0x1180   :  { %v2553_v16 = vmul.f32 %v2547_v6, %v4533_v25 }
0x1182   :  { %v2555_v38 = vadd.f32 %v2553_v16, %v2543_v11 }
0x1183   :  { %v2551_v54 = vpop.permute.xlu1 %2550 }
0x1184   :  { %v2554_v33 = vmul.f32 %v2551_v54, %v4533_v25 }
0x1186   :  { %v2556_v5 = vadd.f32 %v2554_v33, %v2544_v14 }
0x1188   :  { %v3407_v60 = vpack.i.bf16 %v2556_v5, %v2555_v38  ;;  %v2655_v39 = vpop.permute.xlu1 %2654  ;;  %v3121_v5 = vld [vmem:[%s5135_s6 + $0x10] ss:$0 sm:$0xff] }
0x1189   :  { %v2658_v46 = vmul.f32 %v2655_v39, %v4505_v4 }
0x118a   :  { %3408 = vrot.lane.b32.xlu0 %v3407_v60, %s3608_s20 }
0x118d   :  { %v2661_v34 = vpop.permute.xlu1 %2660 }
0x118e   :  { %v2667_v12 = vmul.f32 %v2661_v34, %v4521_v49 }
0x1190   :  { %v2669_v29 = vadd.f32 %v2667_v12, %v2657_v40 }
0x1191   :  { %v2665_v1 = vpop.permute.xlu1 %2664 }
0x1192   :  { %v2668_v63 = vmul.f32 %v2665_v1, %v4521_v49  ;;  %v2692_v49 = vmul.f32 %v2689_v17, %v4529_v3 }
0x1194   :  { %v2670_v47 = vadd.f32 %v2668_v63, %v2658_v46 }
0x1196   :  { %v2673_v36 = vpop.permute.xlu1 %2672 }
0x1197   :  { %v2679_v23 = vmul.f32 %v2673_v36, %v4516_v19 }
0x1199   :  { %v2681_v58 = vadd.f32 %v2679_v23, %v2669_v29  ;;  %v3447_v29 = vld [vmem:[%s5133_s4 + $0x18] sm:$0xff]  }
0x119a   :  { %v2677_v52 = vpop.permute.xlu1 %2676 }
0x119b   :  { %v2680_v51 = vmul.f32 %v2677_v52, %v4516_v19 }
0x119d   :  { %v2682_v53 = vadd.f32 %v2680_v51, %v2670_v47 }
0x119f   :  { %v2685_v30 = vpop.permute.xlu1 %2684  ;;  %v2694_v9 = vadd.f32 %v2692_v49, %v2682_v53  ;;  %v3448_v53 = vld [vmem:[%s5133_s4 + $0x10] sm:$0xff]  }
0x11a0   :  { %v2691_v50 = vmul.f32 %v2685_v30, %v4529_v3 }
0x11a2   :  { %v2693_v19 = vadd.f32 %v2691_v50, %v2681_v58 }
0x11a4   :  { %v2697_v24 = vpop.permute.xlu1 %2696 }
0x11a5   :  { %v2703_v21 = vmul.f32 %v2697_v24, %v4533_v25 }
0x11a7   :  { %v2705_v13 = vadd.f32 %v2703_v21, %v2693_v19 }
0x11a8   :  { %v2701_v4 = vpop.permute.xlu1 %2700 }
0x11a9   :  { %v2704_v57 = vmul.f32 %v2701_v4, %v4533_v25 }
0x11ab   :  { %v2706_v32 = vadd.f32 %v2704_v57, %v2694_v9 }
0x11ac   :  { %v3394_v26 = vpop.permute.xlu1 %3393 }
0x11ad   :  { %v3412_v45 = vpack.i.bf16 %v2706_v32, %v2705_v13  ;;  %v3396_v3 = vunpack.i.h.bf16 %v3394_v26  ;;  %v3395_v7 = vunpack.i.l.bf16 %v3394_v26  ;;  %v3122_v13 = vld [vmem:[%s5135_s6 + $0x11] ss:$0 sm:$0xff] }
0x11af   :  { %3413 = vrot.lane.b32.xlu1 %v3412_v45, %s3608_s20  ;;  %v2074_v25 = vsel %vm657_vm15, %v3395_v7, %v3396_v3 }
0x11b6   :  { %v3399_v28 = vpop.permute.xlu1 %3398 }
0x11b7   :  { %v3400_v56 = vunpack.i.l.bf16 %v3399_v28  ;;  %v3401_v2 = vunpack.i.h.bf16 %v3399_v28  ;;  %v3123_v28 = vld [vmem:[%s5135_s6 + $0x12] ss:$0 sm:$0xff] }
0x11b9   :  { %v2075_v6 = vsel %vm659_vm14, %v2074_v25, %v3400_v56  ;;  %v3450_v56 = vld [vmem:[%s5134_s5 + $0x30] sm:$0xff]  }
0x11ba   :  { %v2076_v54 = vsel %vm661_vm13, %v2075_v6, %v3401_v2 }
0x11d7   :  { %v3404_v43 = vpop.permute.xlu1 %3403 }
0x11d8   :  { %v3406_v20 = vunpack.i.h.bf16 %v3404_v43  ;;  %v3405_v42 = vunpack.i.l.bf16 %v3404_v43 }
0x11da   :  { %v2739_v61 = vsel %vm657_vm15, %v3390_v27, %v3405_v42  ;;  %v2740_v59 = vsel %vm657_vm15, %v3391_v41, %v3406_v20  ;;  %v3451_v20 = vld [vmem:[%s5134_s5 + $0x28] sm:$0xff]   ;;  %v3452_v42 = vld [vmem:[%s5134_s5 + $0x20] sm:$0xff]  }
0x11fc   :  { %v3409_v48 = vpop.permute.xlu0 %3408 }
0x11fd   :  { %v3411_v44 = vunpack.i.h.bf16 %v3409_v48  ;;  %v3410_v35 = vunpack.i.l.bf16 %v3409_v48  ;;  %v3449_v48 = vld [vmem:[%s5134_s5 + $0x38] sm:$0xff]  }
0x11fe   :  { %3237 = vmatpush3.bf16.msra.mxu0 %v3449_v48 }
0x11ff   :  { %v2741_v62 = vsel %vm659_vm14, %v2739_v61, %v3410_v35  ;;  %v2742_v16 = vsel %vm659_vm14, %v2740_v59, %v3411_v44  ;;  %3238 = vmatprep.subr.bf16.mxu0 %v3598_v37  ;;  %v3128_v44 = vld [vmem:[%s5135_s6 + $0x13] ss:$0 sm:$0xff] }
0x1202   :  { %3239 = vmatpush3.bf16.msra.mxu0 %v3450_v56 }
0x1203   :  { %3240 = vmatprep.subr.bf16.mxu0 %v3598_v37 }
0x1206   :  { %3241 = vmatpush3.bf16.msra.mxu0 %v3451_v20 }
0x1207   :  { %3242 = vmatprep.subr.bf16.mxu0 %v3598_v37 }
0x120a   :  { %3243 = vmatpush3.bf16.msra.mxu0 %v3452_v42 }
0x1221   :  { %v3414_v10 = vpop.permute.xlu1 %3413 }
0x1222   :  { %v3416_v0 = vunpack.i.h.bf16 %v3414_v10  ;;  %v3415_v55 = vunpack.i.l.bf16 %v3414_v10 }
0x1224   :  { %v2743_v11 = vsel %vm661_vm13, %v2741_v62, %v3415_v55  ;;  %v2744_v14 = vsel %vm661_vm13, %v2742_v16, %v3416_v0 }
0x1225   :  { %v2745_v33 = vsel %vm32_vm1, %v2076_v54, %v2743_v11  ;;  %vm3026_vm1 = vcmask 1040384  }
0x1226   :  { %v2746_v38 = vpack.c.bf16 %v2744_v14, %v2745_v33 }
0x1228   :  { %3225 = vmatmul.mubr.msk.bf16.vlgmr.msra.gmra.mxu1 %vm194_vm2, %v2746_v38 }
0x1229   :  { %3232 = vmatprep.mubr.msk.bf16.mxu1 %vm3599_vm4, %v3598_v37  ;;  %3229 = vmatpush3.bf16.msra.mxu1 %v3447_v29 }
0x122a   :  { %3230 = vmatprep.subr.bf16.mxu1 %v3598_v37 }
0x122d   :  { %3231 = vmatpush3.bf16.msra.mxu1 %v3448_v53 }
0x12e8   :  { %v2801_v60 = vpop.f32.mrf.mxu1 }
0x12e9   :  { %v2808_v39 = vadd.f32 %v2801_v60, %v4436_v22 }
0x12ea   :  { %v3226_v34 = vpop.f32.mrf.mxu1 }
0x12eb   :  { %v5071_v1 = vadd.f32 %v3121_v5, %v2808_v39 }
0x12ec   :  { %v2804_v36 = vpop.f32.mrf.mxu1 }
0x12ed   :  { %v2809_v52 = vadd.f32 %v2804_v36, %v4441_v18  ;;  %v2816_v31 = vsel %vm194_vm2, %v5071_v1, 0.0 }
0x12ee   :  { %2817 = vadd.xlane.f32.xlu0 %v2816_v31  ;;  %v3227_v63 = vpop.f32.mrf.mxu1  ;;  %v3145_v31 = vld [vmem:[%s5135_s6 + $0x14] ss:$0 sm:$0xff] }
0x12ef   :  { %v2815_v30 = vadd.f32 %v3121_v5, %v2809_v52 }
0x12f1   :  { %v2819_v46 = vsel %vm198_vm3, %v2815_v30, 0.0 }
0x12f2   :  { %2820 = vadd.xlane.f32.xlu1 %v2819_v46 }
0x1377   :  { %v2818_v12 = vpop.xlane.xlu0 %2817 }
0x1378   :  { %v2822_v51 = vmul.f32 0.03125, %v2818_v12 }
0x137a   :  { %v2824_v40 = vsub.f32 %v5071_v1, %v2822_v51 }
0x137b   :  { %v2821_v22 = vpop.xlane.xlu1 %2820 }
0x137c   :  { %v2823_v47 = vmul.f32 0.03125, %v2821_v22  ;;  %v2826_v23 = vmul.f32 %v2824_v40, %v2824_v40 }
0x137e   :  { %v2825_v17 = vsub.f32 %v2815_v30, %v2823_v47  ;;  %v2828_v24 = vsel %vm194_vm2, %v2826_v23, 0.0 }
0x137f   :  { %2829 = vadd.xlane.f32.xlu0 %v2828_v24 }
0x1380   :  { %v2827_v18 = vmul.f32 %v2825_v17, %v2825_v17 }
0x1382   :  { %v2831_v8 = vsel %vm198_vm3, %v2827_v18, 0.0 }
0x1383   :  { %2832 = vadd.xlane.f32.xlu0 %v2831_v8 }
0x1408   :  { %v2830_v50 = vpop.xlane.xlu0 %2829 }
0x1409   :  { %v2834_v49 = vmul.f32 0.03125, %v2830_v50 }
0x140b   :  { %v2836_v58 = vadd.f32 1e-06, %v2834_v49 }
0x140c   :  { %v2833_v21 = vpop.xlane.xlu0 %2832 }
0x140d   :  { %3565 = vrsqrt.f32 %v2836_v58  ;;  %v2835_v4 = vmul.f32 0.03125, %v2833_v21  ;;  %v3146_v58 = vld [vmem:[%s5135_s6 + $0x15] ss:$0 sm:$0xff] }
0x140f   :  { %v2837_v19 = vadd.f32 1e-06, %v2835_v4  ;;  %v3147_v4 = vld [vmem:[%s5135_s6 + $0x16] ss:$0 sm:$0xff] }
0x1411   :  { %3567 = vrsqrt.f32 %v2837_v19 }
0x141a   :  { %v3566_v9 = vpop.eup %3565 }
0x141b   :  { %v2840_v57 = vmul.f32 %v3566_v9, %v2824_v40 }
0x141d   :  { %v2846_v26 = vmul.f32 %v3122_v13, %v2840_v57 }
0x141e   :  { %v3568_v32 = vpop.eup %3567 }
0x141f   :  { %v2841_v45 = vmul.f32 %v3568_v32, %v2825_v17  ;;  %v2852_v43 = vadd.f32 %v3123_v28, %v2846_v26 }
0x1421   :  { %v2847_v15 = vmul.f32 %v3122_v13, %v2841_v45 }
0x1423   :  { %v2853_v3 = vadd.f32 %v3123_v28, %v2847_v15 }
0x1425   :  { %v2854_v7 = vpack.c.bf16 %v2853_v3, %v2852_v43 }
0x1427   :  { %3233 = vmatmul.mubr.msk.bf16.vlgmr.msra.gmra.mxu1 %vm194_vm2, %v2854_v7 }
0x14e7   :  { %v2913_v35 = vpop.f32.mrf.mxu1 }
0x14e8   :  { %v2914_v41 = vadd.f32 %v3128_v44, %v2913_v35 }
0x14e9   :  { %v3234_v27 = vpop.f32.mrf.mxu1 }
0x14ea   :  { %v2922_v25 = vmul.f32 0.044715, %v2914_v41  ;;  %v2920_v5 = vmul.f32 0.5, %v2914_v41 }
0x14eb   :  { %v2916_v2 = vpop.f32.mrf.mxu1 }
0x14ec   :  { %v2924_v6 = vmul.f32 %v2922_v25, %v2914_v41  ;;  %v2917_v10 = vadd.f32 %v3128_v44, %v2916_v2 }
0x14ed   :  { %v3235_v61 = vpop.f32.mrf.mxu1 }
0x14ee   :  { %v2926_v59 = vmul.f32 %v2924_v6, %v2914_v41  ;;  %v2923_v0 = vmul.f32 0.044715, %v2917_v10  ;;  %v2921_v60 = vmul.f32 0.5, %v2917_v10 }
0x14f0   :  { %v2928_v55 = vadd.f32 %v2926_v59, %v2914_v41  ;;  %v2925_v62 = vmul.f32 %v2923_v0, %v2917_v10 }
0x14f2   :  { %v2930_v16 = vmul.f32 0.7978846, %v2928_v55  ;;  %v2927_v54 = vmul.f32 %v2925_v62, %v2917_v10 }
0x14f4   :  { %3569 = vtanh.f32 %v2930_v16  ;;  %v2929_v37 = vadd.f32 %v2927_v54, %v2917_v10 }
0x14f6   :  { %v2931_v11 = vmul.f32 0.7978846, %v2929_v37 }
0x14f8   :  { %3571 = vtanh.f32 %v2931_v11 }
0x1501   :  { %v3570_v14 = vpop.eup %3569 }
0x1502   :  { %v2934_v33 = vadd.f32 1.0, %v3570_v14 }
0x1504   :  { %v2936_v34 = vmul.f32 %v2934_v33, %v2920_v5 }
0x1505   :  { %v3572_v38 = vpop.eup %3571 }
0x1506   :  { %v2935_v39 = vadd.f32 1.0, %v3572_v38 }
0x1508   :  { %v2937_v36 = vmul.f32 %v2935_v39, %v2921_v60 }
0x150a   :  { %v2938_v52 = vpack.c.bf16 %v2937_v36, %v2936_v34 }
0x150c   :  { %3245 = vmatmul.mubr.msk.bf16.vlgmr.msra.gmra.mxu0 %vm141_vm0, %v2938_v52 }
0x15cc   :  { %v3009_v63 = vpop.f32.mrf.mxu0 }
0x15cd   :  { %v3015_v30 = vadd.f32 %v3009_v63, %v5071_v1 }
0x15ce   :  { %v3246_v46 = vpop.f32.mrf.mxu0 }
0x15cf   :  { %v3020_v12 = vadd.f32 %v3145_v31, %v3015_v30 }
0x15d0   :  { %v3012_v51 = vpop.f32.mrf.mxu0 }
0x15d1   :  { %v3024_v40 = vrot.slane %v3020_v12, 4 }
0x15d2   :  { %v3247_v22 = vpop.f32.mrf.mxu0 }
0x15d3   :  { %v3027_v47 = vsel %vm3026_vm1, %v3020_v12, %v3024_v40 }
0x15d4   :  { %v3028_v23 = vsel %vm198_vm3, %v3027_v47, 0.0 }
0x15d5   :  { %3029 = vadd.xlane.f32.xlu1 %v3028_v23 }
0x165e   :  { %v3030_v17 = vpop.xlane.xlu1 %3029 }
0x165f   :  { %v3031_v24 = vmul.f32 0.03125, %v3030_v17 }
0x1661   :  { %v3032_v18 = vsub.f32 %v3027_v47, %v3031_v24 }
0x1663   :  { %v3033_v8 = vmul.f32 %v3032_v18, %v3032_v18 }
0x1665   :  { %v3034_v29 = vsel %vm198_vm3, %v3033_v8, 0.0 }
0x1666   :  { %3035 = vadd.xlane.f32.xlu0 %v3034_v29 }
0x16ef   :  { %v3036_v53 = vpop.xlane.xlu0 %3035 }
0x16f0   :  { %v3037_v50 = vmul.f32 0.03125, %v3036_v53 }
0x16f2   :  { %v3038_v1 = vadd.f32 1e-06, %v3037_v50 }
0x16f4   :  { %3573 = vrsqrt.f32 %v3038_v1 }
0x1701   :  { %v3574_v49 = vpop.eup %3573 }
0x1702   :  { %v3040_v21 = vmul.f32 %v3574_v49, %v3032_v18 }
0x1704   :  { %v3045_v19 = vmul.f32 %v3146_v58, %v3040_v21 }
0x1706   :  { %v3050_v9 = vadd.f32 %v3147_v4, %v3045_v19 }
0x1708   :  { %v3051_v57 = vsel %vm194_vm2, %v3050_v9, 0.0 }
0x1709   :  { %3052 = vst [vmem:[#allocation2] sm:$0x3] %v3051_v57 }
0x170a   :  { %3586 = shalt.err (!%p3583_p4)
}
0x170b   :  { %3062 = dma.vmem_to_hbm [thread:$0]  %s3060_s18, 32, %s5136_s7, [#allocation3]  }
0x170c   :  { %3595 = dma.done.wait [#allocation3], 32  }
0x170d   :  { %3596 = vsyncadd [#allocation3], 4294967264 }
0x170e   :  { %3066 = vsyncpa [#allocation3], 1 }

</bundles_post_ra>
